<compile_context>
chip_gen: v7x
topology: tpu7x:2x2x1
jax: 0.10.0
libtpu: 0.0.40
codegen_flags: <defaults>
</compile_context>

<pallas_src>
import jax
import jax.numpy as jnp
from jax.experimental import pallas as pl
from jax.experimental.pallas import tpu as pltpu


def _neural_ode_kernel(t_ref,                # (T,)     f32, SMEM (scalar dt reads)
                       ts_ref,               # (2T-1,1) f32, VMEM (stage times)
                       y0_ref,               # (BB, D)  f32, VMEM (batch tile)
                       w1_ref, b1_ref, wt_ref, w2_ref, b2_ref,   # VMEM params
                       out_ref):             # (T, BB, D) f32, VMEM output tile
    T = out_ref.shape[0]
    BB, D = y0_ref.shape

    # ---- hoisted invariant loads (once per batch tile) ---------------------
    wt = wt_ref[...]                                   # (1, H) f32
    b1 = b1_ref[...]                                   # (1, H) f32
    b2 = b2_ref[...]                                   # (1, D) f32
    w2 = w2_ref[...].astype(jnp.bfloat16)              # (H, D) bf16 MXU operand
    y0 = y0_ref[...].astype(jnp.float32)               # (BB, D)

    use_vpu_first_layer = D <= 8
    if use_vpu_first_layer:
        # Tiny contraction dim: do y @ W1 as D broadcast-FMAs on the VPU,
        # kept in f32 (exact; v5e has no bf16 VALU).
        w1f = w1_ref[...]                              # (D, H) f32
        w1_rows = [w1f[d:d + 1, :] for d in range(D)]  # D x (1, H)
    else:
        w1 = w1_ref[...].astype(jnp.bfloat16)          # (D, H) bf16

    # ---- all stage time-embeddings, vectorized, off the critical path ------
    # Stage times (from the wrapper): [t_0..t_{T-1}, m_0..m_{T-2}],
    # m_i = 0.5*(t_i + t_{i+1}).  emb[k] = t_stage[k]*Wt + b1.
    emb = ts_ref[...] * wt + b1                        # (2T-1, H) f32

    def vf(e, y):
        # f(t, y) = tanh(y @ W1 + (t*Wt + b1)) @ W2 + b2 with e = t*Wt + b1.
        if use_vpu_first_layer:
            acc = e
            for d in range(D):
                acc = acc + y[:, d:d + 1] * w1_rows[d]
            h = jnp.tanh(acc)                          # (BB, H) f32
        else:
            h = jnp.tanh(
                jnp.dot(y.astype(jnp.bfloat16), w1,
                        preferred_element_type=jnp.float32) + e)
        # H-contraction on the MXU in bf16 with f32 accumulation; the RK4
        # state / k-combination stays in f32.
        return jnp.dot(h.astype(jnp.bfloat16), w2,
                       preferred_element_type=jnp.float32) + b2

    # Solution at t[0] is the initial condition itself.
    out_ref[0] = y0.astype(out_ref.dtype)

    # Statically unrolled time loop (T small & compile-time known): static
    # store indices + full scheduler visibility across steps.
    # TODO(synk): for large T switch to lax.fori_loop(..., unroll=k) with a
    # chunked HBM writeback to bound VMEM and code size.
    y = y0
    for i in range(1, T):
        dt = t_ref[i] - t_ref[i - 1]                   # SMEM scalar

        e0 = emb[i - 1:i]                              # emb at t_{i-1}
        e1 = emb[i:i + 1]                              # emb at t_i
        em = emb[T + i - 1:T + i]                      # emb at midpoint

        k1 = vf(e0, y)
        k2 = vf(em, y + (0.5 * dt) * k1)
        k3 = vf(em, y + (0.5 * dt) * k2)
        k4 = vf(e1, y + dt * k3)
        y = y + (dt * (1.0 / 6.0)) * (k1 + 2.0 * (k2 + k3) + k4)

        out_ref[i] = y.astype(out_ref.dtype)


def _default_batch_block(B):
    """Pick the per-grid-step batch tile.

    v7x has 2 TensorCores per chip: split the batch in two (when it stays
    sublane-aligned, i.e. each tile a multiple of 8 f32 rows) so the
    "parallel" grid axis maps one tile per core.  On 1-TC chips (v5e/v6e)
    keep a single tile: the per-step work is latency-bound, so splitting a
    tiny batch would just run the serial RK4 chain twice.
    """
    try:
        kind = jax.devices()[0].device_kind.lower()
    except Exception:  # pragma: no cover - defensive, e.g. no devices yet
        kind = ""
    if "v7" in kind and B % 16 == 0:
        return B // 2
    return B


def neural_ode_rk4(y0, t, w1, b1, wt, w2, b2, *, batch_block=None):
    """Solve dy/dt = f(t, y) with fixed-step RK4 at the time points `t`.

    y0: (B, D) float32, t: (T,) float32.
    Returns (T, B, D) float32 — solution at each requested time point.
    """
    B, D = y0.shape
    T = t.shape[0]
    H = w1.shape[1]

    if batch_block is None:
        batch_block = _default_batch_block(B)
    assert B % batch_block == 0, "batch must be divisible by batch_block"
    num_b_tiles = B // batch_block

    t = t.astype(jnp.float32)
    # Stage times for the whole integration: endpoints then interval midpoints.
    t_mid = 0.5 * (t[:-1] + t[1:])
    t_stage = jnp.concatenate([t, t_mid]).reshape(2 * T - 1, 1)

    # VMEM budget (per tile): out (T*BB*D) + params + embeddings — tiny here.
    # TODO(synk): chunk T / writeback with make_async_copy once this grows
    # toward the 32 MiB scoped (64 MiB physical on v7x) VMEM limit.
    return pl.pallas_call(
        _neural_ode_kernel,
        out_shape=jax.ShapeDtypeStruct((T, B, D), jnp.float32),
        grid=(num_b_tiles,),
        in_specs=[
            pl.BlockSpec(memory_space=pltpu.MemorySpace.SMEM),       # t (scalars)
            pl.BlockSpec((2 * T - 1, 1), lambda b: (0, 0)),          # stage times
            pl.BlockSpec((batch_block, D), lambda b: (b, 0)),        # y0 tile
            pl.BlockSpec((D, H), lambda b: (0, 0)),                  # W1
            pl.BlockSpec((1, H), lambda b: (0, 0)),                  # b1
            pl.BlockSpec((1, H), lambda b: (0, 0)),                  # Wt
            pl.BlockSpec((H, D), lambda b: (0, 0)),                  # W2
            pl.BlockSpec((1, D), lambda b: (0, 0)),                  # b2
        ],
        out_specs=pl.BlockSpec((T, batch_block, D), lambda b: (0, b, 0)),
        compiler_params=pltpu.CompilerParams(
            dimension_semantics=("parallel",)),
    )(t, t_stage, y0, w1, b1, wt, w2, b2)


def _reference_solve(y0, t, w1, b1, wt, w2, b2):
    """Pure-JAX f32 RK4 reference for correctness checking."""
    hp = jax.lax.Precision.HIGHEST

    def f(ti, y):
        h = jnp.tanh(jnp.dot(y, w1, precision=hp) + ti * wt + b1)
        return jnp.dot(h, w2, precision=hp) + b2

    ys = [y0]
    y = y0
    for i in range(1, t.shape[0]):
        t0, t1 = t[i - 1], t[i]
        dt = t1 - t0
        tm = t0 + 0.5 * dt
        k1 = f(t0, y)
        k2 = f(tm, y + 0.5 * dt * k1)
        k3 = f(tm, y + 0.5 * dt * k2)
        k4 = f(t1, y + dt * k3)
        y = y + (dt / 6.0) * (k1 + 2.0 * k2 + 2.0 * k3 + k4)
        ys.append(y)
    return jnp.stack(ys, axis=0)


if __name__ == "__main__":
    # Small, deterministic setup: batch=16, state_dim=4, hidden=32, T=8.
    B, D, H, T = 16, 4, 32, 8
    key = jax.random.PRNGKey(0)
    k_y0, k_w1, k_b1, k_wt, k_w2, k_b2 = jax.random.split(key, 6)

    y0 = jax.random.normal(k_y0, (B, D), dtype=jnp.float32)
    t = jnp.linspace(0.0, 1.0, T, dtype=jnp.float32)

    # Deterministic MLP vector-field parameters (scaled for stability).
    w1 = 0.3 * jax.random.normal(k_w1, (D, H), dtype=jnp.float32)
    b1 = 0.1 * jax.random.normal(k_b1, (1, H), dtype=jnp.float32)
    wt = 0.1 * jax.random.normal(k_wt, (1, H), dtype=jnp.float32)
    w2 = 0.3 * jax.random.normal(k_w2, (H, D), dtype=jnp.float32)
    b2 = 0.1 * jax.random.normal(k_b2, (1, D), dtype=jnp.float32)

    # batch_block=8 -> grid=(2,): exercises the batch-parallel tiling path
    # (index maps / per-tile output blocks) on any TPU generation.
    out = neural_ode_rk4(y0, t, w1, b1, wt, w2, b2, batch_block=8)
    out = jax.block_until_ready(out)

    ref = _reference_solve(y0, t, w1, b1, wt, w2, b2)
    assert out.shape == (T, B, D)
    # Tolerance loosened vs. the pure-f32 version: the kernel runs the
    # H-contraction matmul in bf16 (f32 accumulation); RK4 state stays f32.
    assert jnp.allclose(out, ref, atol=2e-2, rtol=1e-2), (
        "mismatch vs reference: max abs err = "
        f"{float(jnp.max(jnp.abs(out - ref)))}")

    print("KERNEL_OK")
</pallas_src>

<mosaic_0001>
module attributes {stable_mosaic.version = 11 : i64} {
  func.func @_neural_ode_kernel(%arg0: i32, %arg1: memref<8xf32, #tpu.memory_space<smem>>, %arg2: memref<15x1xf32, #tpu.memory_space<vmem>>, %arg3: memref<8x4xf32, #tpu.memory_space<vmem>>, %arg4: memref<4x32xf32, #tpu.memory_space<vmem>>, %arg5: memref<1x32xf32, #tpu.memory_space<vmem>>, %arg6: memref<1x32xf32, #tpu.memory_space<vmem>>, %arg7: memref<32x4xf32, #tpu.memory_space<vmem>>, %arg8: memref<1x4xf32, #tpu.memory_space<vmem>>, %arg9: memref<8x8x4xf32, #tpu.memory_space<vmem>>) attributes {dimension_semantics = [#tpu.dimension_semantics<parallel>], iteration_bounds = array<i64: 2>, scalar_prefetch = 0 : i64, scratch_operands = 0 : i64, tpu.core_type = #tpu.core_type<tc>, window_params = [{transform_indices = @transform_0, window_bounds = array<i64: 8>}, {pipeline_mode = #tpu.pipeline_mode<synchronous>, transform_indices = @transform_1, window_bounds = array<i64: 15, 1>}, {transform_indices = @transform_2, window_bounds = array<i64: 8, 4>}, {pipeline_mode = #tpu.pipeline_mode<synchronous>, transform_indices = @transform_3, window_bounds = array<i64: 4, 32>}, {pipeline_mode = #tpu.pipeline_mode<synchronous>, transform_indices = @transform_4, window_bounds = array<i64: 1, 32>}, {pipeline_mode = #tpu.pipeline_mode<synchronous>, transform_indices = @transform_5, window_bounds = array<i64: 1, 32>}, {pipeline_mode = #tpu.pipeline_mode<synchronous>, transform_indices = @transform_6, window_bounds = array<i64: 32, 4>}, {pipeline_mode = #tpu.pipeline_mode<synchronous>, transform_indices = @transform_7, window_bounds = array<i64: 1, 4>}, {transform_indices = @transform_8, window_bounds = array<i64: 8, 8, 4>}]} {
    %c0 = arith.constant 0 : index
    %c0_0 = arith.constant 0 : index
    %0 = vector.load %arg6[%c0, %c0_0] : memref<1x32xf32, #tpu.memory_space<vmem>>, vector<1x32xf32>
    %c0_1 = arith.constant 0 : index
    %c0_2 = arith.constant 0 : index
    %1 = vector.load %arg5[%c0_1, %c0_2] : memref<1x32xf32, #tpu.memory_space<vmem>>, vector<1x32xf32>
    %c0_3 = arith.constant 0 : index
    %c0_4 = arith.constant 0 : index
    %2 = vector.load %arg8[%c0_3, %c0_4] : memref<1x4xf32, #tpu.memory_space<vmem>>, vector<1x4xf32>
    %c0_5 = arith.constant 0 : index
    %c0_6 = arith.constant 0 : index
    %3 = vector.load %arg7[%c0_5, %c0_6] : memref<32x4xf32, #tpu.memory_space<vmem>>, vector<32x4xf32>
    %4 = arith.truncf %3 : vector<32x4xf32> to vector<32x4xbf16>
    %c0_7 = arith.constant 0 : index
    %c0_8 = arith.constant 0 : index
    %5 = vector.load %arg3[%c0_7, %c0_8] : memref<8x4xf32, #tpu.memory_space<vmem>>, vector<8x4xf32>
    %c0_9 = arith.constant 0 : index
    %c0_10 = arith.constant 0 : index
    %6 = vector.load %arg4[%c0_9, %c0_10] : memref<4x32xf32, #tpu.memory_space<vmem>>, vector<4x32xf32>
    %7 = vector.extract_strided_slice %6 {offsets = [0, 0], sizes = [1, 32], strides = [1, 1]} : vector<4x32xf32> to vector<1x32xf32>
    %8 = vector.extract_strided_slice %6 {offsets = [1, 0], sizes = [1, 32], strides = [1, 1]} : vector<4x32xf32> to vector<1x32xf32>
    %9 = vector.extract_strided_slice %6 {offsets = [2, 0], sizes = [1, 32], strides = [1, 1]} : vector<4x32xf32> to vector<1x32xf32>
    %10 = vector.extract_strided_slice %6 {offsets = [3, 0], sizes = [1, 32], strides = [1, 1]} : vector<4x32xf32> to vector<1x32xf32>
    %c0_11 = arith.constant 0 : index
    %c0_12 = arith.constant 0 : index
    %11 = vector.load %arg2[%c0_11, %c0_12] : memref<15x1xf32, #tpu.memory_space<vmem>>, vector<15x1xf32>
    %12 = vector.broadcast %11 : vector<15x1xf32> to vector<15x32xf32>
    %13 = vector.broadcast %0 : vector<1x32xf32> to vector<15x32xf32>
    %14 = arith.mulf %12, %13 : vector<15x32xf32>
    %15 = vector.broadcast %1 : vector<1x32xf32> to vector<15x32xf32>
    %16 = arith.addf %14, %15 : vector<15x32xf32>
    %c0_13 = arith.constant 0 : index
    %c0_14 = arith.constant 0 : index
    %c0_15 = arith.constant 0 : index
    %17 = vector.load %arg9[%c0_13, %c0_14, %c0_15] : memref<8x8x4xf32, #tpu.memory_space<vmem>>, vector<1x8x4xf32>
    %18 = vector.shape_cast %17 : vector<1x8x4xf32> to vector<8x4xf32>
    %19 = vector.shape_cast %5 : vector<8x4xf32> to vector<1x8x4xf32>
    tpu.vector_store %arg9[%c0_13, %c0_14, %c0_15], %19 {strides = array<i32>} : memref<8x8x4xf32, #tpu.memory_space<vmem>>, vector<1x8x4xf32>,
    %c1 = arith.constant 1 : index
    %20 = memref.load %arg1[%c1] : memref<8xf32, #tpu.memory_space<smem>>
    %c0_16 = arith.constant 0 : index
    %21 = memref.load %arg1[%c0_16] : memref<8xf32, #tpu.memory_space<smem>>
    %22 = arith.subf %20, %21 : f32
    %23 = vector.extract_strided_slice %16 {offsets = [0, 0], sizes = [1, 32], strides = [1, 1]} : vector<15x32xf32> to vector<1x32xf32>
    %24 = vector.extract_strided_slice %16 {offsets = [1, 0], sizes = [1, 32], strides = [1, 1]} : vector<15x32xf32> to vector<1x32xf32>
    %25 = vector.extract_strided_slice %16 {offsets = [8, 0], sizes = [1, 32], strides = [1, 1]} : vector<15x32xf32> to vector<1x32xf32>
    %26 = vector.extract_strided_slice %5 {offsets = [0, 0], sizes = [8, 1], strides = [1, 1]} : vector<8x4xf32> to vector<8x1xf32>
    %27 = vector.broadcast %26 : vector<8x1xf32> to vector<8x32xf32>
    %28 = vector.broadcast %7 : vector<1x32xf32> to vector<8x32xf32>
    %29 = arith.mulf %27, %28 : vector<8x32xf32>
    %30 = vector.broadcast %23 : vector<1x32xf32> to vector<8x32xf32>
    %31 = arith.addf %30, %29 : vector<8x32xf32>
    %32 = vector.extract_strided_slice %5 {offsets = [0, 1], sizes = [8, 1], strides = [1, 1]} : vector<8x4xf32> to vector<8x1xf32>
    %33 = vector.broadcast %32 : vector<8x1xf32> to vector<8x32xf32>
    %34 = vector.broadcast %8 : vector<1x32xf32> to vector<8x32xf32>
    %35 = arith.mulf %33, %34 : vector<8x32xf32>
    %36 = arith.addf %31, %35 : vector<8x32xf32>
    %37 = vector.extract_strided_slice %5 {offsets = [0, 2], sizes = [8, 1], strides = [1, 1]} : vector<8x4xf32> to vector<8x1xf32>
    %38 = vector.broadcast %37 : vector<8x1xf32> to vector<8x32xf32>
    %39 = vector.broadcast %9 : vector<1x32xf32> to vector<8x32xf32>
    %40 = arith.mulf %38, %39 : vector<8x32xf32>
    %41 = arith.addf %36, %40 : vector<8x32xf32>
    %42 = vector.extract_strided_slice %5 {offsets = [0, 3], sizes = [8, 1], strides = [1, 1]} : vector<8x4xf32> to vector<8x1xf32>
    %43 = vector.broadcast %42 : vector<8x1xf32> to vector<8x32xf32>
    %44 = vector.broadcast %10 : vector<1x32xf32> to vector<8x32xf32>
    %45 = arith.mulf %43, %44 : vector<8x32xf32>
    %46 = arith.addf %41, %45 : vector<8x32xf32>
    %47 = math.tanh %46 : vector<8x32xf32>
    %48 = arith.truncf %47 : vector<8x32xf32> to vector<8x32xbf16>
    %cst = arith.constant dense<0.000000e+00> : vector<8x4xf32>
    %49 = tpu.matmul %48, %4, %cst {dimension_numbers = #tpu.dot_dimension_numbers<[1], [0], [0], [1], [0, 0, 1, 1], [], []>} : vector<8x32xbf16>, vector<32x4xbf16>, vector<8x4xf32> -> vector<8x4xf32>
    %50 = vector.broadcast %2 : vector<1x4xf32> to vector<8x4xf32>
    %51 = arith.addf %49, %50 : vector<8x4xf32>
    %cst_17 = arith.constant 5.000000e-01 : f32
    %52 = arith.mulf %cst_17, %22 : f32
    %53 = vector.broadcast %52 : f32 to vector<8x4xf32>
    %54 = arith.mulf %53, %51 : vector<8x4xf32>
    %55 = arith.addf %5, %54 : vector<8x4xf32>
    %56 = vector.extract_strided_slice %55 {offsets = [0, 0], sizes = [8, 1], strides = [1, 1]} : vector<8x4xf32> to vector<8x1xf32>
    %57 = vector.broadcast %56 : vector<8x1xf32> to vector<8x32xf32>
    %58 = vector.broadcast %7 : vector<1x32xf32> to vector<8x32xf32>
    %59 = arith.mulf %57, %58 : vector<8x32xf32>
    %60 = vector.broadcast %25 : vector<1x32xf32> to vector<8x32xf32>
    %61 = arith.addf %60, %59 : vector<8x32xf32>
    %62 = vector.extract_strided_slice %55 {offsets = [0, 1], sizes = [8, 1], strides = [1, 1]} : vector<8x4xf32> to vector<8x1xf32>
    %63 = vector.broadcast %62 : vector<8x1xf32> to vector<8x32xf32>
    %64 = vector.broadcast %8 : vector<1x32xf32> to vector<8x32xf32>
    %65 = arith.mulf %63, %64 : vector<8x32xf32>
    %66 = arith.addf %61, %65 : vector<8x32xf32>
    %67 = vector.extract_strided_slice %55 {offsets = [0, 2], sizes = [8, 1], strides = [1, 1]} : vector<8x4xf32> to vector<8x1xf32>
    %68 = vector.broadcast %67 : vector<8x1xf32> to vector<8x32xf32>
    %69 = vector.broadcast %9 : vector<1x32xf32> to vector<8x32xf32>
    %70 = arith.mulf %68, %69 : vector<8x32xf32>
    %71 = arith.addf %66, %70 : vector<8x32xf32>
    %72 = vector.extract_strided_slice %55 {offsets = [0, 3], sizes = [8, 1], strides = [1, 1]} : vector<8x4xf32> to vector<8x1xf32>
    %73 = vector.broadcast %72 : vector<8x1xf32> to vector<8x32xf32>
    %74 = vector.broadcast %10 : vector<1x32xf32> to vector<8x32xf32>
    %75 = arith.mulf %73, %74 : vector<8x32xf32>
    %76 = arith.addf %71, %75 : vector<8x32xf32>
    %77 = math.tanh %76 : vector<8x32xf32>
    %78 = arith.truncf %77 : vector<8x32xf32> to vector<8x32xbf16>
    %cst_18 = arith.constant dense<0.000000e+00> : vector<8x4xf32>
    %79 = tpu.matmul %78, %4, %cst_18 {dimension_numbers = #tpu.dot_dimension_numbers<[1], [0], [0], [1], [0, 0, 1, 1], [], []>} : vector<8x32xbf16>, vector<32x4xbf16>, vector<8x4xf32> -> vector<8x4xf32>
    %80 = vector.broadcast %2 : vector<1x4xf32> to vector<8x4xf32>
    %81 = arith.addf %79, %80 : vector<8x4xf32>
    %cst_19 = arith.constant 5.000000e-01 : f32
    %82 = arith.mulf %cst_19, %22 : f32
    %83 = vector.broadcast %82 : f32 to vector<8x4xf32>
    %84 = arith.mulf %83, %81 : vector<8x4xf32>
    %85 = arith.addf %5, %84 : vector<8x4xf32>
    %86 = vector.extract_strided_slice %85 {offsets = [0, 0], sizes = [8, 1], strides = [1, 1]} : vector<8x4xf32> to vector<8x1xf32>
    %87 = vector.broadcast %86 : vector<8x1xf32> to vector<8x32xf32>
    %88 = vector.broadcast %7 : vector<1x32xf32> to vector<8x32xf32>
    %89 = arith.mulf %87, %88 : vector<8x32xf32>
    %90 = vector.broadcast %25 : vector<1x32xf32> to vector<8x32xf32>
    %91 = arith.addf %90, %89 : vector<8x32xf32>
    %92 = vector.extract_strided_slice %85 {offsets = [0, 1], sizes = [8, 1], strides = [1, 1]} : vector<8x4xf32> to vector<8x1xf32>
    %93 = vector.broadcast %92 : vector<8x1xf32> to vector<8x32xf32>
    %94 = vector.broadcast %8 : vector<1x32xf32> to vector<8x32xf32>
    %95 = arith.mulf %93, %94 : vector<8x32xf32>
    %96 = arith.addf %91, %95 : vector<8x32xf32>
    %97 = vector.extract_strided_slice %85 {offsets = [0, 2], sizes = [8, 1], strides = [1, 1]} : vector<8x4xf32> to vector<8x1xf32>
    %98 = vector.broadcast %97 : vector<8x1xf32> to vector<8x32xf32>
    %99 = vector.broadcast %9 : vector<1x32xf32> to vector<8x32xf32>
    %100 = arith.mulf %98, %99 : vector<8x32xf32>
    %101 = arith.addf %96, %100 : vector<8x32xf32>
    %102 = vector.extract_strided_slice %85 {offsets = [0, 3], sizes = [8, 1], strides = [1, 1]} : vector<8x4xf32> to vector<8x1xf32>
    %103 = vector.broadcast %102 : vector<8x1xf32> to vector<8x32xf32>
    %104 = vector.broadcast %10 : vector<1x32xf32> to vector<8x32xf32>
    %105 = arith.mulf %103, %104 : vector<8x32xf32>
    %106 = arith.addf %101, %105 : vector<8x32xf32>
    %107 = math.tanh %106 : vector<8x32xf32>
    %108 = arith.truncf %107 : vector<8x32xf32> to vector<8x32xbf16>
    %cst_20 = arith.constant dense<0.000000e+00> : vector<8x4xf32>
    %109 = tpu.matmul %108, %4, %cst_20 {dimension_numbers = #tpu.dot_dimension_numbers<[1], [0], [0], [1], [0, 0, 1, 1], [], []>} : vector<8x32xbf16>, vector<32x4xbf16>, vector<8x4xf32> -> vector<8x4xf32>
    %110 = vector.broadcast %2 : vector<1x4xf32> to vector<8x4xf32>
    %111 = arith.addf %109, %110 : vector<8x4xf32>
    %112 = vector.broadcast %22 : f32 to vector<8x4xf32>
    %113 = arith.mulf %112, %111 : vector<8x4xf32>
    %114 = arith.addf %5, %113 : vector<8x4xf32>
    %115 = vector.extract_strided_slice %114 {offsets = [0, 0], sizes = [8, 1], strides = [1, 1]} : vector<8x4xf32> to vector<8x1xf32>
    %116 = vector.broadcast %115 : vector<8x1xf32> to vector<8x32xf32>
    %117 = vector.broadcast %7 : vector<1x32xf32> to vector<8x32xf32>
    %118 = arith.mulf %116, %117 : vector<8x32xf32>
    %119 = vector.broadcast %24 : vector<1x32xf32> to vector<8x32xf32>
    %120 = arith.addf %119, %118 : vector<8x32xf32>
    %121 = vector.extract_strided_slice %114 {offsets = [0, 1], sizes = [8, 1], strides = [1, 1]} : vector<8x4xf32> to vector<8x1xf32>
    %122 = vector.broadcast %121 : vector<8x1xf32> to vector<8x32xf32>
    %123 = vector.broadcast %8 : vector<1x32xf32> to vector<8x32xf32>
    %124 = arith.mulf %122, %123 : vector<8x32xf32>
    %125 = arith.addf %120, %124 : vector<8x32xf32>
    %126 = vector.extract_strided_slice %114 {offsets = [0, 2], sizes = [8, 1], strides = [1, 1]} : vector<8x4xf32> to vector<8x1xf32>
    %127 = vector.broadcast %126 : vector<8x1xf32> to vector<8x32xf32>
    %128 = vector.broadcast %9 : vector<1x32xf32> to vector<8x32xf32>
    %129 = arith.mulf %127, %128 : vector<8x32xf32>
    %130 = arith.addf %125, %129 : vector<8x32xf32>
    %131 = vector.extract_strided_slice %114 {offsets = [0, 3], sizes = [8, 1], strides = [1, 1]} : vector<8x4xf32> to vector<8x1xf32>
    %132 = vector.broadcast %131 : vector<8x1xf32> to vector<8x32xf32>
    %133 = vector.broadcast %10 : vector<1x32xf32> to vector<8x32xf32>
    %134 = arith.mulf %132, %133 : vector<8x32xf32>
    %135 = arith.addf %130, %134 : vector<8x32xf32>
    %136 = math.tanh %135 : vector<8x32xf32>
    %137 = arith.truncf %136 : vector<8x32xf32> to vector<8x32xbf16>
    %cst_21 = arith.constant dense<0.000000e+00> : vector<8x4xf32>
    %138 = tpu.matmul %137, %4, %cst_21 {dimension_numbers = #tpu.dot_dimension_numbers<[1], [0], [0], [1], [0, 0, 1, 1], [], []>} : vector<8x32xbf16>, vector<32x4xbf16>, vector<8x4xf32> -> vector<8x4xf32>
    %139 = vector.broadcast %2 : vector<1x4xf32> to vector<8x4xf32>
    %140 = arith.addf %138, %139 : vector<8x4xf32>
    %cst_22 = arith.constant 0.166666672 : f32
    %141 = arith.mulf %22, %cst_22 : f32
    %142 = arith.addf %81, %111 : vector<8x4xf32>
    %cst_23 = arith.constant 2.000000e+00 : f32
    %143 = vector.broadcast %cst_23 : f32 to vector<8x4xf32>
    %144 = arith.mulf %143, %142 : vector<8x4xf32>
    %145 = arith.addf %51, %144 : vector<8x4xf32>
    %146 = arith.addf %145, %140 : vector<8x4xf32>
    %147 = vector.broadcast %141 : f32 to vector<8x4xf32>
    %148 = arith.mulf %147, %146 : vector<8x4xf32>
    %149 = arith.addf %5, %148 : vector<8x4xf32>
    %c1_24 = arith.constant 1 : index
    %c0_25 = arith.constant 0 : index
    %c0_26 = arith.constant 0 : index
    %150 = vector.load %arg9[%c1_24, %c0_25, %c0_26] : memref<8x8x4xf32, #tpu.memory_space<vmem>>, vector<1x8x4xf32>
    %151 = vector.shape_cast %150 : vector<1x8x4xf32> to vector<8x4xf32>
    %152 = vector.shape_cast %149 : vector<8x4xf32> to vector<1x8x4xf32>
    tpu.vector_store %arg9[%c1_24, %c0_25, %c0_26], %152 {strides = array<i32>} : memref<8x8x4xf32, #tpu.memory_space<vmem>>, vector<1x8x4xf32>,
    %c2 = arith.constant 2 : index
    %153 = memref.load %arg1[%c2] : memref<8xf32, #tpu.memory_space<smem>>
    %c1_27 = arith.constant 1 : index
    %154 = memref.load %arg1[%c1_27] : memref<8xf32, #tpu.memory_space<smem>>
    %155 = arith.subf %153, %154 : f32
    %156 = vector.extract_strided_slice %16 {offsets = [1, 0], sizes = [1, 32], strides = [1, 1]} : vector<15x32xf32> to vector<1x32xf32>
    %157 = vector.extract_strided_slice %16 {offsets = [2, 0], sizes = [1, 32], strides = [1, 1]} : vector<15x32xf32> to vector<1x32xf32>
    %158 = vector.extract_strided_slice %16 {offsets = [9, 0], sizes = [1, 32], strides = [1, 1]} : vector<15x32xf32> to vector<1x32xf32>
    %159 = vector.extract_strided_slice %149 {offsets = [0, 0], sizes = [8, 1], strides = [1, 1]} : vector<8x4xf32> to vector<8x1xf32>
    %160 = vector.broadcast %159 : vector<8x1xf32> to vector<8x32xf32>
    %161 = vector.broadcast %7 : vector<1x32xf32> to vector<8x32xf32>
    %162 = arith.mulf %160, %161 : vector<8x32xf32>
    %163 = vector.broadcast %156 : vector<1x32xf32> to vector<8x32xf32>
    %164 = arith.addf %163, %162 : vector<8x32xf32>
    %165 = vector.extract_strided_slice %149 {offsets = [0, 1], sizes = [8, 1], strides = [1, 1]} : vector<8x4xf32> to vector<8x1xf32>
    %166 = vector.broadcast %165 : vector<8x1xf32> to vector<8x32xf32>
    %167 = vector.broadcast %8 : vector<1x32xf32> to vector<8x32xf32>
    %168 = arith.mulf %166, %167 : vector<8x32xf32>
    %169 = arith.addf %164, %168 : vector<8x32xf32>
    %170 = vector.extract_strided_slice %149 {offsets = [0, 2], sizes = [8, 1], strides = [1, 1]} : vector<8x4xf32> to vector<8x1xf32>
    %171 = vector.broadcast %170 : vector<8x1xf32> to vector<8x32xf32>
    %172 = vector.broadcast %9 : vector<1x32xf32> to vector<8x32xf32>
    %173 = arith.mulf %171, %172 : vector<8x32xf32>
    %174 = arith.addf %169, %173 : vector<8x32xf32>
    %175 = vector.extract_strided_slice %149 {offsets = [0, 3], sizes = [8, 1], strides = [1, 1]} : vector<8x4xf32> to vector<8x1xf32>
    %176 = vector.broadcast %175 : vector<8x1xf32> to vector<8x32xf32>
    %177 = vector.broadcast %10 : vector<1x32xf32> to vector<8x32xf32>
    %178 = arith.mulf %176, %177 : vector<8x32xf32>
    %179 = arith.addf %174, %178 : vector<8x32xf32>
    %180 = math.tanh %179 : vector<8x32xf32>
    %181 = arith.truncf %180 : vector<8x32xf32> to vector<8x32xbf16>
    %cst_28 = arith.constant dense<0.000000e+00> : vector<8x4xf32>
    %182 = tpu.matmul %181, %4, %cst_28 {dimension_numbers = #tpu.dot_dimension_numbers<[1], [0], [0], [1], [0, 0, 1, 1], [], []>} : vector<8x32xbf16>, vector<32x4xbf16>, vector<8x4xf32> -> vector<8x4xf32>
    %183 = vector.broadcast %2 : vector<1x4xf32> to vector<8x4xf32>
    %184 = arith.addf %182, %183 : vector<8x4xf32>
    %cst_29 = arith.constant 5.000000e-01 : f32
    %185 = arith.mulf %cst_29, %155 : f32
    %186 = vector.broadcast %185 : f32 to vector<8x4xf32>
    %187 = arith.mulf %186, %184 : vector<8x4xf32>
    %188 = arith.addf %149, %187 : vector<8x4xf32>
    %189 = vector.extract_strided_slice %188 {offsets = [0, 0], sizes = [8, 1], strides = [1, 1]} : vector<8x4xf32> to vector<8x1xf32>
    %190 = vector.broadcast %189 : vector<8x1xf32> to vector<8x32xf32>
    %191 = vector.broadcast %7 : vector<1x32xf32> to vector<8x32xf32>
    %192 = arith.mulf %190, %191 : vector<8x32xf32>
    %193 = vector.broadcast %158 : vector<1x32xf32> to vector<8x32xf32>
    %194 = arith.addf %193, %192 : vector<8x32xf32>
    %195 = vector.extract_strided_slice %188 {offsets = [0, 1], sizes = [8, 1], strides = [1, 1]} : vector<8x4xf32> to vector<8x1xf32>
    %196 = vector.broadcast %195 : vector<8x1xf32> to vector<8x32xf32>
    %197 = vector.broadcast %8 : vector<1x32xf32> to vector<8x32xf32>
    %198 = arith.mulf %196, %197 : vector<8x32xf32>
    %199 = arith.addf %194, %198 : vector<8x32xf32>
    %200 = vector.extract_strided_slice %188 {offsets = [0, 2], sizes = [8, 1], strides = [1, 1]} : vector<8x4xf32> to vector<8x1xf32>
    %201 = vector.broadcast %200 : vector<8x1xf32> to vector<8x32xf32>
    %202 = vector.broadcast %9 : vector<1x32xf32> to vector<8x32xf32>
    %203 = arith.mulf %201, %202 : vector<8x32xf32>
    %204 = arith.addf %199, %203 : vector<8x32xf32>
    %205 = vector.extract_strided_slice %188 {offsets = [0, 3], sizes = [8, 1], strides = [1, 1]} : vector<8x4xf32> to vector<8x1xf32>
    %206 = vector.broadcast %205 : vector<8x1xf32> to vector<8x32xf32>
    %207 = vector.broadcast %10 : vector<1x32xf32> to vector<8x32xf32>
    %208 = arith.mulf %206, %207 : vector<8x32xf32>
    %209 = arith.addf %204, %208 : vector<8x32xf32>
    %210 = math.tanh %209 : vector<8x32xf32>
    %211 = arith.truncf %210 : vector<8x32xf32> to vector<8x32xbf16>
    %cst_30 = arith.constant dense<0.000000e+00> : vector<8x4xf32>
    %212 = tpu.matmul %211, %4, %cst_30 {dimension_numbers = #tpu.dot_dimension_numbers<[1], [0], [0], [1], [0, 0, 1, 1], [], []>} : vector<8x32xbf16>, vector<32x4xbf16>, vector<8x4xf32> -> vector<8x4xf32>
    %213 = vector.broadcast %2 : vector<1x4xf32> to vector<8x4xf32>
    %214 = arith.addf %212, %213 : vector<8x4xf32>
    %cst_31 = arith.constant 5.000000e-01 : f32
    %215 = arith.mulf %cst_31, %155 : f32
    %216 = vector.broadcast %215 : f32 to vector<8x4xf32>
    %217 = arith.mulf %216, %214 : vector<8x4xf32>
    %218 = arith.addf %149, %217 : vector<8x4xf32>
    %219 = vector.extract_strided_slice %218 {offsets = [0, 0], sizes = [8, 1], strides = [1, 1]} : vector<8x4xf32> to vector<8x1xf32>
    %220 = vector.broadcast %219 : vector<8x1xf32> to vector<8x32xf32>
    %221 = vector.broadcast %7 : vector<1x32xf32> to vector<8x32xf32>
    %222 = arith.mulf %220, %221 : vector<8x32xf32>
    %223 = vector.broadcast %158 : vector<1x32xf32> to vector<8x32xf32>
    %224 = arith.addf %223, %222 : vector<8x32xf32>
    %225 = vector.extract_strided_slice %218 {offsets = [0, 1], sizes = [8, 1], strides = [1, 1]} : vector<8x4xf32> to vector<8x1xf32>
    %226 = vector.broadcast %225 : vector<8x1xf32> to vector<8x32xf32>
    %227 = vector.broadcast %8 : vector<1x32xf32> to vector<8x32xf32>
    %228 = arith.mulf %226, %227 : vector<8x32xf32>
    %229 = arith.addf %224, %228 : vector<8x32xf32>
    %230 = vector.extract_strided_slice %218 {offsets = [0, 2], sizes = [8, 1], strides = [1, 1]} : vector<8x4xf32> to vector<8x1xf32>
    %231 = vector.broadcast %230 : vector<8x1xf32> to vector<8x32xf32>
    %232 = vector.broadcast %9 : vector<1x32xf32> to vector<8x32xf32>
    %233 = arith.mulf %231, %232 : vector<8x32xf32>
    %234 = arith.addf %229, %233 : vector<8x32xf32>
    %235 = vector.extract_strided_slice %218 {offsets = [0, 3], sizes = [8, 1], strides = [1, 1]} : vector<8x4xf32> to vector<8x1xf32>
    %236 = vector.broadcast %235 : vector<8x1xf32> to vector<8x32xf32>
    %237 = vector.broadcast %10 : vector<1x32xf32> to vector<8x32xf32>
    %238 = arith.mulf %236, %237 : vector<8x32xf32>
    %239 = arith.addf %234, %238 : vector<8x32xf32>
    %240 = math.tanh %239 : vector<8x32xf32>
    %241 = arith.truncf %240 : vector<8x32xf32> to vector<8x32xbf16>
    %cst_32 = arith.constant dense<0.000000e+00> : vector<8x4xf32>
    %242 = tpu.matmul %241, %4, %cst_32 {dimension_numbers = #tpu.dot_dimension_numbers<[1], [0], [0], [1], [0, 0, 1, 1], [], []>} : vector<8x32xbf16>, vector<32x4xbf16>, vector<8x4xf32> -> vector<8x4xf32>
    %243 = vector.broadcast %2 : vector<1x4xf32> to vector<8x4xf32>
    %244 = arith.addf %242, %243 : vector<8x4xf32>
    %245 = vector.broadcast %155 : f32 to vector<8x4xf32>
    %246 = arith.mulf %245, %244 : vector<8x4xf32>
    %247 = arith.addf %149, %246 : vector<8x4xf32>
    %248 = vector.extract_strided_slice %247 {offsets = [0, 0], sizes = [8, 1], strides = [1, 1]} : vector<8x4xf32> to vector<8x1xf32>
    %249 = vector.broadcast %248 : vector<8x1xf32> to vector<8x32xf32>
    %250 = vector.broadcast %7 : vector<1x32xf32> to vector<8x32xf32>
    %251 = arith.mulf %249, %250 : vector<8x32xf32>
    %252 = vector.broadcast %157 : vector<1x32xf32> to vector<8x32xf32>
    %253 = arith.addf %252, %251 : vector<8x32xf32>
    %254 = vector.extract_strided_slice %247 {offsets = [0, 1], sizes = [8, 1], strides = [1, 1]} : vector<8x4xf32> to vector<8x1xf32>
    %255 = vector.broadcast %254 : vector<8x1xf32> to vector<8x32xf32>
    %256 = vector.broadcast %8 : vector<1x32xf32> to vector<8x32xf32>
    %257 = arith.mulf %255, %256 : vector<8x32xf32>
    %258 = arith.addf %253, %257 : vector<8x32xf32>
    %259 = vector.extract_strided_slice %247 {offsets = [0, 2], sizes = [8, 1], strides = [1, 1]} : vector<8x4xf32> to vector<8x1xf32>
    %260 = vector.broadcast %259 : vector<8x1xf32> to vector<8x32xf32>
    %261 = vector.broadcast %9 : vector<1x32xf32> to vector<8x32xf32>
    %262 = arith.mulf %260, %261 : vector<8x32xf32>
    %263 = arith.addf %258, %262 : vector<8x32xf32>
    %264 = vector.extract_strided_slice %247 {offsets = [0, 3], sizes = [8, 1], strides = [1, 1]} : vector<8x4xf32> to vector<8x1xf32>
    %265 = vector.broadcast %264 : vector<8x1xf32> to vector<8x32xf32>
    %266 = vector.broadcast %10 : vector<1x32xf32> to vector<8x32xf32>
    %267 = arith.mulf %265, %266 : vector<8x32xf32>
    %268 = arith.addf %263, %267 : vector<8x32xf32>
    %269 = math.tanh %268 : vector<8x32xf32>
    %270 = arith.truncf %269 : vector<8x32xf32> to vector<8x32xbf16>
    %cst_33 = arith.constant dense<0.000000e+00> : vector<8x4xf32>
    %271 = tpu.matmul %270, %4, %cst_33 {dimension_numbers = #tpu.dot_dimension_numbers<[1], [0], [0], [1], [0, 0, 1, 1], [], []>} : vector<8x32xbf16>, vector<32x4xbf16>, vector<8x4xf32> -> vector<8x4xf32>
    %272 = vector.broadcast %2 : vector<1x4xf32> to vector<8x4xf32>
    %273 = arith.addf %271, %272 : vector<8x4xf32>
    %cst_34 = arith.constant 0.166666672 : f32
    %274 = arith.mulf %155, %cst_34 : f32
    %275 = arith.addf %214, %244 : vector<8x4xf32>
    %cst_35 = arith.constant 2.000000e+00 : f32
    %276 = vector.broadcast %cst_35 : f32 to vector<8x4xf32>
    %277 = arith.mulf %276, %275 : vector<8x4xf32>
    %278 = arith.addf %184, %277 : vector<8x4xf32>
    %279 = arith.addf %278, %273 : vector<8x4xf32>
    %280 = vector.broadcast %274 : f32 to vector<8x4xf32>
    %281 = arith.mulf %280, %279 : vector<8x4xf32>
    %282 = arith.addf %149, %281 : vector<8x4xf32>
    %c2_36 = arith.constant 2 : index
    %c0_37 = arith.constant 0 : index
    %c0_38 = arith.constant 0 : index
    %283 = vector.load %arg9[%c2_36, %c0_37, %c0_38] : memref<8x8x4xf32, #tpu.memory_space<vmem>>, vector<1x8x4xf32>
    %284 = vector.shape_cast %283 : vector<1x8x4xf32> to vector<8x4xf32>
    %285 = vector.shape_cast %282 : vector<8x4xf32> to vector<1x8x4xf32>
    tpu.vector_store %arg9[%c2_36, %c0_37, %c0_38], %285 {strides = array<i32>} : memref<8x8x4xf32, #tpu.memory_space<vmem>>, vector<1x8x4xf32>,
    %c3 = arith.constant 3 : index
    %286 = memref.load %arg1[%c3] : memref<8xf32, #tpu.memory_space<smem>>
    %c2_39 = arith.constant 2 : index
    %287 = memref.load %arg1[%c2_39] : memref<8xf32, #tpu.memory_space<smem>>
    %288 = arith.subf %286, %287 : f32
    %289 = vector.extract_strided_slice %16 {offsets = [2, 0], sizes = [1, 32], strides = [1, 1]} : vector<15x32xf32> to vector<1x32xf32>
    %290 = vector.extract_strided_slice %16 {offsets = [3, 0], sizes = [1, 32], strides = [1, 1]} : vector<15x32xf32> to vector<1x32xf32>
    %291 = vector.extract_strided_slice %16 {offsets = [10, 0], sizes = [1, 32], strides = [1, 1]} : vector<15x32xf32> to vector<1x32xf32>
    %292 = vector.extract_strided_slice %282 {offsets = [0, 0], sizes = [8, 1], strides = [1, 1]} : vector<8x4xf32> to vector<8x1xf32>
    %293 = vector.broadcast %292 : vector<8x1xf32> to vector<8x32xf32>
    %294 = vector.broadcast %7 : vector<1x32xf32> to vector<8x32xf32>
    %295 = arith.mulf %293, %294 : vector<8x32xf32>
    %296 = vector.broadcast %289 : vector<1x32xf32> to vector<8x32xf32>
    %297 = arith.addf %296, %295 : vector<8x32xf32>
    %298 = vector.extract_strided_slice %282 {offsets = [0, 1], sizes = [8, 1], strides = [1, 1]} : vector<8x4xf32> to vector<8x1xf32>
    %299 = vector.broadcast %298 : vector<8x1xf32> to vector<8x32xf32>
    %300 = vector.broadcast %8 : vector<1x32xf32> to vector<8x32xf32>
    %301 = arith.mulf %299, %300 : vector<8x32xf32>
    %302 = arith.addf %297, %301 : vector<8x32xf32>
    %303 = vector.extract_strided_slice %282 {offsets = [0, 2], sizes = [8, 1], strides = [1, 1]} : vector<8x4xf32> to vector<8x1xf32>
    %304 = vector.broadcast %303 : vector<8x1xf32> to vector<8x32xf32>
    %305 = vector.broadcast %9 : vector<1x32xf32> to vector<8x32xf32>
    %306 = arith.mulf %304, %305 : vector<8x32xf32>
    %307 = arith.addf %302, %306 : vector<8x32xf32>
    %308 = vector.extract_strided_slice %282 {offsets = [0, 3], sizes = [8, 1], strides = [1, 1]} : vector<8x4xf32> to vector<8x1xf32>
    %309 = vector.broadcast %308 : vector<8x1xf32> to vector<8x32xf32>
    %310 = vector.broadcast %10 : vector<1x32xf32> to vector<8x32xf32>
    %311 = arith.mulf %309, %310 : vector<8x32xf32>
    %312 = arith.addf %307, %311 : vector<8x32xf32>
    %313 = math.tanh %312 : vector<8x32xf32>
    %314 = arith.truncf %313 : vector<8x32xf32> to vector<8x32xbf16>
    %cst_40 = arith.constant dense<0.000000e+00> : vector<8x4xf32>
    %315 = tpu.matmul %314, %4, %cst_40 {dimension_numbers = #tpu.dot_dimension_numbers<[1], [0], [0], [1], [0, 0, 1, 1], [], []>} : vector<8x32xbf16>, vector<32x4xbf16>, vector<8x4xf32> -> vector<8x4xf32>
    %316 = vector.broadcast %2 : vector<1x4xf32> to vector<8x4xf32>
    %317 = arith.addf %315, %316 : vector<8x4xf32>
    %cst_41 = arith.constant 5.000000e-01 : f32
    %318 = arith.mulf %cst_41, %288 : f32
    %319 = vector.broadcast %318 : f32 to vector<8x4xf32>
    %320 = arith.mulf %319, %317 : vector<8x4xf32>
    %321 = arith.addf %282, %320 : vector<8x4xf32>
    %322 = vector.extract_strided_slice %321 {offsets = [0, 0], sizes = [8, 1], strides = [1, 1]} : vector<8x4xf32> to vector<8x1xf32>
    %323 = vector.broadcast %322 : vector<8x1xf32> to vector<8x32xf32>
    %324 = vector.broadcast %7 : vector<1x32xf32> to vector<8x32xf32>
    %325 = arith.mulf %323, %324 : vector<8x32xf32>
    %326 = vector.broadcast %291 : vector<1x32xf32> to vector<8x32xf32>
    %327 = arith.addf %326, %325 : vector<8x32xf32>
    %328 = vector.extract_strided_slice %321 {offsets = [0, 1], sizes = [8, 1], strides = [1, 1]} : vector<8x4xf32> to vector<8x1xf32>
    %329 = vector.broadcast %328 : vector<8x1xf32> to vector<8x32xf32>
    %330 = vector.broadcast %8 : vector<1x32xf32> to vector<8x32xf32>
    %331 = arith.mulf %329, %330 : vector<8x32xf32>
    %332 = arith.addf %327, %331 : vector<8x32xf32>
    %333 = vector.extract_strided_slice %321 {offsets = [0, 2], sizes = [8, 1], strides = [1, 1]} : vector<8x4xf32> to vector<8x1xf32>
    %334 = vector.broadcast %333 : vector<8x1xf32> to vector<8x32xf32>
    %335 = vector.broadcast %9 : vector<1x32xf32> to vector<8x32xf32>
    %336 = arith.mulf %334, %335 : vector<8x32xf32>
    %337 = arith.addf %332, %336 : vector<8x32xf32>
    %338 = vector.extract_strided_slice %321 {offsets = [0, 3], sizes = [8, 1], strides = [1, 1]} : vector<8x4xf32> to vector<8x1xf32>
    %339 = vector.broadcast %338 : vector<8x1xf32> to vector<8x32xf32>
    %340 = vector.broadcast %10 : vector<1x32xf32> to vector<8x32xf32>
    %341 = arith.mulf %339, %340 : vector<8x32xf32>
    %342 = arith.addf %337, %341 : vector<8x32xf32>
    %343 = math.tanh %342 : vector<8x32xf32>
    %344 = arith.truncf %343 : vector<8x32xf32> to vector<8x32xbf16>
    %cst_42 = arith.constant dense<0.000000e+00> : vector<8x4xf32>
    %345 = tpu.matmul %344, %4, %cst_42 {dimension_numbers = #tpu.dot_dimension_numbers<[1], [0], [0], [1], [0, 0, 1, 1], [], []>} : vector<8x32xbf16>, vector<32x4xbf16>, vector<8x4xf32> -> vector<8x4xf32>
    %346 = vector.broadcast %2 : vector<1x4xf32> to vector<8x4xf32>
    %347 = arith.addf %345, %346 : vector<8x4xf32>
    %cst_43 = arith.constant 5.000000e-01 : f32
    %348 = arith.mulf %cst_43, %288 : f32
    %349 = vector.broadcast %348 : f32 to vector<8x4xf32>
    %350 = arith.mulf %349, %347 : vector<8x4xf32>
    %351 = arith.addf %282, %350 : vector<8x4xf32>
    %352 = vector.extract_strided_slice %351 {offsets = [0, 0], sizes = [8, 1], strides = [1, 1]} : vector<8x4xf32> to vector<8x1xf32>
    %353 = vector.broadcast %352 : vector<8x1xf32> to vector<8x32xf32>
    %354 = vector.broadcast %7 : vector<1x32xf32> to vector<8x32xf32>
    %355 = arith.mulf %353, %354 : vector<8x32xf32>
    %356 = vector.broadcast %291 : vector<1x32xf32> to vector<8x32xf32>
    %357 = arith.addf %356, %355 : vector<8x32xf32>
    %358 = vector.extract_strided_slice %351 {offsets = [0, 1], sizes = [8, 1], strides = [1, 1]} : vector<8x4xf32> to vector<8x1xf32>
    %359 = vector.broadcast %358 : vector<8x1xf32> to vector<8x32xf32>
    %360 = vector.broadcast %8 : vector<1x32xf32> to vector<8x32xf32>
    %361 = arith.mulf %359, %360 : vector<8x32xf32>
    %362 = arith.addf %357, %361 : vector<8x32xf32>
    %363 = vector.extract_strided_slice %351 {offsets = [0, 2], sizes = [8, 1], strides = [1, 1]} : vector<8x4xf32> to vector<8x1xf32>
    %364 = vector.broadcast %363 : vector<8x1xf32> to vector<8x32xf32>
    %365 = vector.broadcast %9 : vector<1x32xf32> to vector<8x32xf32>
    %366 = arith.mulf %364, %365 : vector<8x32xf32>
    %367 = arith.addf %362, %366 : vector<8x32xf32>
    %368 = vector.extract_strided_slice %351 {offsets = [0, 3], sizes = [8, 1], strides = [1, 1]} : vector<8x4xf32> to vector<8x1xf32>
    %369 = vector.broadcast %368 : vector<8x1xf32> to vector<8x32xf32>
    %370 = vector.broadcast %10 : vector<1x32xf32> to vector<8x32xf32>
    %371 = arith.mulf %369, %370 : vector<8x32xf32>
    %372 = arith.addf %367, %371 : vector<8x32xf32>
    %373 = math.tanh %372 : vector<8x32xf32>
    %374 = arith.truncf %373 : vector<8x32xf32> to vector<8x32xbf16>
    %cst_44 = arith.constant dense<0.000000e+00> : vector<8x4xf32>
    %375 = tpu.matmul %374, %4, %cst_44 {dimension_numbers = #tpu.dot_dimension_numbers<[1], [0], [0], [1], [0, 0, 1, 1], [], []>} : vector<8x32xbf16>, vector<32x4xbf16>, vector<8x4xf32> -> vector<8x4xf32>
    %376 = vector.broadcast %2 : vector<1x4xf32> to vector<8x4xf32>
    %377 = arith.addf %375, %376 : vector<8x4xf32>
    %378 = vector.broadcast %288 : f32 to vector<8x4xf32>
    %379 = arith.mulf %378, %377 : vector<8x4xf32>
    %380 = arith.addf %282, %379 : vector<8x4xf32>
    %381 = vector.extract_strided_slice %380 {offsets = [0, 0], sizes = [8, 1], strides = [1, 1]} : vector<8x4xf32> to vector<8x1xf32>
    %382 = vector.broadcast %381 : vector<8x1xf32> to vector<8x32xf32>
    %383 = vector.broadcast %7 : vector<1x32xf32> to vector<8x32xf32>
    %384 = arith.mulf %382, %383 : vector<8x32xf32>
    %385 = vector.broadcast %290 : vector<1x32xf32> to vector<8x32xf32>
    %386 = arith.addf %385, %384 : vector<8x32xf32>
    %387 = vector.extract_strided_slice %380 {offsets = [0, 1], sizes = [8, 1], strides = [1, 1]} : vector<8x4xf32> to vector<8x1xf32>
    %388 = vector.broadcast %387 : vector<8x1xf32> to vector<8x32xf32>
    %389 = vector.broadcast %8 : vector<1x32xf32> to vector<8x32xf32>
    %390 = arith.mulf %388, %389 : vector<8x32xf32>
    %391 = arith.addf %386, %390 : vector<8x32xf32>
    %392 = vector.extract_strided_slice %380 {offsets = [0, 2], sizes = [8, 1], strides = [1, 1]} : vector<8x4xf32> to vector<8x1xf32>
    %393 = vector.broadcast %392 : vector<8x1xf32> to vector<8x32xf32>
    %394 = vector.broadcast %9 : vector<1x32xf32> to vector<8x32xf32>
    %395 = arith.mulf %393, %394 : vector<8x32xf32>
    %396 = arith.addf %391, %395 : vector<8x32xf32>
    %397 = vector.extract_strided_slice %380 {offsets = [0, 3], sizes = [8, 1], strides = [1, 1]} : vector<8x4xf32> to vector<8x1xf32>
    %398 = vector.broadcast %397 : vector<8x1xf32> to vector<8x32xf32>
    %399 = vector.broadcast %10 : vector<1x32xf32> to vector<8x32xf32>
    %400 = arith.mulf %398, %399 : vector<8x32xf32>
    %401 = arith.addf %396, %400 : vector<8x32xf32>
    %402 = math.tanh %401 : vector<8x32xf32>
    %403 = arith.truncf %402 : vector<8x32xf32> to vector<8x32xbf16>
    %cst_45 = arith.constant dense<0.000000e+00> : vector<8x4xf32>
    %404 = tpu.matmul %403, %4, %cst_45 {dimension_numbers = #tpu.dot_dimension_numbers<[1], [0], [0], [1], [0, 0, 1, 1], [], []>} : vector<8x32xbf16>, vector<32x4xbf16>, vector<8x4xf32> -> vector<8x4xf32>
    %405 = vector.broadcast %2 : vector<1x4xf32> to vector<8x4xf32>
    %406 = arith.addf %404, %405 : vector<8x4xf32>
    %cst_46 = arith.constant 0.166666672 : f32
    %407 = arith.mulf %288, %cst_46 : f32
    %408 = arith.addf %347, %377 : vector<8x4xf32>
    %cst_47 = arith.constant 2.000000e+00 : f32
    %409 = vector.broadcast %cst_47 : f32 to vector<8x4xf32>
    %410 = arith.mulf %409, %408 : vector<8x4xf32>
    %411 = arith.addf %317, %410 : vector<8x4xf32>
    %412 = arith.addf %411, %406 : vector<8x4xf32>
    %413 = vector.broadcast %407 : f32 to vector<8x4xf32>
    %414 = arith.mulf %413, %412 : vector<8x4xf32>
    %415 = arith.addf %282, %414 : vector<8x4xf32>
    %c3_48 = arith.constant 3 : index
    %c0_49 = arith.constant 0 : index
    %c0_50 = arith.constant 0 : index
    %416 = vector.load %arg9[%c3_48, %c0_49, %c0_50] : memref<8x8x4xf32, #tpu.memory_space<vmem>>, vector<1x8x4xf32>
    %417 = vector.shape_cast %416 : vector<1x8x4xf32> to vector<8x4xf32>
    %418 = vector.shape_cast %415 : vector<8x4xf32> to vector<1x8x4xf32>
    tpu.vector_store %arg9[%c3_48, %c0_49, %c0_50], %418 {strides = array<i32>} : memref<8x8x4xf32, #tpu.memory_space<vmem>>, vector<1x8x4xf32>,
    %c4 = arith.constant 4 : index
    %419 = memref.load %arg1[%c4] : memref<8xf32, #tpu.memory_space<smem>>
    %c3_51 = arith.constant 3 : index
    %420 = memref.load %arg1[%c3_51] : memref<8xf32, #tpu.memory_space<smem>>
    %421 = arith.subf %419, %420 : f32
    %422 = vector.extract_strided_slice %16 {offsets = [3, 0], sizes = [1, 32], strides = [1, 1]} : vector<15x32xf32> to vector<1x32xf32>
    %423 = vector.extract_strided_slice %16 {offsets = [4, 0], sizes = [1, 32], strides = [1, 1]} : vector<15x32xf32> to vector<1x32xf32>
    %424 = vector.extract_strided_slice %16 {offsets = [11, 0], sizes = [1, 32], strides = [1, 1]} : vector<15x32xf32> to vector<1x32xf32>
    %425 = vector.extract_strided_slice %415 {offsets = [0, 0], sizes = [8, 1], strides = [1, 1]} : vector<8x4xf32> to vector<8x1xf32>
    %426 = vector.broadcast %425 : vector<8x1xf32> to vector<8x32xf32>
    %427 = vector.broadcast %7 : vector<1x32xf32> to vector<8x32xf32>
    %428 = arith.mulf %426, %427 : vector<8x32xf32>
    %429 = vector.broadcast %422 : vector<1x32xf32> to vector<8x32xf32>
    %430 = arith.addf %429, %428 : vector<8x32xf32>
    %431 = vector.extract_strided_slice %415 {offsets = [0, 1], sizes = [8, 1], strides = [1, 1]} : vector<8x4xf32> to vector<8x1xf32>
    %432 = vector.broadcast %431 : vector<8x1xf32> to vector<8x32xf32>
    %433 = vector.broadcast %8 : vector<1x32xf32> to vector<8x32xf32>
    %434 = arith.mulf %432, %433 : vector<8x32xf32>
    %435 = arith.addf %430, %434 : vector<8x32xf32>
    %436 = vector.extract_strided_slice %415 {offsets = [0, 2], sizes = [8, 1], strides = [1, 1]} : vector<8x4xf32> to vector<8x1xf32>
    %437 = vector.broadcast %436 : vector<8x1xf32> to vector<8x32xf32>
    %438 = vector.broadcast %9 : vector<1x32xf32> to vector<8x32xf32>
    %439 = arith.mulf %437, %438 : vector<8x32xf32>
    %440 = arith.addf %435, %439 : vector<8x32xf32>
    %441 = vector.extract_strided_slice %415 {offsets = [0, 3], sizes = [8, 1], strides = [1, 1]} : vector<8x4xf32> to vector<8x1xf32>
    %442 = vector.broadcast %441 : vector<8x1xf32> to vector<8x32xf32>
    %443 = vector.broadcast %10 : vector<1x32xf32> to vector<8x32xf32>
    %444 = arith.mulf %442, %443 : vector<8x32xf32>
    %445 = arith.addf %440, %444 : vector<8x32xf32>
    %446 = math.tanh %445 : vector<8x32xf32>
    %447 = arith.truncf %446 : vector<8x32xf32> to vector<8x32xbf16>
    %cst_52 = arith.constant dense<0.000000e+00> : vector<8x4xf32>
    %448 = tpu.matmul %447, %4, %cst_52 {dimension_numbers = #tpu.dot_dimension_numbers<[1], [0], [0], [1], [0, 0, 1, 1], [], []>} : vector<8x32xbf16>, vector<32x4xbf16>, vector<8x4xf32> -> vector<8x4xf32>
    %449 = vector.broadcast %2 : vector<1x4xf32> to vector<8x4xf32>
    %450 = arith.addf %448, %449 : vector<8x4xf32>
    %cst_53 = arith.constant 5.000000e-01 : f32
    %451 = arith.mulf %cst_53, %421 : f32
    %452 = vector.broadcast %451 : f32 to vector<8x4xf32>
    %453 = arith.mulf %452, %450 : vector<8x4xf32>
    %454 = arith.addf %415, %453 : vector<8x4xf32>
    %455 = vector.extract_strided_slice %454 {offsets = [0, 0], sizes = [8, 1], strides = [1, 1]} : vector<8x4xf32> to vector<8x1xf32>
    %456 = vector.broadcast %455 : vector<8x1xf32> to vector<8x32xf32>
    %457 = vector.broadcast %7 : vector<1x32xf32> to vector<8x32xf32>
    %458 = arith.mulf %456, %457 : vector<8x32xf32>
    %459 = vector.broadcast %424 : vector<1x32xf32> to vector<8x32xf32>
    %460 = arith.addf %459, %458 : vector<8x32xf32>
    %461 = vector.extract_strided_slice %454 {offsets = [0, 1], sizes = [8, 1], strides = [1, 1]} : vector<8x4xf32> to vector<8x1xf32>
    %462 = vector.broadcast %461 : vector<8x1xf32> to vector<8x32xf32>
    %463 = vector.broadcast %8 : vector<1x32xf32> to vector<8x32xf32>
    %464 = arith.mulf %462, %463 : vector<8x32xf32>
    %465 = arith.addf %460, %464 : vector<8x32xf32>
    %466 = vector.extract_strided_slice %454 {offsets = [0, 2], sizes = [8, 1], strides = [1, 1]} : vector<8x4xf32> to vector<8x1xf32>
    %467 = vector.broadcast %466 : vector<8x1xf32> to vector<8x32xf32>
    %468 = vector.broadcast %9 : vector<1x32xf32> to vector<8x32xf32>
    %469 = arith.mulf %467, %468 : vector<8x32xf32>
    %470 = arith.addf %465, %469 : vector<8x32xf32>
    %471 = vector.extract_strided_slice %454 {offsets = [0, 3], sizes = [8, 1], strides = [1, 1]} : vector<8x4xf32> to vector<8x1xf32>
    %472 = vector.broadcast %471 : vector<8x1xf32> to vector<8x32xf32>
    %473 = vector.broadcast %10 : vector<1x32xf32> to vector<8x32xf32>
    %474 = arith.mulf %472, %473 : vector<8x32xf32>
    %475 = arith.addf %470, %474 : vector<8x32xf32>
    %476 = math.tanh %475 : vector<8x32xf32>
    %477 = arith.truncf %476 : vector<8x32xf32> to vector<8x32xbf16>
    %cst_54 = arith.constant dense<0.000000e+00> : vector<8x4xf32>
    %478 = tpu.matmul %477, %4, %cst_54 {dimension_numbers = #tpu.dot_dimension_numbers<[1], [0], [0], [1], [0, 0, 1, 1], [], []>} : vector<8x32xbf16>, vector<32x4xbf16>, vector<8x4xf32> -> vector<8x4xf32>
    %479 = vector.broadcast %2 : vector<1x4xf32> to vector<8x4xf32>
    %480 = arith.addf %478, %479 : vector<8x4xf32>
    %cst_55 = arith.constant 5.000000e-01 : f32
    %481 = arith.mulf %cst_55, %421 : f32
    %482 = vector.broadcast %481 : f32 to vector<8x4xf32>
    %483 = arith.mulf %482, %480 : vector<8x4xf32>
    %484 = arith.addf %415, %483 : vector<8x4xf32>
    %485 = vector.extract_strided_slice %484 {offsets = [0, 0], sizes = [8, 1], strides = [1, 1]} : vector<8x4xf32> to vector<8x1xf32>
    %486 = vector.broadcast %485 : vector<8x1xf32> to vector<8x32xf32>
    %487 = vector.broadcast %7 : vector<1x32xf32> to vector<8x32xf32>
    %488 = arith.mulf %486, %487 : vector<8x32xf32>
    %489 = vector.broadcast %424 : vector<1x32xf32> to vector<8x32xf32>
    %490 = arith.addf %489, %488 : vector<8x32xf32>
    %491 = vector.extract_strided_slice %484 {offsets = [0, 1], sizes = [8, 1], strides = [1, 1]} : vector<8x4xf32> to vector<8x1xf32>
    %492 = vector.broadcast %491 : vector<8x1xf32> to vector<8x32xf32>
    %493 = vector.broadcast %8 : vector<1x32xf32> to vector<8x32xf32>
    %494 = arith.mulf %492, %493 : vector<8x32xf32>
    %495 = arith.addf %490, %494 : vector<8x32xf32>
    %496 = vector.extract_strided_slice %484 {offsets = [0, 2], sizes = [8, 1], strides = [1, 1]} : vector<8x4xf32> to vector<8x1xf32>
    %497 = vector.broadcast %496 : vector<8x1xf32> to vector<8x32xf32>
    %498 = vector.broadcast %9 : vector<1x32xf32> to vector<8x32xf32>
    %499 = arith.mulf %497, %498 : vector<8x32xf32>
    %500 = arith.addf %495, %499 : vector<8x32xf32>
    %501 = vector.extract_strided_slice %484 {offsets = [0, 3], sizes = [8, 1], strides = [1, 1]} : vector<8x4xf32> to vector<8x1xf32>
    %502 = vector.broadcast %501 : vector<8x1xf32> to vector<8x32xf32>
    %503 = vector.broadcast %10 : vector<1x32xf32> to vector<8x32xf32>
    %504 = arith.mulf %502, %503 : vector<8x32xf32>
    %505 = arith.addf %500, %504 : vector<8x32xf32>
    %506 = math.tanh %505 : vector<8x32xf32>
    %507 = arith.truncf %506 : vector<8x32xf32> to vector<8x32xbf16>
    %cst_56 = arith.constant dense<0.000000e+00> : vector<8x4xf32>
    %508 = tpu.matmul %507, %4, %cst_56 {dimension_numbers = #tpu.dot_dimension_numbers<[1], [0], [0], [1], [0, 0, 1, 1], [], []>} : vector<8x32xbf16>, vector<32x4xbf16>, vector<8x4xf32> -> vector<8x4xf32>
    %509 = vector.broadcast %2 : vector<1x4xf32> to vector<8x4xf32>
    %510 = arith.addf %508, %509 : vector<8x4xf32>
    %511 = vector.broadcast %421 : f32 to vector<8x4xf32>
    %512 = arith.mulf %511, %510 : vector<8x4xf32>
    %513 = arith.addf %415, %512 : vector<8x4xf32>
    %514 = vector.extract_strided_slice %513 {offsets = [0, 0], sizes = [8, 1], strides = [1, 1]} : vector<8x4xf32> to vector<8x1xf32>
    %515 = vector.broadcast %514 : vector<8x1xf32> to vector<8x32xf32>
    %516 = vector.broadcast %7 : vector<1x32xf32> to vector<8x32xf32>
    %517 = arith.mulf %515, %516 : vector<8x32xf32>
    %518 = vector.broadcast %423 : vector<1x32xf32> to vector<8x32xf32>
    %519 = arith.addf %518, %517 : vector<8x32xf32>
    %520 = vector.extract_strided_slice %513 {offsets = [0, 1], sizes = [8, 1], strides = [1, 1]} : vector<8x4xf32> to vector<8x1xf32>
    %521 = vector.broadcast %520 : vector<8x1xf32> to vector<8x32xf32>
    %522 = vector.broadcast %8 : vector<1x32xf32> to vector<8x32xf32>
    %523 = arith.mulf %521, %522 : vector<8x32xf32>
    %524 = arith.addf %519, %523 : vector<8x32xf32>
    %525 = vector.extract_strided_slice %513 {offsets = [0, 2], sizes = [8, 1], strides = [1, 1]} : vector<8x4xf32> to vector<8x1xf32>
    %526 = vector.broadcast %525 : vector<8x1xf32> to vector<8x32xf32>
    %527 = vector.broadcast %9 : vector<1x32xf32> to vector<8x32xf32>
    %528 = arith.mulf %526, %527 : vector<8x32xf32>
    %529 = arith.addf %524, %528 : vector<8x32xf32>
    %530 = vector.extract_strided_slice %513 {offsets = [0, 3], sizes = [8, 1], strides = [1, 1]} : vector<8x4xf32> to vector<8x1xf32>
    %531 = vector.broadcast %530 : vector<8x1xf32> to vector<8x32xf32>
    %532 = vector.broadcast %10 : vector<1x32xf32> to vector<8x32xf32>
    %533 = arith.mulf %531, %532 : vector<8x32xf32>
    %534 = arith.addf %529, %533 : vector<8x32xf32>
    %535 = math.tanh %534 : vector<8x32xf32>
    %536 = arith.truncf %535 : vector<8x32xf32> to vector<8x32xbf16>
    %cst_57 = arith.constant dense<0.000000e+00> : vector<8x4xf32>
    %537 = tpu.matmul %536, %4, %cst_57 {dimension_numbers = #tpu.dot_dimension_numbers<[1], [0], [0], [1], [0, 0, 1, 1], [], []>} : vector<8x32xbf16>, vector<32x4xbf16>, vector<8x4xf32> -> vector<8x4xf32>
    %538 = vector.broadcast %2 : vector<1x4xf32> to vector<8x4xf32>
    %539 = arith.addf %537, %538 : vector<8x4xf32>
    %cst_58 = arith.constant 0.166666672 : f32
    %540 = arith.mulf %421, %cst_58 : f32
    %541 = arith.addf %480, %510 : vector<8x4xf32>
    %cst_59 = arith.constant 2.000000e+00 : f32
    %542 = vector.broadcast %cst_59 : f32 to vector<8x4xf32>
    %543 = arith.mulf %542, %541 : vector<8x4xf32>
    %544 = arith.addf %450, %543 : vector<8x4xf32>
    %545 = arith.addf %544, %539 : vector<8x4xf32>
    %546 = vector.broadcast %540 : f32 to vector<8x4xf32>
    %547 = arith.mulf %546, %545 : vector<8x4xf32>
    %548 = arith.addf %415, %547 : vector<8x4xf32>
    %c4_60 = arith.constant 4 : index
    %c0_61 = arith.constant 0 : index
    %c0_62 = arith.constant 0 : index
    %549 = vector.load %arg9[%c4_60, %c0_61, %c0_62] : memref<8x8x4xf32, #tpu.memory_space<vmem>>, vector<1x8x4xf32>
    %550 = vector.shape_cast %549 : vector<1x8x4xf32> to vector<8x4xf32>
    %551 = vector.shape_cast %548 : vector<8x4xf32> to vector<1x8x4xf32>
    tpu.vector_store %arg9[%c4_60, %c0_61, %c0_62], %551 {strides = array<i32>} : memref<8x8x4xf32, #tpu.memory_space<vmem>>, vector<1x8x4xf32>,
    %c5 = arith.constant 5 : index
    %552 = memref.load %arg1[%c5] : memref<8xf32, #tpu.memory_space<smem>>
    %c4_63 = arith.constant 4 : index
    %553 = memref.load %arg1[%c4_63] : memref<8xf32, #tpu.memory_space<smem>>
    %554 = arith.subf %552, %553 : f32
    %555 = vector.extract_strided_slice %16 {offsets = [4, 0], sizes = [1, 32], strides = [1, 1]} : vector<15x32xf32> to vector<1x32xf32>
    %556 = vector.extract_strided_slice %16 {offsets = [5, 0], sizes = [1, 32], strides = [1, 1]} : vector<15x32xf32> to vector<1x32xf32>
    %557 = vector.extract_strided_slice %16 {offsets = [12, 0], sizes = [1, 32], strides = [1, 1]} : vector<15x32xf32> to vector<1x32xf32>
    %558 = vector.extract_strided_slice %548 {offsets = [0, 0], sizes = [8, 1], strides = [1, 1]} : vector<8x4xf32> to vector<8x1xf32>
    %559 = vector.broadcast %558 : vector<8x1xf32> to vector<8x32xf32>
    %560 = vector.broadcast %7 : vector<1x32xf32> to vector<8x32xf32>
    %561 = arith.mulf %559, %560 : vector<8x32xf32>
    %562 = vector.broadcast %555 : vector<1x32xf32> to vector<8x32xf32>
    %563 = arith.addf %562, %561 : vector<8x32xf32>
    %564 = vector.extract_strided_slice %548 {offsets = [0, 1], sizes = [8, 1], strides = [1, 1]} : vector<8x4xf32> to vector<8x1xf32>
    %565 = vector.broadcast %564 : vector<8x1xf32> to vector<8x32xf32>
    %566 = vector.broadcast %8 : vector<1x32xf32> to vector<8x32xf32>
    %567 = arith.mulf %565, %566 : vector<8x32xf32>
    %568 = arith.addf %563, %567 : vector<8x32xf32>
    %569 = vector.extract_strided_slice %548 {offsets = [0, 2], sizes = [8, 1], strides = [1, 1]} : vector<8x4xf32> to vector<8x1xf32>
    %570 = vector.broadcast %569 : vector<8x1xf32> to vector<8x32xf32>
    %571 = vector.broadcast %9 : vector<1x32xf32> to vector<8x32xf32>
    %572 = arith.mulf %570, %571 : vector<8x32xf32>
    %573 = arith.addf %568, %572 : vector<8x32xf32>
    %574 = vector.extract_strided_slice %548 {offsets = [0, 3], sizes = [8, 1], strides = [1, 1]} : vector<8x4xf32> to vector<8x1xf32>
    %575 = vector.broadcast %574 : vector<8x1xf32> to vector<8x32xf32>
    %576 = vector.broadcast %10 : vector<1x32xf32> to vector<8x32xf32>
    %577 = arith.mulf %575, %576 : vector<8x32xf32>
    %578 = arith.addf %573, %577 : vector<8x32xf32>
    %579 = math.tanh %578 : vector<8x32xf32>
    %580 = arith.truncf %579 : vector<8x32xf32> to vector<8x32xbf16>
    %cst_64 = arith.constant dense<0.000000e+00> : vector<8x4xf32>
    %581 = tpu.matmul %580, %4, %cst_64 {dimension_numbers = #tpu.dot_dimension_numbers<[1], [0], [0], [1], [0, 0, 1, 1], [], []>} : vector<8x32xbf16>, vector<32x4xbf16>, vector<8x4xf32> -> vector<8x4xf32>
    %582 = vector.broadcast %2 : vector<1x4xf32> to vector<8x4xf32>
    %583 = arith.addf %581, %582 : vector<8x4xf32>
    %cst_65 = arith.constant 5.000000e-01 : f32
    %584 = arith.mulf %cst_65, %554 : f32
    %585 = vector.broadcast %584 : f32 to vector<8x4xf32>
    %586 = arith.mulf %585, %583 : vector<8x4xf32>
    %587 = arith.addf %548, %586 : vector<8x4xf32>
    %588 = vector.extract_strided_slice %587 {offsets = [0, 0], sizes = [8, 1], strides = [1, 1]} : vector<8x4xf32> to vector<8x1xf32>
    %589 = vector.broadcast %588 : vector<8x1xf32> to vector<8x32xf32>
    %590 = vector.broadcast %7 : vector<1x32xf32> to vector<8x32xf32>
    %591 = arith.mulf %589, %590 : vector<8x32xf32>
    %592 = vector.broadcast %557 : vector<1x32xf32> to vector<8x32xf32>
    %593 = arith.addf %592, %591 : vector<8x32xf32>
    %594 = vector.extract_strided_slice %587 {offsets = [0, 1], sizes = [8, 1], strides = [1, 1]} : vector<8x4xf32> to vector<8x1xf32>
    %595 = vector.broadcast %594 : vector<8x1xf32> to vector<8x32xf32>
    %596 = vector.broadcast %8 : vector<1x32xf32> to vector<8x32xf32>
    %597 = arith.mulf %595, %596 : vector<8x32xf32>
    %598 = arith.addf %593, %597 : vector<8x32xf32>
    %599 = vector.extract_strided_slice %587 {offsets = [0, 2], sizes = [8, 1], strides = [1, 1]} : vector<8x4xf32> to vector<8x1xf32>
    %600 = vector.broadcast %599 : vector<8x1xf32> to vector<8x32xf32>
    %601 = vector.broadcast %9 : vector<1x32xf32> to vector<8x32xf32>
    %602 = arith.mulf %600, %601 : vector<8x32xf32>
    %603 = arith.addf %598, %602 : vector<8x32xf32>
    %604 = vector.extract_strided_slice %587 {offsets = [0, 3], sizes = [8, 1], strides = [1, 1]} : vector<8x4xf32> to vector<8x1xf32>
    %605 = vector.broadcast %604 : vector<8x1xf32> to vector<8x32xf32>
    %606 = vector.broadcast %10 : vector<1x32xf32> to vector<8x32xf32>
    %607 = arith.mulf %605, %606 : vector<8x32xf32>
    %608 = arith.addf %603, %607 : vector<8x32xf32>
    %609 = math.tanh %608 : vector<8x32xf32>
    %610 = arith.truncf %609 : vector<8x32xf32> to vector<8x32xbf16>
    %cst_66 = arith.constant dense<0.000000e+00> : vector<8x4xf32>
    %611 = tpu.matmul %610, %4, %cst_66 {dimension_numbers = #tpu.dot_dimension_numbers<[1], [0], [0], [1], [0, 0, 1, 1], [], []>} : vector<8x32xbf16>, vector<32x4xbf16>, vector<8x4xf32> -> vector<8x4xf32>
    %612 = vector.broadcast %2 : vector<1x4xf32> to vector<8x4xf32>
    %613 = arith.addf %611, %612 : vector<8x4xf32>
    %cst_67 = arith.constant 5.000000e-01 : f32
    %614 = arith.mulf %cst_67, %554 : f32
    %615 = vector.broadcast %614 : f32 to vector<8x4xf32>
    %616 = arith.mulf %615, %613 : vector<8x4xf32>
    %617 = arith.addf %548, %616 : vector<8x4xf32>
    %618 = vector.extract_strided_slice %617 {offsets = [0, 0], sizes = [8, 1], strides = [1, 1]} : vector<8x4xf32> to vector<8x1xf32>
    %619 = vector.broadcast %618 : vector<8x1xf32> to vector<8x32xf32>
    %620 = vector.broadcast %7 : vector<1x32xf32> to vector<8x32xf32>
    %621 = arith.mulf %619, %620 : vector<8x32xf32>
    %622 = vector.broadcast %557 : vector<1x32xf32> to vector<8x32xf32>
    %623 = arith.addf %622, %621 : vector<8x32xf32>
    %624 = vector.extract_strided_slice %617 {offsets = [0, 1], sizes = [8, 1], strides = [1, 1]} : vector<8x4xf32> to vector<8x1xf32>
    %625 = vector.broadcast %624 : vector<8x1xf32> to vector<8x32xf32>
    %626 = vector.broadcast %8 : vector<1x32xf32> to vector<8x32xf32>
    %627 = arith.mulf %625, %626 : vector<8x32xf32>
    %628 = arith.addf %623, %627 : vector<8x32xf32>
    %629 = vector.extract_strided_slice %617 {offsets = [0, 2], sizes = [8, 1], strides = [1, 1]} : vector<8x4xf32> to vector<8x1xf32>
    %630 = vector.broadcast %629 : vector<8x1xf32> to vector<8x32xf32>
    %631 = vector.broadcast %9 : vector<1x32xf32> to vector<8x32xf32>
    %632 = arith.mulf %630, %631 : vector<8x32xf32>
    %633 = arith.addf %628, %632 : vector<8x32xf32>
    %634 = vector.extract_strided_slice %617 {offsets = [0, 3], sizes = [8, 1], strides = [1, 1]} : vector<8x4xf32> to vector<8x1xf32>
    %635 = vector.broadcast %634 : vector<8x1xf32> to vector<8x32xf32>
    %636 = vector.broadcast %10 : vector<1x32xf32> to vector<8x32xf32>
    %637 = arith.mulf %635, %636 : vector<8x32xf32>
    %638 = arith.addf %633, %637 : vector<8x32xf32>
    %639 = math.tanh %638 : vector<8x32xf32>
    %640 = arith.truncf %639 : vector<8x32xf32> to vector<8x32xbf16>
    %cst_68 = arith.constant dense<0.000000e+00> : vector<8x4xf32>
    %641 = tpu.matmul %640, %4, %cst_68 {dimension_numbers = #tpu.dot_dimension_numbers<[1], [0], [0], [1], [0, 0, 1, 1], [], []>} : vector<8x32xbf16>, vector<32x4xbf16>, vector<8x4xf32> -> vector<8x4xf32>
    %642 = vector.broadcast %2 : vector<1x4xf32> to vector<8x4xf32>
    %643 = arith.addf %641, %642 : vector<8x4xf32>
    %644 = vector.broadcast %554 : f32 to vector<8x4xf32>
    %645 = arith.mulf %644, %643 : vector<8x4xf32>
    %646 = arith.addf %548, %645 : vector<8x4xf32>
    %647 = vector.extract_strided_slice %646 {offsets = [0, 0], sizes = [8, 1], strides = [1, 1]} : vector<8x4xf32> to vector<8x1xf32>
    %648 = vector.broadcast %647 : vector<8x1xf32> to vector<8x32xf32>
    %649 = vector.broadcast %7 : vector<1x32xf32> to vector<8x32xf32>
    %650 = arith.mulf %648, %649 : vector<8x32xf32>
    %651 = vector.broadcast %556 : vector<1x32xf32> to vector<8x32xf32>
    %652 = arith.addf %651, %650 : vector<8x32xf32>
    %653 = vector.extract_strided_slice %646 {offsets = [0, 1], sizes = [8, 1], strides = [1, 1]} : vector<8x4xf32> to vector<8x1xf32>
    %654 = vector.broadcast %653 : vector<8x1xf32> to vector<8x32xf32>
    %655 = vector.broadcast %8 : vector<1x32xf32> to vector<8x32xf32>
    %656 = arith.mulf %654, %655 : vector<8x32xf32>
    %657 = arith.addf %652, %656 : vector<8x32xf32>
    %658 = vector.extract_strided_slice %646 {offsets = [0, 2], sizes = [8, 1], strides = [1, 1]} : vector<8x4xf32> to vector<8x1xf32>
    %659 = vector.broadcast %658 : vector<8x1xf32> to vector<8x32xf32>
    %660 = vector.broadcast %9 : vector<1x32xf32> to vector<8x32xf32>
    %661 = arith.mulf %659, %660 : vector<8x32xf32>
    %662 = arith.addf %657, %661 : vector<8x32xf32>
    %663 = vector.extract_strided_slice %646 {offsets = [0, 3], sizes = [8, 1], strides = [1, 1]} : vector<8x4xf32> to vector<8x1xf32>
    %664 = vector.broadcast %663 : vector<8x1xf32> to vector<8x32xf32>
    %665 = vector.broadcast %10 : vector<1x32xf32> to vector<8x32xf32>
    %666 = arith.mulf %664, %665 : vector<8x32xf32>
    %667 = arith.addf %662, %666 : vector<8x32xf32>
    %668 = math.tanh %667 : vector<8x32xf32>
    %669 = arith.truncf %668 : vector<8x32xf32> to vector<8x32xbf16>
    %cst_69 = arith.constant dense<0.000000e+00> : vector<8x4xf32>
    %670 = tpu.matmul %669, %4, %cst_69 {dimension_numbers = #tpu.dot_dimension_numbers<[1], [0], [0], [1], [0, 0, 1, 1], [], []>} : vector<8x32xbf16>, vector<32x4xbf16>, vector<8x4xf32> -> vector<8x4xf32>
    %671 = vector.broadcast %2 : vector<1x4xf32> to vector<8x4xf32>
    %672 = arith.addf %670, %671 : vector<8x4xf32>
    %cst_70 = arith.constant 0.166666672 : f32
    %673 = arith.mulf %554, %cst_70 : f32
    %674 = arith.addf %613, %643 : vector<8x4xf32>
    %cst_71 = arith.constant 2.000000e+00 : f32
    %675 = vector.broadcast %cst_71 : f32 to vector<8x4xf32>
    %676 = arith.mulf %675, %674 : vector<8x4xf32>
    %677 = arith.addf %583, %676 : vector<8x4xf32>
    %678 = arith.addf %677, %672 : vector<8x4xf32>
    %679 = vector.broadcast %673 : f32 to vector<8x4xf32>
    %680 = arith.mulf %679, %678 : vector<8x4xf32>
    %681 = arith.addf %548, %680 : vector<8x4xf32>
    %c5_72 = arith.constant 5 : index
    %c0_73 = arith.constant 0 : index
    %c0_74 = arith.constant 0 : index
    %682 = vector.load %arg9[%c5_72, %c0_73, %c0_74] : memref<8x8x4xf32, #tpu.memory_space<vmem>>, vector<1x8x4xf32>
    %683 = vector.shape_cast %682 : vector<1x8x4xf32> to vector<8x4xf32>
    %684 = vector.shape_cast %681 : vector<8x4xf32> to vector<1x8x4xf32>
    tpu.vector_store %arg9[%c5_72, %c0_73, %c0_74], %684 {strides = array<i32>} : memref<8x8x4xf32, #tpu.memory_space<vmem>>, vector<1x8x4xf32>,
    %c6 = arith.constant 6 : index
    %685 = memref.load %arg1[%c6] : memref<8xf32, #tpu.memory_space<smem>>
    %c5_75 = arith.constant 5 : index
    %686 = memref.load %arg1[%c5_75] : memref<8xf32, #tpu.memory_space<smem>>
    %687 = arith.subf %685, %686 : f32
    %688 = vector.extract_strided_slice %16 {offsets = [5, 0], sizes = [1, 32], strides = [1, 1]} : vector<15x32xf32> to vector<1x32xf32>
    %689 = vector.extract_strided_slice %16 {offsets = [6, 0], sizes = [1, 32], strides = [1, 1]} : vector<15x32xf32> to vector<1x32xf32>
    %690 = vector.extract_strided_slice %16 {offsets = [13, 0], sizes = [1, 32], strides = [1, 1]} : vector<15x32xf32> to vector<1x32xf32>
    %691 = vector.extract_strided_slice %681 {offsets = [0, 0], sizes = [8, 1], strides = [1, 1]} : vector<8x4xf32> to vector<8x1xf32>
    %692 = vector.broadcast %691 : vector<8x1xf32> to vector<8x32xf32>
    %693 = vector.broadcast %7 : vector<1x32xf32> to vector<8x32xf32>
    %694 = arith.mulf %692, %693 : vector<8x32xf32>
    %695 = vector.broadcast %688 : vector<1x32xf32> to vector<8x32xf32>
    %696 = arith.addf %695, %694 : vector<8x32xf32>
    %697 = vector.extract_strided_slice %681 {offsets = [0, 1], sizes = [8, 1], strides = [1, 1]} : vector<8x4xf32> to vector<8x1xf32>
    %698 = vector.broadcast %697 : vector<8x1xf32> to vector<8x32xf32>
    %699 = vector.broadcast %8 : vector<1x32xf32> to vector<8x32xf32>
    %700 = arith.mulf %698, %699 : vector<8x32xf32>
    %701 = arith.addf %696, %700 : vector<8x32xf32>
    %702 = vector.extract_strided_slice %681 {offsets = [0, 2], sizes = [8, 1], strides = [1, 1]} : vector<8x4xf32> to vector<8x1xf32>
    %703 = vector.broadcast %702 : vector<8x1xf32> to vector<8x32xf32>
    %704 = vector.broadcast %9 : vector<1x32xf32> to vector<8x32xf32>
    %705 = arith.mulf %703, %704 : vector<8x32xf32>
    %706 = arith.addf %701, %705 : vector<8x32xf32>
    %707 = vector.extract_strided_slice %681 {offsets = [0, 3], sizes = [8, 1], strides = [1, 1]} : vector<8x4xf32> to vector<8x1xf32>
    %708 = vector.broadcast %707 : vector<8x1xf32> to vector<8x32xf32>
    %709 = vector.broadcast %10 : vector<1x32xf32> to vector<8x32xf32>
    %710 = arith.mulf %708, %709 : vector<8x32xf32>
    %711 = arith.addf %706, %710 : vector<8x32xf32>
    %712 = math.tanh %711 : vector<8x32xf32>
    %713 = arith.truncf %712 : vector<8x32xf32> to vector<8x32xbf16>
    %cst_76 = arith.constant dense<0.000000e+00> : vector<8x4xf32>
    %714 = tpu.matmul %713, %4, %cst_76 {dimension_numbers = #tpu.dot_dimension_numbers<[1], [0], [0], [1], [0, 0, 1, 1], [], []>} : vector<8x32xbf16>, vector<32x4xbf16>, vector<8x4xf32> -> vector<8x4xf32>
    %715 = vector.broadcast %2 : vector<1x4xf32> to vector<8x4xf32>
    %716 = arith.addf %714, %715 : vector<8x4xf32>
    %cst_77 = arith.constant 5.000000e-01 : f32
    %717 = arith.mulf %cst_77, %687 : f32
    %718 = vector.broadcast %717 : f32 to vector<8x4xf32>
    %719 = arith.mulf %718, %716 : vector<8x4xf32>
    %720 = arith.addf %681, %719 : vector<8x4xf32>
    %721 = vector.extract_strided_slice %720 {offsets = [0, 0], sizes = [8, 1], strides = [1, 1]} : vector<8x4xf32> to vector<8x1xf32>
    %722 = vector.broadcast %721 : vector<8x1xf32> to vector<8x32xf32>
    %723 = vector.broadcast %7 : vector<1x32xf32> to vector<8x32xf32>
    %724 = arith.mulf %722, %723 : vector<8x32xf32>
    %725 = vector.broadcast %690 : vector<1x32xf32> to vector<8x32xf32>
    %726 = arith.addf %725, %724 : vector<8x32xf32>
    %727 = vector.extract_strided_slice %720 {offsets = [0, 1], sizes = [8, 1], strides = [1, 1]} : vector<8x4xf32> to vector<8x1xf32>
    %728 = vector.broadcast %727 : vector<8x1xf32> to vector<8x32xf32>
    %729 = vector.broadcast %8 : vector<1x32xf32> to vector<8x32xf32>
    %730 = arith.mulf %728, %729 : vector<8x32xf32>
    %731 = arith.addf %726, %730 : vector<8x32xf32>
    %732 = vector.extract_strided_slice %720 {offsets = [0, 2], sizes = [8, 1], strides = [1, 1]} : vector<8x4xf32> to vector<8x1xf32>
    %733 = vector.broadcast %732 : vector<8x1xf32> to vector<8x32xf32>
    %734 = vector.broadcast %9 : vector<1x32xf32> to vector<8x32xf32>
    %735 = arith.mulf %733, %734 : vector<8x32xf32>
    %736 = arith.addf %731, %735 : vector<8x32xf32>
    %737 = vector.extract_strided_slice %720 {offsets = [0, 3], sizes = [8, 1], strides = [1, 1]} : vector<8x4xf32> to vector<8x1xf32>
    %738 = vector.broadcast %737 : vector<8x1xf32> to vector<8x32xf32>
    %739 = vector.broadcast %10 : vector<1x32xf32> to vector<8x32xf32>
    %740 = arith.mulf %738, %739 : vector<8x32xf32>
    %741 = arith.addf %736, %740 : vector<8x32xf32>
    %742 = math.tanh %741 : vector<8x32xf32>
    %743 = arith.truncf %742 : vector<8x32xf32> to vector<8x32xbf16>
    %cst_78 = arith.constant dense<0.000000e+00> : vector<8x4xf32>
    %744 = tpu.matmul %743, %4, %cst_78 {dimension_numbers = #tpu.dot_dimension_numbers<[1], [0], [0], [1], [0, 0, 1, 1], [], []>} : vector<8x32xbf16>, vector<32x4xbf16>, vector<8x4xf32> -> vector<8x4xf32>
    %745 = vector.broadcast %2 : vector<1x4xf32> to vector<8x4xf32>
    %746 = arith.addf %744, %745 : vector<8x4xf32>
    %cst_79 = arith.constant 5.000000e-01 : f32
    %747 = arith.mulf %cst_79, %687 : f32
    %748 = vector.broadcast %747 : f32 to vector<8x4xf32>
    %749 = arith.mulf %748, %746 : vector<8x4xf32>
    %750 = arith.addf %681, %749 : vector<8x4xf32>
    %751 = vector.extract_strided_slice %750 {offsets = [0, 0], sizes = [8, 1], strides = [1, 1]} : vector<8x4xf32> to vector<8x1xf32>
    %752 = vector.broadcast %751 : vector<8x1xf32> to vector<8x32xf32>
    %753 = vector.broadcast %7 : vector<1x32xf32> to vector<8x32xf32>
    %754 = arith.mulf %752, %753 : vector<8x32xf32>
    %755 = vector.broadcast %690 : vector<1x32xf32> to vector<8x32xf32>
    %756 = arith.addf %755, %754 : vector<8x32xf32>
    %757 = vector.extract_strided_slice %750 {offsets = [0, 1], sizes = [8, 1], strides = [1, 1]} : vector<8x4xf32> to vector<8x1xf32>
    %758 = vector.broadcast %757 : vector<8x1xf32> to vector<8x32xf32>
    %759 = vector.broadcast %8 : vector<1x32xf32> to vector<8x32xf32>
    %760 = arith.mulf %758, %759 : vector<8x32xf32>
    %761 = arith.addf %756, %760 : vector<8x32xf32>
    %762 = vector.extract_strided_slice %750 {offsets = [0, 2], sizes = [8, 1], strides = [1, 1]} : vector<8x4xf32> to vector<8x1xf32>
    %763 = vector.broadcast %762 : vector<8x1xf32> to vector<8x32xf32>
    %764 = vector.broadcast %9 : vector<1x32xf32> to vector<8x32xf32>
    %765 = arith.mulf %763, %764 : vector<8x32xf32>
    %766 = arith.addf %761, %765 : vector<8x32xf32>
    %767 = vector.extract_strided_slice %750 {offsets = [0, 3], sizes = [8, 1], strides = [1, 1]} : vector<8x4xf32> to vector<8x1xf32>
    %768 = vector.broadcast %767 : vector<8x1xf32> to vector<8x32xf32>
    %769 = vector.broadcast %10 : vector<1x32xf32> to vector<8x32xf32>
    %770 = arith.mulf %768, %769 : vector<8x32xf32>
    %771 = arith.addf %766, %770 : vector<8x32xf32>
    %772 = math.tanh %771 : vector<8x32xf32>
    %773 = arith.truncf %772 : vector<8x32xf32> to vector<8x32xbf16>
    %cst_80 = arith.constant dense<0.000000e+00> : vector<8x4xf32>
    %774 = tpu.matmul %773, %4, %cst_80 {dimension_numbers = #tpu.dot_dimension_numbers<[1], [0], [0], [1], [0, 0, 1, 1], [], []>} : vector<8x32xbf16>, vector<32x4xbf16>, vector<8x4xf32> -> vector<8x4xf32>
    %775 = vector.broadcast %2 : vector<1x4xf32> to vector<8x4xf32>
    %776 = arith.addf %774, %775 : vector<8x4xf32>
    %777 = vector.broadcast %687 : f32 to vector<8x4xf32>
    %778 = arith.mulf %777, %776 : vector<8x4xf32>
    %779 = arith.addf %681, %778 : vector<8x4xf32>
    %780 = vector.extract_strided_slice %779 {offsets = [0, 0], sizes = [8, 1], strides = [1, 1]} : vector<8x4xf32> to vector<8x1xf32>
    %781 = vector.broadcast %780 : vector<8x1xf32> to vector<8x32xf32>
    %782 = vector.broadcast %7 : vector<1x32xf32> to vector<8x32xf32>
    %783 = arith.mulf %781, %782 : vector<8x32xf32>
    %784 = vector.broadcast %689 : vector<1x32xf32> to vector<8x32xf32>
    %785 = arith.addf %784, %783 : vector<8x32xf32>
    %786 = vector.extract_strided_slice %779 {offsets = [0, 1], sizes = [8, 1], strides = [1, 1]} : vector<8x4xf32> to vector<8x1xf32>
    %787 = vector.broadcast %786 : vector<8x1xf32> to vector<8x32xf32>
    %788 = vector.broadcast %8 : vector<1x32xf32> to vector<8x32xf32>
    %789 = arith.mulf %787, %788 : vector<8x32xf32>
    %790 = arith.addf %785, %789 : vector<8x32xf32>
    %791 = vector.extract_strided_slice %779 {offsets = [0, 2], sizes = [8, 1], strides = [1, 1]} : vector<8x4xf32> to vector<8x1xf32>
    %792 = vector.broadcast %791 : vector<8x1xf32> to vector<8x32xf32>
    %793 = vector.broadcast %9 : vector<1x32xf32> to vector<8x32xf32>
    %794 = arith.mulf %792, %793 : vector<8x32xf32>
    %795 = arith.addf %790, %794 : vector<8x32xf32>
    %796 = vector.extract_strided_slice %779 {offsets = [0, 3], sizes = [8, 1], strides = [1, 1]} : vector<8x4xf32> to vector<8x1xf32>
    %797 = vector.broadcast %796 : vector<8x1xf32> to vector<8x32xf32>
    %798 = vector.broadcast %10 : vector<1x32xf32> to vector<8x32xf32>
    %799 = arith.mulf %797, %798 : vector<8x32xf32>
    %800 = arith.addf %795, %799 : vector<8x32xf32>
    %801 = math.tanh %800 : vector<8x32xf32>
    %802 = arith.truncf %801 : vector<8x32xf32> to vector<8x32xbf16>
    %cst_81 = arith.constant dense<0.000000e+00> : vector<8x4xf32>
    %803 = tpu.matmul %802, %4, %cst_81 {dimension_numbers = #tpu.dot_dimension_numbers<[1], [0], [0], [1], [0, 0, 1, 1], [], []>} : vector<8x32xbf16>, vector<32x4xbf16>, vector<8x4xf32> -> vector<8x4xf32>
    %804 = vector.broadcast %2 : vector<1x4xf32> to vector<8x4xf32>
    %805 = arith.addf %803, %804 : vector<8x4xf32>
    %cst_82 = arith.constant 0.166666672 : f32
    %806 = arith.mulf %687, %cst_82 : f32
    %807 = arith.addf %746, %776 : vector<8x4xf32>
    %cst_83 = arith.constant 2.000000e+00 : f32
    %808 = vector.broadcast %cst_83 : f32 to vector<8x4xf32>
    %809 = arith.mulf %808, %807 : vector<8x4xf32>
    %810 = arith.addf %716, %809 : vector<8x4xf32>
    %811 = arith.addf %810, %805 : vector<8x4xf32>
    %812 = vector.broadcast %806 : f32 to vector<8x4xf32>
    %813 = arith.mulf %812, %811 : vector<8x4xf32>
    %814 = arith.addf %681, %813 : vector<8x4xf32>
    %c6_84 = arith.constant 6 : index
    %c0_85 = arith.constant 0 : index
    %c0_86 = arith.constant 0 : index
    %815 = vector.load %arg9[%c6_84, %c0_85, %c0_86] : memref<8x8x4xf32, #tpu.memory_space<vmem>>, vector<1x8x4xf32>
    %816 = vector.shape_cast %815 : vector<1x8x4xf32> to vector<8x4xf32>
    %817 = vector.shape_cast %814 : vector<8x4xf32> to vector<1x8x4xf32>
    tpu.vector_store %arg9[%c6_84, %c0_85, %c0_86], %817 {strides = array<i32>} : memref<8x8x4xf32, #tpu.memory_space<vmem>>, vector<1x8x4xf32>,
    %c7 = arith.constant 7 : index
    %818 = memref.load %arg1[%c7] : memref<8xf32, #tpu.memory_space<smem>>
    %c6_87 = arith.constant 6 : index
    %819 = memref.load %arg1[%c6_87] : memref<8xf32, #tpu.memory_space<smem>>
    %820 = arith.subf %818, %819 : f32
    %821 = vector.extract_strided_slice %16 {offsets = [6, 0], sizes = [1, 32], strides = [1, 1]} : vector<15x32xf32> to vector<1x32xf32>
    %822 = vector.extract_strided_slice %16 {offsets = [7, 0], sizes = [1, 32], strides = [1, 1]} : vector<15x32xf32> to vector<1x32xf32>
    %823 = vector.extract_strided_slice %16 {offsets = [14, 0], sizes = [1, 32], strides = [1, 1]} : vector<15x32xf32> to vector<1x32xf32>
    %824 = vector.extract_strided_slice %814 {offsets = [0, 0], sizes = [8, 1], strides = [1, 1]} : vector<8x4xf32> to vector<8x1xf32>
    %825 = vector.broadcast %824 : vector<8x1xf32> to vector<8x32xf32>
    %826 = vector.broadcast %7 : vector<1x32xf32> to vector<8x32xf32>
    %827 = arith.mulf %825, %826 : vector<8x32xf32>
    %828 = vector.broadcast %821 : vector<1x32xf32> to vector<8x32xf32>
    %829 = arith.addf %828, %827 : vector<8x32xf32>
    %830 = vector.extract_strided_slice %814 {offsets = [0, 1], sizes = [8, 1], strides = [1, 1]} : vector<8x4xf32> to vector<8x1xf32>
    %831 = vector.broadcast %830 : vector<8x1xf32> to vector<8x32xf32>
    %832 = vector.broadcast %8 : vector<1x32xf32> to vector<8x32xf32>
    %833 = arith.mulf %831, %832 : vector<8x32xf32>
    %834 = arith.addf %829, %833 : vector<8x32xf32>
    %835 = vector.extract_strided_slice %814 {offsets = [0, 2], sizes = [8, 1], strides = [1, 1]} : vector<8x4xf32> to vector<8x1xf32>
    %836 = vector.broadcast %835 : vector<8x1xf32> to vector<8x32xf32>
    %837 = vector.broadcast %9 : vector<1x32xf32> to vector<8x32xf32>
    %838 = arith.mulf %836, %837 : vector<8x32xf32>
    %839 = arith.addf %834, %838 : vector<8x32xf32>
    %840 = vector.extract_strided_slice %814 {offsets = [0, 3], sizes = [8, 1], strides = [1, 1]} : vector<8x4xf32> to vector<8x1xf32>
    %841 = vector.broadcast %840 : vector<8x1xf32> to vector<8x32xf32>
    %842 = vector.broadcast %10 : vector<1x32xf32> to vector<8x32xf32>
    %843 = arith.mulf %841, %842 : vector<8x32xf32>
    %844 = arith.addf %839, %843 : vector<8x32xf32>
    %845 = math.tanh %844 : vector<8x32xf32>
    %846 = arith.truncf %845 : vector<8x32xf32> to vector<8x32xbf16>
    %cst_88 = arith.constant dense<0.000000e+00> : vector<8x4xf32>
    %847 = tpu.matmul %846, %4, %cst_88 {dimension_numbers = #tpu.dot_dimension_numbers<[1], [0], [0], [1], [0, 0, 1, 1], [], []>} : vector<8x32xbf16>, vector<32x4xbf16>, vector<8x4xf32> -> vector<8x4xf32>
    %848 = vector.broadcast %2 : vector<1x4xf32> to vector<8x4xf32>
    %849 = arith.addf %847, %848 : vector<8x4xf32>
    %cst_89 = arith.constant 5.000000e-01 : f32
    %850 = arith.mulf %cst_89, %820 : f32
    %851 = vector.broadcast %850 : f32 to vector<8x4xf32>
    %852 = arith.mulf %851, %849 : vector<8x4xf32>
    %853 = arith.addf %814, %852 : vector<8x4xf32>
    %854 = vector.extract_strided_slice %853 {offsets = [0, 0], sizes = [8, 1], strides = [1, 1]} : vector<8x4xf32> to vector<8x1xf32>
    %855 = vector.broadcast %854 : vector<8x1xf32> to vector<8x32xf32>
    %856 = vector.broadcast %7 : vector<1x32xf32> to vector<8x32xf32>
    %857 = arith.mulf %855, %856 : vector<8x32xf32>
    %858 = vector.broadcast %823 : vector<1x32xf32> to vector<8x32xf32>
    %859 = arith.addf %858, %857 : vector<8x32xf32>
    %860 = vector.extract_strided_slice %853 {offsets = [0, 1], sizes = [8, 1], strides = [1, 1]} : vector<8x4xf32> to vector<8x1xf32>
    %861 = vector.broadcast %860 : vector<8x1xf32> to vector<8x32xf32>
    %862 = vector.broadcast %8 : vector<1x32xf32> to vector<8x32xf32>
    %863 = arith.mulf %861, %862 : vector<8x32xf32>
    %864 = arith.addf %859, %863 : vector<8x32xf32>
    %865 = vector.extract_strided_slice %853 {offsets = [0, 2], sizes = [8, 1], strides = [1, 1]} : vector<8x4xf32> to vector<8x1xf32>
    %866 = vector.broadcast %865 : vector<8x1xf32> to vector<8x32xf32>
    %867 = vector.broadcast %9 : vector<1x32xf32> to vector<8x32xf32>
    %868 = arith.mulf %866, %867 : vector<8x32xf32>
    %869 = arith.addf %864, %868 : vector<8x32xf32>
    %870 = vector.extract_strided_slice %853 {offsets = [0, 3], sizes = [8, 1], strides = [1, 1]} : vector<8x4xf32> to vector<8x1xf32>
    %871 = vector.broadcast %870 : vector<8x1xf32> to vector<8x32xf32>
    %872 = vector.broadcast %10 : vector<1x32xf32> to vector<8x32xf32>
    %873 = arith.mulf %871, %872 : vector<8x32xf32>
    %874 = arith.addf %869, %873 : vector<8x32xf32>
    %875 = math.tanh %874 : vector<8x32xf32>
    %876 = arith.truncf %875 : vector<8x32xf32> to vector<8x32xbf16>
    %cst_90 = arith.constant dense<0.000000e+00> : vector<8x4xf32>
    %877 = tpu.matmul %876, %4, %cst_90 {dimension_numbers = #tpu.dot_dimension_numbers<[1], [0], [0], [1], [0, 0, 1, 1], [], []>} : vector<8x32xbf16>, vector<32x4xbf16>, vector<8x4xf32> -> vector<8x4xf32>
    %878 = vector.broadcast %2 : vector<1x4xf32> to vector<8x4xf32>
    %879 = arith.addf %877, %878 : vector<8x4xf32>
    %cst_91 = arith.constant 5.000000e-01 : f32
    %880 = arith.mulf %cst_91, %820 : f32
    %881 = vector.broadcast %880 : f32 to vector<8x4xf32>
    %882 = arith.mulf %881, %879 : vector<8x4xf32>
    %883 = arith.addf %814, %882 : vector<8x4xf32>
    %884 = vector.extract_strided_slice %883 {offsets = [0, 0], sizes = [8, 1], strides = [1, 1]} : vector<8x4xf32> to vector<8x1xf32>
    %885 = vector.broadcast %884 : vector<8x1xf32> to vector<8x32xf32>
    %886 = vector.broadcast %7 : vector<1x32xf32> to vector<8x32xf32>
    %887 = arith.mulf %885, %886 : vector<8x32xf32>
    %888 = vector.broadcast %823 : vector<1x32xf32> to vector<8x32xf32>
    %889 = arith.addf %888, %887 : vector<8x32xf32>
    %890 = vector.extract_strided_slice %883 {offsets = [0, 1], sizes = [8, 1], strides = [1, 1]} : vector<8x4xf32> to vector<8x1xf32>
    %891 = vector.broadcast %890 : vector<8x1xf32> to vector<8x32xf32>
    %892 = vector.broadcast %8 : vector<1x32xf32> to vector<8x32xf32>
    %893 = arith.mulf %891, %892 : vector<8x32xf32>
    %894 = arith.addf %889, %893 : vector<8x32xf32>
    %895 = vector.extract_strided_slice %883 {offsets = [0, 2], sizes = [8, 1], strides = [1, 1]} : vector<8x4xf32> to vector<8x1xf32>
    %896 = vector.broadcast %895 : vector<8x1xf32> to vector<8x32xf32>
    %897 = vector.broadcast %9 : vector<1x32xf32> to vector<8x32xf32>
    %898 = arith.mulf %896, %897 : vector<8x32xf32>
    %899 = arith.addf %894, %898 : vector<8x32xf32>
    %900 = vector.extract_strided_slice %883 {offsets = [0, 3], sizes = [8, 1], strides = [1, 1]} : vector<8x4xf32> to vector<8x1xf32>
    %901 = vector.broadcast %900 : vector<8x1xf32> to vector<8x32xf32>
    %902 = vector.broadcast %10 : vector<1x32xf32> to vector<8x32xf32>
    %903 = arith.mulf %901, %902 : vector<8x32xf32>
    %904 = arith.addf %899, %903 : vector<8x32xf32>
    %905 = math.tanh %904 : vector<8x32xf32>
    %906 = arith.truncf %905 : vector<8x32xf32> to vector<8x32xbf16>
    %cst_92 = arith.constant dense<0.000000e+00> : vector<8x4xf32>
    %907 = tpu.matmul %906, %4, %cst_92 {dimension_numbers = #tpu.dot_dimension_numbers<[1], [0], [0], [1], [0, 0, 1, 1], [], []>} : vector<8x32xbf16>, vector<32x4xbf16>, vector<8x4xf32> -> vector<8x4xf32>
    %908 = vector.broadcast %2 : vector<1x4xf32> to vector<8x4xf32>
    %909 = arith.addf %907, %908 : vector<8x4xf32>
    %910 = vector.broadcast %820 : f32 to vector<8x4xf32>
    %911 = arith.mulf %910, %909 : vector<8x4xf32>
    %912 = arith.addf %814, %911 : vector<8x4xf32>
    %913 = vector.extract_strided_slice %912 {offsets = [0, 0], sizes = [8, 1], strides = [1, 1]} : vector<8x4xf32> to vector<8x1xf32>
    %914 = vector.broadcast %913 : vector<8x1xf32> to vector<8x32xf32>
    %915 = vector.broadcast %7 : vector<1x32xf32> to vector<8x32xf32>
    %916 = arith.mulf %914, %915 : vector<8x32xf32>
    %917 = vector.broadcast %822 : vector<1x32xf32> to vector<8x32xf32>
    %918 = arith.addf %917, %916 : vector<8x32xf32>
    %919 = vector.extract_strided_slice %912 {offsets = [0, 1], sizes = [8, 1], strides = [1, 1]} : vector<8x4xf32> to vector<8x1xf32>
    %920 = vector.broadcast %919 : vector<8x1xf32> to vector<8x32xf32>
    %921 = vector.broadcast %8 : vector<1x32xf32> to vector<8x32xf32>
    %922 = arith.mulf %920, %921 : vector<8x32xf32>
    %923 = arith.addf %918, %922 : vector<8x32xf32>
    %924 = vector.extract_strided_slice %912 {offsets = [0, 2], sizes = [8, 1], strides = [1, 1]} : vector<8x4xf32> to vector<8x1xf32>
    %925 = vector.broadcast %924 : vector<8x1xf32> to vector<8x32xf32>
    %926 = vector.broadcast %9 : vector<1x32xf32> to vector<8x32xf32>
    %927 = arith.mulf %925, %926 : vector<8x32xf32>
    %928 = arith.addf %923, %927 : vector<8x32xf32>
    %929 = vector.extract_strided_slice %912 {offsets = [0, 3], sizes = [8, 1], strides = [1, 1]} : vector<8x4xf32> to vector<8x1xf32>
    %930 = vector.broadcast %929 : vector<8x1xf32> to vector<8x32xf32>
    %931 = vector.broadcast %10 : vector<1x32xf32> to vector<8x32xf32>
    %932 = arith.mulf %930, %931 : vector<8x32xf32>
    %933 = arith.addf %928, %932 : vector<8x32xf32>
    %934 = math.tanh %933 : vector<8x32xf32>
    %935 = arith.truncf %934 : vector<8x32xf32> to vector<8x32xbf16>
    %cst_93 = arith.constant dense<0.000000e+00> : vector<8x4xf32>
    %936 = tpu.matmul %935, %4, %cst_93 {dimension_numbers = #tpu.dot_dimension_numbers<[1], [0], [0], [1], [0, 0, 1, 1], [], []>} : vector<8x32xbf16>, vector<32x4xbf16>, vector<8x4xf32> -> vector<8x4xf32>
    %937 = vector.broadcast %2 : vector<1x4xf32> to vector<8x4xf32>
    %938 = arith.addf %936, %937 : vector<8x4xf32>
    %cst_94 = arith.constant 0.166666672 : f32
    %939 = arith.mulf %820, %cst_94 : f32
    %940 = arith.addf %879, %909 : vector<8x4xf32>
    %cst_95 = arith.constant 2.000000e+00 : f32
    %941 = vector.broadcast %cst_95 : f32 to vector<8x4xf32>
    %942 = arith.mulf %941, %940 : vector<8x4xf32>
    %943 = arith.addf %849, %942 : vector<8x4xf32>
    %944 = arith.addf %943, %938 : vector<8x4xf32>
    %945 = vector.broadcast %939 : f32 to vector<8x4xf32>
    %946 = arith.mulf %945, %944 : vector<8x4xf32>
    %947 = arith.addf %814, %946 : vector<8x4xf32>
    %c7_96 = arith.constant 7 : index
    %c0_97 = arith.constant 0 : index
    %c0_98 = arith.constant 0 : index
    %948 = vector.load %arg9[%c7_96, %c0_97, %c0_98] : memref<8x8x4xf32, #tpu.memory_space<vmem>>, vector<1x8x4xf32>
    %949 = vector.shape_cast %948 : vector<1x8x4xf32> to vector<8x4xf32>
    %950 = vector.shape_cast %947 : vector<8x4xf32> to vector<1x8x4xf32>
    tpu.vector_store %arg9[%c7_96, %c0_97, %c0_98], %950 {strides = array<i32>} : memref<8x8x4xf32, #tpu.memory_space<vmem>>, vector<1x8x4xf32>,
    return
  }
  func.func @transform_0(%arg0: i32) -> i32 {
    %c0_i32 = arith.constant 0 : i32
    %c0_i32_0 = arith.constant 0 : i32
    return %c0_i32 : i32
  }
  func.func @transform_1(%arg0: i32) -> (i32, i32) {
    %c0_i32 = arith.constant 0 : i32
    %c0_i32_0 = arith.constant 0 : i32
    %c0_i32_1 = arith.constant 0 : i32
    return %c0_i32, %c0_i32_0 : i32, i32
  }
  func.func @transform_2(%arg0: i32) -> (i32, i32) {
    %c0_i32 = arith.constant 0 : i32
    %c0_i32_0 = arith.constant 0 : i32
    return %arg0, %c0_i32 : i32, i32
  }
  func.func @transform_3(%arg0: i32) -> (i32, i32) {
    %c0_i32 = arith.constant 0 : i32
    %c0_i32_0 = arith.constant 0 : i32
    %c0_i32_1 = arith.constant 0 : i32
    return %c0_i32, %c0_i32_0 : i32, i32
  }
  func.func @transform_4(%arg0: i32) -> (i32, i32) {
    %c0_i32 = arith.constant 0 : i32
    %c0_i32_0 = arith.constant 0 : i32
    %c0_i32_1 = arith.constant 0 : i32
    return %c0_i32, %c0_i32_0 : i32, i32
  }
  func.func @transform_5(%arg0: i32) -> (i32, i32) {
    %c0_i32 = arith.constant 0 : i32
    %c0_i32_0 = arith.constant 0 : i32
    %c0_i32_1 = arith.constant 0 : i32
    return %c0_i32, %c0_i32_0 : i32, i32
  }
  func.func @transform_6(%arg0: i32) -> (i32, i32) {
    %c0_i32 = arith.constant 0 : i32
    %c0_i32_0 = arith.constant 0 : i32
    %c0_i32_1 = arith.constant 0 : i32
    return %c0_i32, %c0_i32_0 : i32, i32
  }
  func.func @transform_7(%arg0: i32) -> (i32, i32) {
    %c0_i32 = arith.constant 0 : i32
    %c0_i32_0 = arith.constant 0 : i32
    %c0_i32_1 = arith.constant 0 : i32
    return %c0_i32, %c0_i32_0 : i32, i32
  }
  func.func @transform_8(%arg0: i32) -> (i32, i32, i32) {
    %c0_i32 = arith.constant 0 : i32
    %c0_i32_0 = arith.constant 0 : i32
    %c0_i32_1 = arith.constant 0 : i32
    return %c0_i32, %arg0, %c0_i32_0 : i32, i32, i32
  }
}

</mosaic_0001>

<bundles_post_ra>
// kernel: tpu_custom_call.1
= control target key start
LH: loop header
LB: loop body
LE: loop exit
PB: predicated region body
PF: predicated region fallthrough
CT: control target
= control target key end

     0   :  { %13 = vsyncpa [#allocation3], 0  ;;  %s3360_s27 = smov 0   ;;  %s3362_s28 = smov 0   ;;  %s4211_s0 = inlined_call_operand.vmem [shape: f32[8], index: 0, kind: input, shape index: {}]   ;;  %s4212_s1 = inlined_call_operand.vmem [shape: f32[15,1], index: 1, kind: input, shape index: {}]   ;;  %s4213_s2 = inlined_call_operand.vmem [shape: f32[16,4], index: 2, kind: input, shape index: {}]   ;;  %s4214_s3 = inlined_call_operand.vmem [shape: f32[4,32], index: 3, kind: input, shape index: {}]   ;;  %s4215_s4 = inlined_call_operand.vmem [shape: f32[1,32], index: 4, kind: input, shape index: {}]   ;;  %s4216_s5 = inlined_call_operand.vmem [shape: f32[1,32], index: 5, kind: input, shape index: {}]   ;;  %s4217_s6 = inlined_call_operand.vmem [shape: f32[32,4], index: 6, kind: input, shape index: {}]   ;;  %s4218_s7 = inlined_call_operand.vmem [shape: f32[1,4], index: 7, kind: input, shape index: {}]   ;;  %s4219_s8 = inlined_call_operand.vmem [shape: f32[8,16,4], index: 8, kind: output, shape index: {}]  }
   0x1   :  { %s3364_s29 = smov 0  }
   0x2 LB: > { %s3373_s30 = sadd.s32 4294967295, %s3306_s29   ;;  %s3375_s9 = sadd.s32 1, %s3306_s29   ;;  %s3306_s29 = sphi %s3364_s29, %s4224_s29   ;;  %s3302_s28 = sphi %s3362_s28, %s4223_s28   ;;  %s3298_s27 = sphi %s3360_s27, %s4222_s27  }
   0x3   : > { %s196_s10 = ssub.s32 %s3306_s29, %s3375_s9  ;;  %s199_s11 = sadd.s32 1, %s3302_s28 }
   0x4   : > { %p197_p0 = scmp.eq.s32.totalorder %s196_s10, 0  ;;  %p209_p1 = scmp.ne.s32.totalorder %s3302_s28, %s3298_s27 }
   0x5   : > { %p210_p2 = scmp.eq.s32.totalorder %s3373_s30, 1  ;;  %p2683_p3 = scmp.ge.s32.totalorder %s3306_s29, 1 }
   0x6   : > { %s3383_s12 = scalar_select %p197_p0, %s3302_s28, %s199_s11  }
   0x7   : > { %p3385_p4 = por %p210_p2, %p209_p1  ;;  %p223_p5 = scmp.lt.s32.totalorder %s3306_s29, 3 }
   0x8   : > { %p3061_p6 = scmp.eq.s32.totalorder %s3373_s30, 0  ;;  %s236_s17 = sshll.u32 %s4211_s0, 4  ;;  %s237_s17 = int_to_ptr.vmem [resolvable:$true] %s236_s17 }
   0x9   : > { %p3390_p7 = pnand %p2683_p3, %p223_p5  ;;  %s3265_s18 = scalar_lea.vmem %s237_s17, 16 }
   0xa   : > { %p3266_p10 = scmp.ne.s32.totalorder %s237_s17, %s3265_s18  ;;  %p3273_p0 = scmp.lt.s32.totalorder %s237_s17, %s237_s17 }
   0xb   : > { %p3057_p8 = pneg %p3390_p7  ;;  %p3274_p1 = scmp.lt.s32.totalorder %s3265_s18, %s3265_s18 }
   0xd   : > { %p3058_p9 = pnand %p3061_p6, %p3057_p8  ;;  %p3275_p2 = por %p3274_p1, %p3273_p0 }
   0xf   : > { %p3267_p11 = pneg %p3058_p9 }
  0x11   : > { %p3268_p12 = pnand %p3267_p11, %p3266_p10 }
  0x13   : > { %p3269_p13 = pneg %p3268_p12 }
  0x15   : > { %p3276_p3 = pnand %p3275_p2, %p3269_p13 }
  0x17   : > { %3279 = shalt.err (!%p3276_p3)
}
  0x18   : > { %s3308_s19 = smov [#allocation2]   ;;  %274 = sbr.rel (%p3390_p7) target bundleno = 10478 (0x28ee), region = 52 }
  0x19   : > { %3060 = dma.vmem_to_smem (!%p3058_p9), %s237_s17, 16, %s3308_s19, [#allocation3]  }
  0x1f   : > { %3293 = dma.done.wait (%p3061_p6), [#allocation3], 16  }
  0x20   : > { %3295 = vsyncadd (%p3061_p6), [#allocation3], 4294967280 }
  0x21   : > { %280 = sfence }
  0x22   : > { %v323_v0 = vld [vmem:[%s4212_s1] sm:$0xff]  ;;  %p307_p5 = scmp.lt.s32.totalorder %s3373_s30, 1  ;;  %v3309_v1 = vmov 0   ;;  %v3310_v2 = vmov 1   ;;  %v3311_v4 = vmov 2   ;;  %v3312_v5 = vmov 3  }
  0x23   : > { %3094 = vset.pattern.permute.xlu0 %v3309_v1  ;;  %3095 = vset.pattern.permute.xlu1 %v3310_v2  ;;  %v315_v6 = vld [vmem:[%s4217_s6] sm:$0xff]  ;;  %v316_v7 = vld [vmem:[%s4217_s6 + $0x8] sm:$0xff]  ;;  %v3313_v9 = vmov 0.0   ;;  %v317_v10 = vld [vmem:[%s4217_s6 + $0x10] sm:$0xff]  ;;  %vm3314_vm0 = vmmov 0   ;;  %v361_v13 = vlaneseq  ;;  %vm409_vm1 = vcmask 261120  }
  0x24   : > { %327 = vperm.xlu0 %3094, %v323_v0   ;;  %s308_s22 = scalar_select %p307_p5, %s3373_s30, 1  ;;  %v3433_v8 = vpack.c.bf16 %v316_v7, %v315_v6  ;;  %2829 = vmatprep.subr.bf16.mxu0 %v3313_v9  ;;  %v318_v11 = vld [vmem:[%s4217_s6 + $0x18] sm:$0xff]  ;;  %v3462_v15 = vld [vmem:[%s4216_s5] ss:$0 sm:$0xff]  ;;  %v324_v46 = vld [vmem:[%s4212_s1 + $0x8] sm:$0x7f] }
  0x25   : > { %2837 = vmatprep.subr.bf16.mxu1 %v3313_v9  ;;  %v3447_v12 = vpack.c.bf16 %v318_v11, %v317_v10  ;;  %2833 = vmatprep.mubr.msk.bf16.mxu0 %vm3314_vm0, %v3313_v9  ;;  %v3457_v14 = vshrl.u32 %v361_v13, 7  ;;  %v322_v17 = vld [vmem:[%s4214_s3] sm:$0xf]  ;;  %s3517_s29 = sld [smem:[#allocation2 + $0x1]]  ;;  %s354_s10 = sld [smem:[#allocation2]]  ;;  %vm351_vm2 = vcmask 31744  }
  0x26   : > { %s2689_s23 = sshll.u32 %s308_s22, 3  ;;  %2830 = vmatpush3.bf16.msra.mxu0 %v3433_v8  ;;  %2838 = vmatpush3.bf16.msra.mxu1 %v3433_v8  ;;  %v2691_v19 = vld [vmem:[%s4215_s4] ss:$0 sm:$0xff]  ;;  %s304_s17 = sand.u32 1, %s3298_s27  }
  0x27   : > { %s310_s26 = scalar_lea.vmem %s4213_s2, %s2689_s23  ;;  %2831 = vmatprep.subr.bf16.mxu0 %v3313_v9  ;;  %2839 = vmatprep.subr.bf16.mxu1 %v3313_v9  ;;  %v3465_v16 = vsub.s32 0, %v3457_v14  ;;  %v3474_v20 = vsub.s32 1, %v3457_v14  ;;  %v2474_v24 = vsub.s32 7, %v3457_v14  ;;  %v3489_v28 = vsub.s32 2, %v3457_v14  ;;  %v3526_v47 = vld [vmem:[%s4218_s7] ss:$0 sm:$0xff] }
  0x28   : > { %v3417_v3 = vld [vmem:[%s310_s26] sm:$0xff]  ;;  %2841 = vmatprep.mubr.msk.bf16.mxu1 %vm3314_vm0, %v3313_v9  ;;  %v3492_v29 = vsub.s32 3, %v3457_v14  ;;  %s2688_s18 = sshll.u32 %s304_s17, 6  ;;  %s3628_s27 = sld [smem:[#allocation2 + $0x2]] }
  0x29   : > { %372 = vperm.xlu1 %3095, %v3417_v3   ;;  %358 = vperm.xlu0 %3094, %v3417_v3   ;;  %v3478_v22 = vrot.slane %v322_v17, %v3465_v16  ;;  %v3484_v25 = vrot.slane %v322_v17, %v3474_v20  ;;  %v3496_v32 = vrot.slane %v322_v17, %v3489_v28  ;;  %s3594_s19 = scalar_lea.vmem [#allocation4], %s2688_s18  ;;  %s3726_s24 = sld [smem:[#allocation2 + $0x3]] }
  0x2a   : > { %2832 = vmatpush3.bf16.msra.mxu0 %v3447_v12  ;;  %2840 = vmatpush3.bf16.msra.mxu1 %v3447_v12  ;;  %v3499_v33 = vrot.slane %v322_v17, %v3492_v29  ;;  %352 = vst.msk [vmem:[%s3594_s19] sm:$0xff] %vm351_vm2, %v3417_v3  ;;  %s3929_s18 = sld [smem:[#allocation2 + $0x5]]  ;;  %s2742_s16 = sshll.u32 (%p3385_p4), %s3373_s30, 3 }
  0x2b   : > { %2845 = vmatprep.subr.bf16.mxu0 %v3313_v9  ;;  %2853 = vmatprep.subr.bf16.mxu1 %v3313_v9  ;;  %s3520_s11 = ssub.f32 %s3517_s29, %s354_s10  ;;  %s3824_s10 = sld [smem:[#allocation2 + $0x4]] }
  0x2d   : > { %3096 = vset.pattern.permute.xlu1 %v3311_v4  ;;  %3097 = vset.pattern.permute.xlu0 %v3312_v5  ;;  %s453_s14 = smul.f32 0.5, %s3520_s11 }
  0x2e   : > { %382 = vperm.xlu1 %3096, %v3417_v3   ;;  %392 = vperm.xlu0 %3097, %v3417_v3   ;;  %s680_s20 = smul.f32 0.16666667, %s3520_s11  ;;  %s3632_s21 = ssub.f32 %s3628_s27, %s3517_s29 }
  0x2f   : > { %v454_v49 = vstv %s453_s14  ;;  %s3730_s25 = ssub.f32 %s3726_s24, %s3628_s27 }
  0x30   : > { %s763_s22 = smul.f32 0.5, %s3632_s21 }
  0x31   : > { %s990_s23 = smul.f32 0.16666667, %s3632_s21 }
  0x32   : > { %3098 = vset.pattern.permute.xlu1 %v3309_v1  ;;  %3099 = vset.pattern.permute.xlu0 %v3310_v2  ;;  %s1073_s26 = smul.f32 0.5, %s3730_s25 }
  0x33   : > { %332 = vperm.xlu1 %3098, %v324_v46   ;;  %s1300_s29 = smul.f32 0.16666667, %s3730_s25 }
  0xa3   : > { %v328_v18 = vpop.permute.xlu0 %327 }
  0xa4   : > { %v341_v21 = vmul.f32 %v3462_v15, %v328_v18 }
  0xa6   : > { %v3480_v23 = vadd.f32 %v2691_v19, %v341_v21 }
  0xa8   : > { %v373_v26 = vpop.permute.xlu1 %372  ;;  %v369_v27 = vrot.slane %v3480_v23, %v3465_v16  ;;  %v359_v30 = vpop.permute.xlu0 %358  ;;  %v3502_v34 = vrot.slane %v3480_v23, %v2474_v24 }
  0xa9   : > { %v365_v31 = vmul.f32 %v3478_v22, %v359_v30  ;;  %v379_v35 = vmul.f32 %v3484_v25, %v373_v26 }
  0xab   : > { %v370_v36 = vadd.f32 %v369_v27, %v365_v31 }
  0xad   : > { %v380_v37 = vadd.f32 %v379_v35, %v370_v36  ;;  %v383_v38 = vpop.permute.xlu1 %382  ;;  %v393_v39 = vpop.permute.xlu0 %392 }
  0xae   : > { %v389_v40 = vmul.f32 %v3496_v32, %v383_v38  ;;  %v399_v41 = vmul.f32 %v3499_v33, %v393_v39 }
  0xb0   : > { %v390_v42 = vadd.f32 %v389_v40, %v380_v37 }
  0xb2   : > { %v400_v43 = vadd.f32 %v399_v41, %v390_v42  ;;  %v333_v56 = vpop.permute.xlu1 %332 }
  0xb3   : > { %v342_v57 = vmul.f32 %v3462_v15, %v333_v56 }
  0xb4   : > { %3207 = vtanh.f32 %v400_v43 }
  0xb5   : > { %v3538_v58 = vadd.f32 %v2691_v19, %v342_v57 }
  0xb7   : > { %v466_v59 = vrot.slane %v3538_v58, %v3465_v16 }
  0xbe   : > { %v3208_v44 = vpop.eup %3207 }
  0xbf   : > { %v402_v45 = vpack.c.bf16 %v3208_v44, %v3208_v44 }
  0xc1   : > { %2834 = vmatmul.mubr.msk.bf16.vlgmr.msra.gmra.mrb[0].mxu0 %vm409_vm1, %v402_v45 }
  0xc2   : > { %2846 = vmatpush3.bf16.msra.mxu0 %v3433_v8  ;;  %2849 = vmatprep.mubr.msk.bf16.mxu0 %vm3314_vm0, %v3313_v9 }
  0xc3   : > { %2847 = vmatprep.subr.bf16.mxu0 %v3313_v9 }
  0xc6   : > { %2848 = vmatpush3.bf16.msra.mxu0 %v3447_v12 }
  0xc7   : > { %2861 = vmatprep.subr.bf16.mxu0 %v3313_v9 }
 0x194   : > { %v447_v48 = vpop.f32.mrb[0].mxu0 }
 0x195   : > { %v3529_v50 = vadd.f32 %v3526_v47, %v447_v48  ;;  %v2835_v51 = vpop.f32.mrb[1].mxu0 }
 0x196   : > { %v450_v52 = vpop.f32.mrb[2].mxu0 }
 0x197   : > { %v455_v53 = vmul.f32 %v454_v49, %v3529_v50  ;;  %v2836_v54 = vpop.f32.mrb[3].mxu0  ;;  %v603_v52 = vstv %s3520_s11  ;;  %s3828_s11 = ssub.f32 %s3824_s10, %s3726_s24 }
 0x199   : > { %v456_v55 = vadd.f32 %v455_v53, %v3417_v3  ;;  %s1383_s14 = smul.f32 0.5, %s3828_s11 }
 0x19a   : > { %s1610_s17 = smul.f32 0.16666667, %s3828_s11 }
 0x19b   : > { %469 = vperm.xlu0 %3099, %v456_v55   ;;  %459 = vperm.xlu1 %3098, %v456_v55  }
 0x19f   : > { %3100 = vset.pattern.permute.xlu1 %v3311_v4  ;;  %3102 = vset.pattern.permute.xlu0 %v3309_v1 }
 0x1a0   : > { %475 = vperm.xlu1 %3100, %v456_v55  }
 0x1a4   : > { %3101 = vset.pattern.permute.xlu1 %v3312_v5 }
 0x1a5   : > { %481 = vperm.xlu1 %3101, %v456_v55  }
 0x1a9   : > { %3103 = vset.pattern.permute.xlu1 %v3310_v2 }
 0x21a   : > { %v460_v60 = vpop.permute.xlu1 %459  ;;  %v470_v62 = vpop.permute.xlu0 %469 }
 0x21b   : > { %v462_v61 = vmul.f32 %v460_v60, %v3478_v22  ;;  %v472_v0 = vmul.f32 %v470_v62, %v3484_v25  ;;  %v615_v62 = vrot.slane %v3480_v23, %v3474_v20 }
 0x21d   : > { %v467_v63 = vadd.f32 %v466_v59, %v462_v61 }
 0x21f   : > { %v476_v6 = vpop.permute.xlu1 %475  ;;  %v473_v7 = vadd.f32 %v472_v0, %v467_v63 }
 0x220   : > { %v478_v10 = vmul.f32 %v476_v6, %v3496_v32 }
 0x222   : > { %v479_v13 = vadd.f32 %v478_v10, %v473_v7 }
 0x224   : > { %v482_v11 = vpop.permute.xlu1 %481 }
 0x225   : > { %v484_v15 = vmul.f32 %v482_v11, %v3499_v33 }
 0x227   : > { %v485_v17 = vadd.f32 %v484_v15, %v479_v13 }
 0x229   : > { %3209 = vtanh.f32 %v485_v17 }
 0x233   : > { %v3210_v18 = vpop.eup %3209 }
 0x234   : > { %v487_v19 = vpack.c.bf16 %v3210_v18, %v3210_v18 }
 0x236   : > { %2842 = vmatmul.mubr.msk.bf16.vlgmr.msra.gmra.mrb[0].mxu1 %vm409_vm1, %v487_v19 }
 0x237   : > { %2854 = vmatpush3.bf16.msra.mxu1 %v3433_v8  ;;  %2857 = vmatprep.mubr.msk.bf16.mxu1 %vm3314_vm0, %v3313_v9 }
 0x238   : > { %2855 = vmatprep.subr.bf16.mxu1 %v3313_v9 }
 0x23b   : > { %2856 = vmatpush3.bf16.msra.mxu1 %v3447_v12 }
 0x23c   : > { %2869 = vmatprep.subr.bf16.mxu1 %v3313_v9 }
 0x309   : > { %v525_v16 = vpop.f32.mrb[0].mxu1 }
 0x30a   : > { %v3554_v21 = vadd.f32 %v3526_v47, %v525_v16  ;;  %v2843_v24 = vpop.f32.mrb[1].mxu1 }
 0x30b   : > { %v528_v26 = vpop.f32.mrb[2].mxu1 }
 0x30c   : > { %v531_v27 = vmul.f32 %v3554_v21, %v454_v49  ;;  %v2844_v30 = vpop.f32.mrb[3].mxu1 }
 0x30e   : > { %v532_v31 = vadd.f32 %v531_v27, %v3417_v3 }
 0x310   : > { %541 = vperm.xlu1 %3103, %v532_v31   ;;  %535 = vperm.xlu0 %3102, %v532_v31  }
 0x314   : > { %3104 = vset.pattern.permute.xlu1 %v3311_v4  ;;  %3105 = vset.pattern.permute.xlu0 %v3312_v5 }
 0x315   : > { %547 = vperm.xlu1 %3104, %v532_v31   ;;  %553 = vperm.xlu0 %3105, %v532_v31  }
 0x319   : > { %3106 = vset.pattern.permute.xlu1 %v3309_v1  ;;  %3108 = vset.pattern.permute.xlu0 %v3311_v4 }
 0x38f   : > { %v542_v35 = vpop.permute.xlu1 %541  ;;  %v536_v36 = vpop.permute.xlu0 %535 }
 0x390   : > { %v538_v37 = vmul.f32 %v536_v36, %v3478_v22  ;;  %v544_v38 = vmul.f32 %v542_v35, %v3484_v25  ;;  %v685_v36 = vstv %s680_s20  ;;  %s3933_s20 = ssub.f32 %s3929_s18, %s3824_s10 }
 0x392   : > { %v539_v39 = vadd.f32 %v538_v37, %v466_v59  ;;  %s1693_s27 = smul.f32 0.5, %s3933_s20 }
 0x394   : > { %v545_v40 = vadd.f32 %v544_v38, %v539_v39  ;;  %v548_v41 = vpop.permute.xlu1 %547  ;;  %v554_v42 = vpop.permute.xlu0 %553 }
 0x395   : > { %v550_v43 = vmul.f32 %v548_v41, %v3496_v32  ;;  %v556_v45 = vmul.f32 %v554_v42, %v3499_v33 }
 0x397   : > { %v551_v44 = vadd.f32 %v550_v43, %v545_v40 }
 0x399   : > { %v557_v46 = vadd.f32 %v556_v45, %v551_v44 }
 0x39b   : > { %3211 = vtanh.f32 %v557_v46 }
 0x3a5   : > { %v3212_v48 = vpop.eup %3211 }
 0x3a6   : > { %v559_v49 = vpack.c.bf16 %v3212_v48, %v3212_v48 }
 0x3a8   : > { %2850 = vmatmul.mubr.msk.bf16.vlgmr.msra.gmra.mrb[4].mxu0 %vm409_vm1, %v559_v49 }
 0x3a9   : > { %2862 = vmatpush3.bf16.msra.mxu0 %v3433_v8  ;;  %2865 = vmatprep.mubr.msk.bf16.mxu0 %vm3314_vm0, %v3313_v9 }
 0x3aa   : > { %2863 = vmatprep.subr.bf16.mxu0 %v3313_v9 }
 0x3ad   : > { %2864 = vmatpush3.bf16.msra.mxu0 %v3447_v12 }
 0x3ae   : > { %2877 = vmatprep.subr.bf16.mxu0 %v3313_v9 }
 0x47b   : > { %v597_v51 = vpop.f32.mrb[4].mxu0 }
 0x47c   : > { %v598_v53 = vadd.f32 %v3526_v47, %v597_v51  ;;  %v2851_v54 = vpop.f32.mrb[5].mxu0 }
 0x47d   : > { %v600_v55 = vpop.f32.mrb[6].mxu0 }
 0x47e   : > { %v604_v56 = vmul.f32 %v603_v52, %v598_v53  ;;  %v2852_v57 = vpop.f32.mrb[7].mxu0  ;;  %v681_v24 = vadd.f32 %v598_v53, %v3554_v21 }
 0x480   : > { %v605_v59 = vadd.f32 %v604_v56, %v3417_v3  ;;  %v682_v26 = vmul.f32 2.0, %v681_v24  ;;  %v764_v56 = vstv %s763_s22  ;;  %s4030_s22 = sld [smem:[#allocation2 + $0x6]] }
 0x482   : > { %624 = vperm.xlu0 %3108, %v605_v59   ;;  %608 = vperm.xlu1 %3106, %v605_v59   ;;  %v683_v31 = vadd.f32 %v682_v26, %v3529_v50 }
 0x486   : > { %3107 = vset.pattern.permute.xlu1 %v3310_v2  ;;  %3111 = vset.pattern.permute.xlu0 %v3310_v2 }
 0x487   : > { %618 = vperm.xlu1 %3107, %v605_v59  }
 0x48b   : > { %3109 = vset.pattern.permute.xlu1 %v3312_v5 }
 0x48c   : > { %630 = vperm.xlu1 %3109, %v605_v59  }
 0x490   : > { %3110 = vset.pattern.permute.xlu1 %v3309_v1 }
 0x501   : > { %v609_v60 = vpop.permute.xlu1 %608  ;;  %v625_v63 = vpop.permute.xlu0 %624 }
 0x502   : > { %v611_v61 = vmul.f32 %v609_v60, %v3478_v22  ;;  %v627_v10 = vmul.f32 %v625_v63, %v3496_v32 }
 0x504   : > { %v616_v6 = vadd.f32 %v615_v62, %v611_v61 }
 0x506   : > { %v619_v0 = vpop.permute.xlu1 %618 }
 0x507   : > { %v621_v7 = vmul.f32 %v619_v0, %v3484_v25 }
 0x509   : > { %v622_v11 = vadd.f32 %v621_v7, %v616_v6  ;;  %v776_v7 = vrot.slane %v3538_v58, %v3474_v20 }
 0x50b   : > { %v628_v13 = vadd.f32 %v627_v10, %v622_v11  ;;  %v631_v15 = vpop.permute.xlu1 %630 }
 0x50c   : > { %v633_v17 = vmul.f32 %v631_v15, %v3499_v33 }
 0x50e   : > { %v634_v18 = vadd.f32 %v633_v17, %v628_v13 }
 0x510   : > { %3213 = vtanh.f32 %v634_v18 }
 0x51a   : > { %v3214_v19 = vpop.eup %3213 }
 0x51b   : > { %v636_v16 = vpack.c.bf16 %v3214_v19, %v3214_v19 }
 0x51d   : > { %2858 = vmatmul.mubr.msk.bf16.vlgmr.msra.gmra.mrb[4].mxu1 %vm409_vm1, %v636_v16 }
 0x51e   : > { %2870 = vmatpush3.bf16.msra.mxu1 %v3433_v8  ;;  %2873 = vmatprep.mubr.msk.bf16.mxu1 %vm3314_vm0, %v3313_v9 }
 0x51f   : > { %2871 = vmatprep.subr.bf16.mxu1 %v3313_v9 }
 0x522   : > { %2872 = vmatpush3.bf16.msra.mxu1 %v3447_v12 }
 0x523   : > { %2885 = vmatprep.subr.bf16.mxu1 %v3313_v9 }
 0x5f0   : > { %v674_v27 = vpop.f32.mrb[4].mxu1 }
 0x5f1   : > { %v675_v30 = vadd.f32 %v3526_v47, %v674_v27  ;;  %v2859_v35 = vpop.f32.mrb[5].mxu1 }
 0x5f2   : > { %v677_v37 = vpop.f32.mrb[6].mxu1 }
 0x5f3   : > { %v684_v38 = vadd.f32 %v683_v31, %v675_v30  ;;  %v2860_v39 = vpop.f32.mrb[7].mxu1 }
 0x5f5   : > { %v686_v40 = vmul.f32 %v685_v36, %v684_v38 }
 0x5f7   : > { %v3604_v41 = vadd.f32 %v686_v40, %v3417_v3 }
 0x5f9   : > { %701 = vperm.xlu0 %3111, %v3604_v41   ;;  %695 = vperm.xlu1 %3110, %v3604_v41   ;;  %2698 = vst.msk [vmem:[%s3594_s19 + $0x8] sm:$0xff] %vm351_vm2, %v3604_v41 }
 0x5fd   : > { %3112 = vset.pattern.permute.xlu1 %v3311_v4  ;;  %3114 = vset.pattern.permute.xlu0 %v3309_v1 }
 0x5fe   : > { %707 = vperm.xlu1 %3112, %v3604_v41  }
 0x602   : > { %3113 = vset.pattern.permute.xlu1 %v3312_v5 }
 0x603   : > { %713 = vperm.xlu1 %3113, %v3604_v41  }
 0x607   : > { %3115 = vset.pattern.permute.xlu1 %v3310_v2 }
 0x678   : > { %v696_v3 = vpop.permute.xlu1 %695  ;;  %v702_v21 = vpop.permute.xlu0 %701 }
 0x679   : > { %v698_v50 = vmul.f32 %v696_v3, %v3478_v22  ;;  %v704_v43 = vmul.f32 %v702_v21, %v3484_v25 }
 0x67b   : > { %v699_v42 = vadd.f32 %v698_v50, %v615_v62 }
 0x67d   : > { %v708_v44 = vpop.permute.xlu1 %707  ;;  %v705_v45 = vadd.f32 %v704_v43, %v699_v42 }
 0x67e   : > { %v710_v46 = vmul.f32 %v708_v44, %v3496_v32 }
 0x680   : > { %v711_v49 = vadd.f32 %v710_v46, %v705_v45 }
 0x682   : > { %v714_v48 = vpop.permute.xlu1 %713 }
 0x683   : > { %v716_v51 = vmul.f32 %v714_v48, %v3499_v33 }
 0x685   : > { %v717_v52 = vadd.f32 %v716_v51, %v711_v49 }
 0x687   : > { %3215 = vtanh.f32 %v717_v52 }
 0x691   : > { %v3216_v53 = vpop.eup %3215 }
 0x692   : > { %v719_v54 = vpack.c.bf16 %v3216_v53, %v3216_v53 }
 0x694   : > { %2866 = vmatmul.mubr.msk.bf16.vlgmr.msra.gmra.mrb[8].mxu0 %vm409_vm1, %v719_v54 }
 0x695   : > { %2878 = vmatpush3.bf16.msra.mxu0 %v3433_v8  ;;  %2881 = vmatprep.mubr.msk.bf16.mxu0 %vm3314_vm0, %v3313_v9 }
 0x696   : > { %2879 = vmatprep.subr.bf16.mxu0 %v3313_v9 }
 0x699   : > { %2880 = vmatpush3.bf16.msra.mxu0 %v3447_v12 }
 0x69a   : > { %2893 = vmatprep.subr.bf16.mxu0 %v3313_v9 }
 0x767   : > { %v757_v55 = vpop.f32.mrb[8].mxu0 }
 0x768   : > { %v3636_v57 = vadd.f32 %v3526_v47, %v757_v55  ;;  %v2867_v59 = vpop.f32.mrb[9].mxu0  ;;  %v913_v55 = vstv %s3632_s21  ;;  %s1920_s21 = smul.f32 0.16666667, %s3933_s20 }
 0x769   : > { %v760_v60 = vpop.f32.mrb[10].mxu0 }
 0x76a   : > { %v765_v61 = vmul.f32 %v764_v56, %v3636_v57  ;;  %v2868_v62 = vpop.f32.mrb[11].mxu0 }
 0x76c   : > { %v766_v63 = vadd.f32 %v765_v61, %v3604_v41 }
 0x76e   : > { %779 = vperm.xlu1 %3115, %v766_v63   ;;  %769 = vperm.xlu0 %3114, %v766_v63  }
 0x772   : > { %3116 = vset.pattern.permute.xlu1 %v3311_v4  ;;  %3117 = vset.pattern.permute.xlu0 %v3312_v5 }
 0x773   : > { %785 = vperm.xlu1 %3116, %v766_v63   ;;  %791 = vperm.xlu0 %3117, %v766_v63  }
 0x777   : > { %3118 = vset.pattern.permute.xlu1 %v3309_v1  ;;  %3120 = vset.pattern.permute.xlu0 %v3311_v4 }
 0x7ed   : > { %v780_v0 = vpop.permute.xlu1 %779  ;;  %v770_v6 = vpop.permute.xlu0 %769 }
 0x7ee   : > { %v772_v10 = vmul.f32 %v770_v6, %v3478_v22  ;;  %v782_v11 = vmul.f32 %v780_v0, %v3484_v25  ;;  %v925_v6 = vrot.slane %v3480_v23, %v3489_v28 }
 0x7f0   : > { %v777_v13 = vadd.f32 %v776_v7, %v772_v10 }
 0x7f2   : > { %v783_v15 = vadd.f32 %v782_v11, %v777_v13  ;;  %v786_v17 = vpop.permute.xlu1 %785  ;;  %v792_v18 = vpop.permute.xlu0 %791 }
 0x7f3   : > { %v788_v19 = vmul.f32 %v786_v17, %v3496_v32  ;;  %v794_v24 = vmul.f32 %v792_v18, %v3499_v33 }
 0x7f5   : > { %v789_v16 = vadd.f32 %v788_v19, %v783_v15 }
 0x7f7   : > { %v795_v26 = vadd.f32 %v794_v24, %v789_v16 }
 0x7f9   : > { %3217 = vtanh.f32 %v795_v26 }
 0x803   : > { %v3218_v27 = vpop.eup %3217 }
 0x804   : > { %v797_v30 = vpack.c.bf16 %v3218_v27, %v3218_v27 }
 0x806   : > { %2874 = vmatmul.mubr.msk.bf16.vlgmr.msra.gmra.mrb[8].mxu1 %vm409_vm1, %v797_v30 }
 0x807   : > { %2886 = vmatpush3.bf16.msra.mxu1 %v3433_v8  ;;  %2889 = vmatprep.mubr.msk.bf16.mxu1 %vm3314_vm0, %v3313_v9 }
 0x808   : > { %2887 = vmatprep.subr.bf16.mxu1 %v3313_v9 }
 0x80b   : > { %2888 = vmatpush3.bf16.msra.mxu1 %v3447_v12 }
 0x80c   : > { %2901 = vmatprep.subr.bf16.mxu1 %v3313_v9 }
 0x8d9   : > { %v835_v20 = vpop.f32.mrb[8].mxu1 }
 0x8da   : > { %v3658_v31 = vadd.f32 %v3526_v47, %v835_v20  ;;  %v2875_v35 = vpop.f32.mrb[9].mxu1 }
 0x8db   : > { %v838_v36 = vpop.f32.mrb[10].mxu1 }
 0x8dc   : > { %v841_v37 = vmul.f32 %v3658_v31, %v764_v56  ;;  %v2876_v38 = vpop.f32.mrb[11].mxu1 }
 0x8de   : > { %v842_v39 = vadd.f32 %v841_v37, %v3604_v41 }
 0x8e0   : > { %857 = vperm.xlu0 %3120, %v842_v39   ;;  %845 = vperm.xlu1 %3118, %v842_v39  }
 0x8e4   : > { %3119 = vset.pattern.permute.xlu1 %v3310_v2  ;;  %3123 = vset.pattern.permute.xlu0 %v3310_v2 }
 0x8e5   : > { %851 = vperm.xlu1 %3119, %v842_v39  }
 0x8e9   : > { %3121 = vset.pattern.permute.xlu1 %v3312_v5 }
 0x8ea   : > { %863 = vperm.xlu1 %3121, %v842_v39  }
 0x8ee   : > { %3122 = vset.pattern.permute.xlu1 %v3309_v1 }
 0x95f   : > { %v846_v40 = vpop.permute.xlu1 %845  ;;  %v858_v50 = vpop.permute.xlu0 %857 }
 0x960   : > { %v848_v3 = vmul.f32 %v846_v40, %v3478_v22  ;;  %v860_v44 = vmul.f32 %v858_v50, %v3496_v32  ;;  %v995_v40 = vstv %s990_s23  ;;  %s4034_s23 = ssub.f32 %s4030_s22, %s3929_s18 }
 0x962   : > { %v849_v42 = vadd.f32 %v848_v3, %v776_v7  ;;  %s2003_s24 = smul.f32 0.5, %s4034_s23 }
 0x964   : > { %v852_v21 = vpop.permute.xlu1 %851 }
 0x965   : > { %v854_v43 = vmul.f32 %v852_v21, %v3484_v25 }
 0x967   : > { %v855_v45 = vadd.f32 %v854_v43, %v849_v42 }
 0x969   : > { %v861_v46 = vadd.f32 %v860_v44, %v855_v45  ;;  %v864_v48 = vpop.permute.xlu1 %863 }
 0x96a   : > { %v866_v49 = vmul.f32 %v864_v48, %v3499_v33 }
 0x96c   : > { %v867_v51 = vadd.f32 %v866_v49, %v861_v46 }
 0x96e   : > { %3219 = vtanh.f32 %v867_v51 }
 0x978   : > { %v3220_v52 = vpop.eup %3219 }
 0x979   : > { %v869_v53 = vpack.c.bf16 %v3220_v52, %v3220_v52 }
 0x97b   : > { %2882 = vmatmul.mubr.msk.bf16.vlgmr.msra.gmra.mrb[12].mxu0 %vm409_vm1, %v869_v53 }
 0x97c   : > { %2894 = vmatpush3.bf16.msra.mxu0 %v3433_v8  ;;  %2897 = vmatprep.mubr.msk.bf16.mxu0 %vm3314_vm0, %v3313_v9 }
 0x97d   : > { %2895 = vmatprep.subr.bf16.mxu0 %v3313_v9 }
 0x980   : > { %2896 = vmatpush3.bf16.msra.mxu0 %v3447_v12 }
 0x981   : > { %2909 = vmatprep.subr.bf16.mxu0 %v3313_v9 }
 0xa4e   : > { %v907_v54 = vpop.f32.mrb[12].mxu0 }
 0xa4f   : > { %v908_v56 = vadd.f32 %v3526_v47, %v907_v54  ;;  %v2883_v59 = vpop.f32.mrb[13].mxu0 }
 0xa50   : > { %v910_v60 = vpop.f32.mrb[14].mxu0 }
 0xa51   : > { %v914_v61 = vmul.f32 %v913_v55, %v908_v56  ;;  %v2884_v62 = vpop.f32.mrb[15].mxu0  ;;  %v991_v20 = vadd.f32 %v908_v56, %v3658_v31  ;;  %v1074_v60 = vstv %s1073_s26  ;;  %s2734_s26 = sld [smem:[#allocation2 + $0x7]] }
 0xa53   : > { %v915_v63 = vadd.f32 %v914_v61, %v3604_v41  ;;  %v992_v35 = vmul.f32 2.0, %v991_v20 }
 0xa55   : > { %928 = vperm.xlu0 %3123, %v915_v63   ;;  %918 = vperm.xlu1 %3122, %v915_v63   ;;  %v993_v38 = vadd.f32 %v992_v35, %v3636_v57 }
 0xa59   : > { %3124 = vset.pattern.permute.xlu1 %v3311_v4  ;;  %3126 = vset.pattern.permute.xlu0 %v3309_v1 }
 0xa5a   : > { %934 = vperm.xlu1 %3124, %v915_v63  }
 0xa5e   : > { %3125 = vset.pattern.permute.xlu1 %v3312_v5 }
 0xa5f   : > { %940 = vperm.xlu1 %3125, %v915_v63  }
 0xa63   : > { %3127 = vset.pattern.permute.xlu1 %v3310_v2 }
 0xad4   : > { %v919_v0 = vpop.permute.xlu1 %918  ;;  %v929_v10 = vpop.permute.xlu0 %928 }
 0xad5   : > { %v921_v7 = vmul.f32 %v919_v0, %v3478_v22  ;;  %v931_v13 = vmul.f32 %v929_v10, %v3484_v25 }
 0xad7   : > { %v926_v11 = vadd.f32 %v925_v6, %v921_v7 }
 0xad9   : > { %v935_v15 = vpop.permute.xlu1 %934  ;;  %v932_v17 = vadd.f32 %v931_v13, %v926_v11  ;;  %v1086_v13 = vrot.slane %v3538_v58, %v3489_v28 }
 0xada   : > { %v937_v18 = vmul.f32 %v935_v15, %v3496_v32 }
 0xadc   : > { %v938_v16 = vadd.f32 %v937_v18, %v932_v17 }
 0xade   : > { %v941_v19 = vpop.permute.xlu1 %940 }
 0xadf   : > { %v943_v24 = vmul.f32 %v941_v19, %v3499_v33 }
 0xae1   : > { %v944_v26 = vadd.f32 %v943_v24, %v938_v16 }
 0xae3   : > { %3221 = vtanh.f32 %v944_v26 }
 0xaed   : > { %v3222_v27 = vpop.eup %3221 }
 0xaee   : > { %v946_v30 = vpack.c.bf16 %v3222_v27, %v3222_v27 }
 0xaf0   : > { %2890 = vmatmul.mubr.msk.bf16.vlgmr.msra.gmra.mrb[12].mxu1 %vm409_vm1, %v946_v30 }
 0xaf1   : > { %2902 = vmatpush3.bf16.msra.mxu1 %v3433_v8  ;;  %2905 = vmatprep.mubr.msk.bf16.mxu1 %vm3314_vm0, %v3313_v9 }
 0xaf2   : > { %2903 = vmatprep.subr.bf16.mxu1 %v3313_v9 }
 0xaf5   : > { %2904 = vmatpush3.bf16.msra.mxu1 %v3447_v12 }
 0xaf6   : > { %2917 = vmatprep.subr.bf16.mxu1 %v3313_v9 }
 0xbc3   : > { %v984_v36 = vpop.f32.mrb[12].mxu1 }
 0xbc4   : > { %v985_v37 = vadd.f32 %v3526_v47, %v984_v36  ;;  %v2891_v39 = vpop.f32.mrb[13].mxu1 }
 0xbc5   : > { %v987_v3 = vpop.f32.mrb[14].mxu1 }
 0xbc6   : > { %v994_v50 = vadd.f32 %v993_v38, %v985_v37  ;;  %v2892_v21 = vpop.f32.mrb[15].mxu1 }
 0xbc8   : > { %v996_v42 = vmul.f32 %v995_v40, %v994_v50 }
 0xbca   : > { %v3702_v43 = vadd.f32 %v996_v42, %v3604_v41 }
 0xbcc   : > { %1011 = vperm.xlu1 %3127, %v3702_v43   ;;  %1005 = vperm.xlu0 %3126, %v3702_v43   ;;  %2705 = vst.msk [vmem:[%s3594_s19 + $0x10] sm:$0xff] %vm351_vm2, %v3702_v43 }
 0xbd0   : > { %3128 = vset.pattern.permute.xlu1 %v3311_v4  ;;  %3129 = vset.pattern.permute.xlu0 %v3312_v5 }
 0xbd1   : > { %1017 = vperm.xlu1 %3128, %v3702_v43   ;;  %1023 = vperm.xlu0 %3129, %v3702_v43  }
 0xbd5   : > { %3130 = vset.pattern.permute.xlu1 %v3309_v1  ;;  %3132 = vset.pattern.permute.xlu0 %v3311_v4 }
 0xc4b   : > { %v1012_v41 = vpop.permute.xlu1 %1011  ;;  %v1006_v57 = vpop.permute.xlu0 %1005 }
 0xc4c   : > { %v1008_v31 = vmul.f32 %v1006_v57, %v3478_v22  ;;  %v1014_v44 = vmul.f32 %v1012_v41, %v3484_v25 }
 0xc4e   : > { %v1009_v45 = vadd.f32 %v1008_v31, %v925_v6 }
 0xc50   : > { %v1015_v46 = vadd.f32 %v1014_v44, %v1009_v45  ;;  %v1018_v48 = vpop.permute.xlu1 %1017  ;;  %v1024_v49 = vpop.permute.xlu0 %1023 }
 0xc51   : > { %v1020_v51 = vmul.f32 %v1018_v48, %v3496_v32  ;;  %v1026_v53 = vmul.f32 %v1024_v49, %v3499_v33 }
 0xc53   : > { %v1021_v52 = vadd.f32 %v1020_v51, %v1015_v46 }
 0xc55   : > { %v1027_v54 = vadd.f32 %v1026_v53, %v1021_v52 }
 0xc57   : > { %3223 = vtanh.f32 %v1027_v54 }
 0xc61   : > { %v3224_v55 = vpop.eup %3223 }
 0xc62   : > { %v1029_v56 = vpack.c.bf16 %v3224_v55, %v3224_v55 }
 0xc64   : > { %2898 = vmatmul.mubr.msk.bf16.vlgmr.msra.gmra.mrb[16].mxu0 %vm409_vm1, %v1029_v56  ;;  %v1223_v56 = vstv %s3730_s25  ;;  %s2230_s25 = smul.f32 0.16666667, %s4034_s23 }
 0xc65   : > { %2910 = vmatpush3.bf16.msra.mxu0 %v3433_v8  ;;  %2913 = vmatprep.mubr.msk.bf16.mxu0 %vm3314_vm0, %v3313_v9 }
 0xc66   : > { %2911 = vmatprep.subr.bf16.mxu0 %v3313_v9 }
 0xc69   : > { %2912 = vmatpush3.bf16.msra.mxu0 %v3447_v12 }
 0xc6a   : > { %2925 = vmatprep.subr.bf16.mxu0 %v3313_v9 }
 0xd37   : > { %v1067_v59 = vpop.f32.mrb[16].mxu0 }
 0xd38   : > { %v3734_v61 = vadd.f32 %v3526_v47, %v1067_v59  ;;  %v2899_v62 = vpop.f32.mrb[17].mxu0 }
 0xd39   : > { %v1070_v63 = vpop.f32.mrb[18].mxu0 }
 0xd3a   : > { %v1075_v0 = vmul.f32 %v1074_v60, %v3734_v61  ;;  %v2900_v6 = vpop.f32.mrb[19].mxu0 }
 0xd3c   : > { %v1076_v7 = vadd.f32 %v1075_v0, %v3702_v43 }
 0xd3e   : > { %1095 = vperm.xlu0 %3132, %v1076_v7   ;;  %1079 = vperm.xlu1 %3130, %v1076_v7  }
 0xd42   : > { %3131 = vset.pattern.permute.xlu1 %v3310_v2  ;;  %3135 = vset.pattern.permute.xlu0 %v3310_v2 }
 0xd43   : > { %1089 = vperm.xlu1 %3131, %v1076_v7  }
 0xd47   : > { %3133 = vset.pattern.permute.xlu1 %v3312_v5 }
 0xd48   : > { %1101 = vperm.xlu1 %3133, %v1076_v7  }
 0xd4c   : > { %3134 = vset.pattern.permute.xlu1 %v3309_v1 }
 0xdbd   : > { %v1080_v10 = vpop.permute.xlu1 %1079  ;;  %v1096_v15 = vpop.permute.xlu0 %1095 }
 0xdbe   : > { %v1082_v11 = vmul.f32 %v1080_v10, %v3478_v22  ;;  %v1098_v16 = vmul.f32 %v1096_v15, %v3496_v32 }
 0xdc0   : > { %v1087_v18 = vadd.f32 %v1086_v13, %v1082_v11  ;;  %v1235_v11 = vrot.slane %v3480_v23, %v3492_v29 }
 0xdc2   : > { %v1090_v17 = vpop.permute.xlu1 %1089 }
 0xdc3   : > { %v1092_v19 = vmul.f32 %v1090_v17, %v3484_v25 }
 0xdc5   : > { %v1093_v24 = vadd.f32 %v1092_v19, %v1087_v18 }
 0xdc7   : > { %v1099_v26 = vadd.f32 %v1098_v16, %v1093_v24  ;;  %v1102_v27 = vpop.permute.xlu1 %1101 }
 0xdc8   : > { %v1104_v30 = vmul.f32 %v1102_v27, %v3499_v33 }
 0xdca   : > { %v1105_v20 = vadd.f32 %v1104_v30, %v1099_v26 }
 0xdcc   : > { %3225 = vtanh.f32 %v1105_v20 }
 0xdd6   : > { %v3226_v35 = vpop.eup %3225 }
 0xdd7   : > { %v1107_v36 = vpack.c.bf16 %v3226_v35, %v3226_v35 }
 0xdd9   : > { %2906 = vmatmul.mubr.msk.bf16.vlgmr.msra.gmra.mrb[16].mxu1 %vm409_vm1, %v1107_v36 }
 0xdda   : > { %2918 = vmatpush3.bf16.msra.mxu1 %v3433_v8  ;;  %2921 = vmatprep.mubr.msk.bf16.mxu1 %vm3314_vm0, %v3313_v9 }
 0xddb   : > { %2919 = vmatprep.subr.bf16.mxu1 %v3313_v9 }
 0xdde   : > { %2920 = vmatpush3.bf16.msra.mxu1 %v3447_v12 }
 0xddf   : > { %2933 = vmatprep.subr.bf16.mxu1 %v3313_v9 }
 0xeac   : > { %v1145_v28 = vpop.f32.mrb[16].mxu1 }
 0xead   : > { %v3756_v37 = vadd.f32 %v3526_v47, %v1145_v28  ;;  %v2907_v38 = vpop.f32.mrb[17].mxu1 }
 0xeae   : > { %v1148_v39 = vpop.f32.mrb[18].mxu1 }
 0xeaf   : > { %v1151_v40 = vmul.f32 %v3756_v37, %v1074_v60  ;;  %v2908_v3 = vpop.f32.mrb[19].mxu1 }
 0xeb1   : > { %v1152_v50 = vadd.f32 %v1151_v40, %v3702_v43 }
 0xeb3   : > { %1161 = vperm.xlu0 %3135, %v1152_v50   ;;  %1155 = vperm.xlu1 %3134, %v1152_v50  }
 0xeb7   : > { %3136 = vset.pattern.permute.xlu1 %v3311_v4  ;;  %3138 = vset.pattern.permute.xlu0 %v3309_v1 }
 0xeb8   : > { %1167 = vperm.xlu1 %3136, %v1152_v50  }
 0xebc   : > { %3137 = vset.pattern.permute.xlu1 %v3312_v5 }
 0xebd   : > { %1173 = vperm.xlu1 %3137, %v1152_v50   ;;  %v1305_v50 = vstv %s1300_s29  ;;  %s4131_s29 = ssub.f32 %s2734_s26, %s4030_s22 }
 0xebf   : > { %s2313_s10 = smul.f32 0.5, %s4131_s29 }
 0xec1   : > { %3139 = vset.pattern.permute.xlu1 %v3310_v2 }
 0xf32   : > { %v1156_v21 = vpop.permute.xlu1 %1155  ;;  %v1162_v41 = vpop.permute.xlu0 %1161 }
 0xf33   : > { %v1158_v42 = vmul.f32 %v1156_v21, %v3478_v22  ;;  %v1164_v31 = vmul.f32 %v1162_v41, %v3484_v25 }
 0xf35   : > { %v1159_v57 = vadd.f32 %v1158_v42, %v1086_v13 }
 0xf37   : > { %v1168_v44 = vpop.permute.xlu1 %1167  ;;  %v1165_v45 = vadd.f32 %v1164_v31, %v1159_v57 }
 0xf38   : > { %v1170_v46 = vmul.f32 %v1168_v44, %v3496_v32 }
 0xf3a   : > { %v1171_v49 = vadd.f32 %v1170_v46, %v1165_v45 }
 0xf3c   : > { %v1174_v48 = vpop.permute.xlu1 %1173 }
 0xf3d   : > { %v1176_v51 = vmul.f32 %v1174_v48, %v3499_v33 }
 0xf3f   : > { %v1177_v52 = vadd.f32 %v1176_v51, %v1171_v49 }
 0xf41   : > { %3227 = vtanh.f32 %v1177_v52 }
 0xf4b   : > { %v3228_v53 = vpop.eup %3227 }
 0xf4c   : > { %v1179_v54 = vpack.c.bf16 %v3228_v53, %v3228_v53 }
 0xf4e   : > { %2914 = vmatmul.mubr.msk.bf16.vlgmr.msra.gmra.mrb[20].mxu0 %vm409_vm1, %v1179_v54 }
 0xf4f   : > { %2926 = vmatpush3.bf16.msra.mxu0 %v3433_v8  ;;  %2929 = vmatprep.mubr.msk.bf16.mxu0 %vm3314_vm0, %v3313_v9 }
 0xf50   : > { %2927 = vmatprep.subr.bf16.mxu0 %v3313_v9 }
 0xf53   : > { %2928 = vmatpush3.bf16.msra.mxu0 %v3447_v12 }
 0xf54   : > { %2941 = vmatprep.subr.bf16.mxu0 %v3313_v9 }
0x1021   : > { %v1217_v55 = vpop.f32.mrb[20].mxu0 }
0x1022   : > { %v1218_v59 = vadd.f32 %v3526_v47, %v1217_v55  ;;  %v2915_v60 = vpop.f32.mrb[21].mxu0 }
0x1023   : > { %v1220_v62 = vpop.f32.mrb[22].mxu0  ;;  %v1384_v60 = vstv %s1383_s14 }
0x1024   : > { %v1224_v63 = vmul.f32 %v1223_v56, %v1218_v59  ;;  %v2916_v0 = vpop.f32.mrb[23].mxu0  ;;  %v1301_v36 = vadd.f32 %v1218_v59, %v3756_v37 }
0x1026   : > { %v1225_v6 = vadd.f32 %v1224_v63, %v3702_v43  ;;  %v1302_v28 = vmul.f32 2.0, %v1301_v36 }
0x1028   : > { %1238 = vperm.xlu1 %3139, %v1225_v6   ;;  %1228 = vperm.xlu0 %3138, %v1225_v6   ;;  %v1303_v40 = vadd.f32 %v1302_v28, %v3734_v61  ;;  %v3856_v28 = vld [vmem:[%s4218_s7] ss:$0 sm:$0xff] }
0x102c   : > { %3140 = vset.pattern.permute.xlu1 %v3311_v4  ;;  %3141 = vset.pattern.permute.xlu0 %v3312_v5 }
0x102d   : > { %1244 = vperm.xlu1 %3140, %v1225_v6   ;;  %1250 = vperm.xlu0 %3141, %v1225_v6  }
0x1031   : > { %3142 = vset.pattern.permute.xlu1 %v3309_v1  ;;  %3144 = vset.pattern.permute.xlu0 %v3311_v4 }
0x10a7   : > { %v1239_v7 = vpop.permute.xlu1 %1238  ;;  %v1229_v10 = vpop.permute.xlu0 %1228 }
0x10a8   : > { %v1231_v13 = vmul.f32 %v1229_v10, %v3478_v22  ;;  %v1241_v15 = vmul.f32 %v1239_v7, %v3484_v25 }
0x10aa   : > { %v1236_v17 = vadd.f32 %v1235_v11, %v1231_v13 }
0x10ac   : > { %v1245_v18 = vpop.permute.xlu1 %1244  ;;  %v1242_v19 = vadd.f32 %v1241_v15, %v1236_v17  ;;  %v1251_v16 = vpop.permute.xlu0 %1250 }
0x10ad   : > { %v1247_v24 = vmul.f32 %v1245_v18, %v3496_v32  ;;  %v1253_v27 = vmul.f32 %v1251_v16, %v3499_v33 }
0x10af   : > { %v1248_v26 = vadd.f32 %v1247_v24, %v1242_v19 }
0x10b1   : > { %v1254_v30 = vadd.f32 %v1253_v27, %v1248_v26 }
0x10b3   : > { %3229 = vtanh.f32 %v1254_v30 }
0x10bd   : > { %v3230_v20 = vpop.eup %3229 }
0x10be   : > { %v1256_v35 = vpack.c.bf16 %v3230_v20, %v3230_v20 }
0x10c0   : > { %2922 = vmatmul.mubr.msk.bf16.vlgmr.msra.gmra.mrb[20].mxu1 %vm409_vm1, %v1256_v35 }
0x10c1   : > { %2934 = vmatpush3.bf16.msra.mxu1 %v3433_v8  ;;  %2937 = vmatprep.mubr.msk.bf16.mxu1 %vm3314_vm0, %v3313_v9 }
0x10c2   : > { %2935 = vmatprep.subr.bf16.mxu1 %v3313_v9 }
0x10c5   : > { %2936 = vmatpush3.bf16.msra.mxu1 %v3447_v12 }
0x10c6   : > { %2949 = vmatprep.subr.bf16.mxu1 %v3313_v9 }
0x1193   : > { %v1294_v38 = vpop.f32.mrb[20].mxu1 }
0x1194   : > { %v1295_v39 = vadd.f32 %v3526_v47, %v1294_v38  ;;  %v2923_v3 = vpop.f32.mrb[21].mxu1 }
0x1195   : > { %v1297_v21 = vpop.f32.mrb[22].mxu1 }
0x1196   : > { %v1304_v42 = vadd.f32 %v1303_v40, %v1295_v39  ;;  %v2924_v41 = vpop.f32.mrb[23].mxu1 }
0x1198   : > { %v1306_v57 = vmul.f32 %v1305_v50, %v1304_v42 }
0x119a   : > { %v3800_v31 = vadd.f32 %v1306_v57, %v3702_v43 }
0x119c   : > { %1327 = vperm.xlu0 %3144, %v3800_v31   ;;  %1315 = vperm.xlu1 %3142, %v3800_v31   ;;  %2712 = vst.msk [vmem:[%s3594_s19 + $0x18] sm:$0xff] %vm351_vm2, %v3800_v31 }
0x11a0   : > { %3143 = vset.pattern.permute.xlu1 %v3310_v2  ;;  %3147 = vset.pattern.permute.xlu0 %v3310_v2 }
0x11a1   : > { %1321 = vperm.xlu1 %3143, %v3800_v31  }
0x11a5   : > { %3145 = vset.pattern.permute.xlu1 %v3312_v5 }
0x11a6   : > { %1333 = vperm.xlu1 %3145, %v3800_v31  }
0x11aa   : > { %3146 = vset.pattern.permute.xlu1 %v3309_v1 }
0x121b   : > { %v1316_v43 = vpop.permute.xlu1 %1315  ;;  %v1328_v37 = vpop.permute.xlu0 %1327 }
0x121c   : > { %v1318_v61 = vmul.f32 %v1316_v43, %v3478_v22  ;;  %v1330_v48 = vmul.f32 %v1328_v37, %v3496_v32 }
0x121e   : > { %v1319_v45 = vadd.f32 %v1318_v61, %v1235_v11  ;;  %v1396_v11 = vrot.slane %v3538_v58, %v3492_v29 }
0x1220   : > { %v1322_v44 = vpop.permute.xlu1 %1321 }
0x1221   : > { %v1324_v46 = vmul.f32 %v1322_v44, %v3484_v25 }
0x1223   : > { %v1325_v49 = vadd.f32 %v1324_v46, %v1319_v45 }
0x1225   : > { %v1331_v51 = vadd.f32 %v1330_v48, %v1325_v49  ;;  %v1334_v52 = vpop.permute.xlu1 %1333 }
0x1226   : > { %v1336_v53 = vmul.f32 %v1334_v52, %v3499_v33 }
0x1228   : > { %v1337_v54 = vadd.f32 %v1336_v53, %v1331_v51 }
0x122a   : > { %3231 = vtanh.f32 %v1337_v54 }
0x1234   : > { %v3232_v55 = vpop.eup %3231 }
0x1235   : > { %v1339_v56 = vpack.c.bf16 %v3232_v55, %v3232_v55  ;;  %v1533_v55 = vstv %s3828_s11  ;;  %s2540_s11 = smul.f32 0.16666667, %s4131_s29 }
0x1237   : > { %2930 = vmatmul.mubr.msk.bf16.vlgmr.msra.gmra.mrb[24].mxu0 %vm409_vm1, %v1339_v56 }
0x1238   : > { %2942 = vmatpush3.bf16.msra.mxu0 %v3433_v8  ;;  %2945 = vmatprep.mubr.msk.bf16.mxu0 %vm3314_vm0, %v3313_v9 }
0x1239   : > { %2943 = vmatprep.subr.bf16.mxu0 %v3313_v9 }
0x123c   : > { %2944 = vmatpush3.bf16.msra.mxu0 %v3447_v12 }
0x123d   : > { %2957 = vmatprep.subr.bf16.mxu0 %v3313_v9 }
0x130a   : > { %v1377_v59 = vpop.f32.mrb[24].mxu0 }
0x130b   : > { %v3832_v62 = vadd.f32 %v3526_v47, %v1377_v59  ;;  %v2931_v63 = vpop.f32.mrb[25].mxu0 }
0x130c   : > { %v1380_v0 = vpop.f32.mrb[26].mxu0 }
0x130d   : > { %v1385_v6 = vmul.f32 %v1384_v60, %v3832_v62  ;;  %v2932_v7 = vpop.f32.mrb[27].mxu0 }
0x130e   : > { %v1544_v7 = vsub.s32 4, %v3457_v14 }
0x130f   : > { %v1386_v10 = vadd.f32 %v1385_v6, %v3800_v31 }
0x1311   : > { %1399 = vperm.xlu0 %3147, %v1386_v10   ;;  %1389 = vperm.xlu1 %3146, %v1386_v10  }
0x1315   : > { %3148 = vset.pattern.permute.xlu1 %v3311_v4  ;;  %3150 = vset.pattern.permute.xlu0 %v3309_v1 }
0x1316   : > { %1405 = vperm.xlu1 %3148, %v1386_v10  }
0x131a   : > { %3149 = vset.pattern.permute.xlu1 %v3312_v5 }
0x131b   : > { %1411 = vperm.xlu1 %3149, %v1386_v10  }
0x131f   : > { %3151 = vset.pattern.permute.xlu1 %v3310_v2 }
0x1390   : > { %v1390_v47 = vpop.permute.xlu1 %1389  ;;  %v1400_v15 = vpop.permute.xlu0 %1399 }
0x1391   : > { %v1392_v13 = vmul.f32 %v1390_v47, %v3478_v22  ;;  %v1402_v18 = vmul.f32 %v1400_v15, %v3484_v25 }
0x1393   : > { %v1397_v17 = vadd.f32 %v1396_v11, %v1392_v13 }
0x1395   : > { %v1406_v19 = vpop.permute.xlu1 %1405  ;;  %v1403_v16 = vadd.f32 %v1402_v18, %v1397_v17 }
0x1396   : > { %v1408_v24 = vmul.f32 %v1406_v19, %v3496_v32 }
0x1398   : > { %v1409_v27 = vadd.f32 %v1408_v24, %v1403_v16 }
0x139a   : > { %v1412_v26 = vpop.permute.xlu1 %1411 }
0x139b   : > { %v1414_v30 = vmul.f32 %v1412_v26, %v3499_v33 }
0x139d   : > { %v1415_v20 = vadd.f32 %v1414_v30, %v1409_v27 }
0x139f   : > { %3233 = vtanh.f32 %v1415_v20 }
0x13a9   : > { %v3234_v35 = vpop.eup %3233 }
0x13aa   : > { %v1417_v36 = vpack.c.bf16 %v3234_v35, %v3234_v35 }
0x13ac   : > { %2938 = vmatmul.mubr.msk.bf16.vlgmr.msra.gmra.mrb[24].mxu1 %vm409_vm1, %v1417_v36 }
0x13ad   : > { %2950 = vmatpush3.bf16.msra.mxu1 %v3433_v8  ;;  %2953 = vmatprep.mubr.msk.bf16.mxu1 %vm3314_vm0, %v3313_v9 }
0x13ae   : > { %2951 = vmatprep.subr.bf16.mxu1 %v3313_v9 }
0x13b1   : > { %2952 = vmatpush3.bf16.msra.mxu1 %v3447_v12 }
0x13b2   : > { %2965 = vmatprep.subr.bf16.mxu1 %v3313_v9 }
0x147f   : > { %v1455_v29 = vpop.f32.mrb[24].mxu1 }
0x1480   : > { %v3859_v38 = vadd.f32 %v3856_v28, %v1455_v29  ;;  %v2939_v39 = vpop.f32.mrb[25].mxu1 }
0x1481   : > { %v1458_v40 = vpop.f32.mrb[26].mxu1 }
0x1482   : > { %v1461_v3 = vmul.f32 %v3859_v38, %v1384_v60  ;;  %v2940_v50 = vpop.f32.mrb[27].mxu1 }
0x1484   : > { %v1462_v21 = vadd.f32 %v1461_v3, %v3800_v31 }
0x1486   : > { %1471 = vperm.xlu1 %3151, %v1462_v21   ;;  %1465 = vperm.xlu0 %3150, %v1462_v21  }
0x148a   : > { %3152 = vset.pattern.permute.xlu1 %v3311_v4  ;;  %3153 = vset.pattern.permute.xlu0 %v3312_v5 }
0x148b   : > { %1477 = vperm.xlu1 %3152, %v1462_v21   ;;  %1483 = vperm.xlu0 %3153, %v1462_v21   ;;  %v1615_v21 = vstv %s1610_s17 }
0x148f   : > { %3154 = vset.pattern.permute.xlu1 %v3309_v1  ;;  %3156 = vset.pattern.permute.xlu0 %v3311_v4 }
0x1505   : > { %v1472_v42 = vpop.permute.xlu1 %1471  ;;  %v1466_v41 = vpop.permute.xlu0 %1465 }
0x1506   : > { %v1468_v57 = vmul.f32 %v1466_v41, %v3478_v22  ;;  %v1474_v43 = vmul.f32 %v1472_v42, %v3484_v25 }
0x1508   : > { %v1469_v61 = vadd.f32 %v1468_v57, %v1396_v11  ;;  %v1545_v11 = vrot.slane %v3480_v23, %v1544_v7 }
0x150a   : > { %v1478_v37 = vpop.permute.xlu1 %1477  ;;  %v1475_v44 = vadd.f32 %v1474_v43, %v1469_v61  ;;  %v1484_v45 = vpop.permute.xlu0 %1483 }
0x150b   : > { %v1480_v46 = vmul.f32 %v1478_v37, %v3496_v32  ;;  %v1486_v49 = vmul.f32 %v1484_v45, %v3499_v33 }
0x150d   : > { %v1481_v48 = vadd.f32 %v1480_v46, %v1475_v44 }
0x150f   : > { %v1487_v51 = vadd.f32 %v1486_v49, %v1481_v48 }
0x1511   : > { %3235 = vtanh.f32 %v1487_v51 }
0x151b   : > { %v3236_v52 = vpop.eup %3235 }
0x151c   : > { %v1489_v53 = vpack.c.bf16 %v3236_v52, %v3236_v52 }
0x151e   : > { %2946 = vmatmul.mubr.msk.bf16.vlgmr.msra.gmra.mrb[28].mxu0 %vm409_vm1, %v1489_v53 }
0x151f   : > { %2958 = vmatpush3.bf16.msra.mxu0 %v3433_v8  ;;  %2961 = vmatprep.mubr.msk.bf16.mxu0 %vm3314_vm0, %v3313_v9 }
0x1520   : > { %2959 = vmatprep.subr.bf16.mxu0 %v3313_v9 }
0x1523   : > { %2960 = vmatpush3.bf16.msra.mxu0 %v3447_v12 }
0x1524   : > { %2973 = vmatprep.subr.bf16.mxu0 %v3313_v9 }
0x15f1   : > { %v1527_v54 = vpop.f32.mrb[28].mxu0 }
0x15f2   : > { %v1528_v56 = vadd.f32 %v3856_v28, %v1527_v54  ;;  %v2947_v59 = vpop.f32.mrb[29].mxu0 }
0x15f3   : > { %v1530_v60 = vpop.f32.mrb[30].mxu0  ;;  %v1694_v59 = vstv %s1693_s27 }
0x15f4   : > { %v1534_v63 = vmul.f32 %v1533_v55, %v1528_v56  ;;  %v2948_v0 = vpop.f32.mrb[31].mxu0  ;;  %v1611_v36 = vadd.f32 %v1528_v56, %v3859_v38 }
0x15f6   : > { %v1535_v6 = vadd.f32 %v1534_v63, %v3800_v31  ;;  %v1612_v29 = vmul.f32 2.0, %v1611_v36 }
0x15f8   : > { %1554 = vperm.xlu0 %3156, %v1535_v6   ;;  %1538 = vperm.xlu1 %3154, %v1535_v6   ;;  %v1613_v3 = vadd.f32 %v1612_v29, %v3832_v62 }
0x15fc   : > { %3155 = vset.pattern.permute.xlu1 %v3310_v2  ;;  %3159 = vset.pattern.permute.xlu0 %v3310_v2 }
0x15fd   : > { %1548 = vperm.xlu1 %3155, %v1535_v6  }
0x1601   : > { %3157 = vset.pattern.permute.xlu1 %v3312_v5 }
0x1602   : > { %1560 = vperm.xlu1 %3157, %v1535_v6  }
0x1606   : > { %3158 = vset.pattern.permute.xlu1 %v3309_v1 }
0x1677   : > { %v1539_v10 = vpop.permute.xlu1 %1538  ;;  %v1555_v13 = vpop.permute.xlu0 %1554 }
0x1678   : > { %v1541_v47 = vmul.f32 %v1539_v10, %v3478_v22  ;;  %v1557_v19 = vmul.f32 %v1555_v13, %v3496_v32 }
0x167a   : > { %v1546_v17 = vadd.f32 %v1545_v11, %v1541_v47 }
0x167c   : > { %v1549_v15 = vpop.permute.xlu1 %1548 }
0x167d   : > { %v1551_v18 = vmul.f32 %v1549_v15, %v3484_v25  ;;  %v1706_v15 = vrot.slane %v3538_v58, %v1544_v7 }
0x167f   : > { %v1552_v16 = vadd.f32 %v1551_v18, %v1546_v17 }
0x1681   : > { %v1558_v24 = vadd.f32 %v1557_v19, %v1552_v16  ;;  %v1561_v26 = vpop.permute.xlu1 %1560 }
0x1682   : > { %v1563_v27 = vmul.f32 %v1561_v26, %v3499_v33 }
0x1684   : > { %v1564_v30 = vadd.f32 %v1563_v27, %v1558_v24 }
0x1686   : > { %3237 = vtanh.f32 %v1564_v30 }
0x1690   : > { %v3238_v20 = vpop.eup %3237 }
0x1691   : > { %v1566_v35 = vpack.c.bf16 %v3238_v20, %v3238_v20 }
0x1693   : > { %2954 = vmatmul.mubr.msk.bf16.vlgmr.msra.gmra.mrb[28].mxu1 %vm409_vm1, %v1566_v35 }
0x1694   : > { %2966 = vmatpush3.bf16.msra.mxu1 %v3433_v8  ;;  %2969 = vmatprep.mubr.msk.bf16.mxu1 %vm3314_vm0, %v3313_v9 }
0x1695   : > { %2967 = vmatprep.subr.bf16.mxu1 %v3313_v9 }
0x1698   : > { %2968 = vmatpush3.bf16.msra.mxu1 %v3447_v12 }
0x1699   : > { %2981 = vmatprep.subr.bf16.mxu1 %v3313_v9 }
0x1766   : > { %v1604_v39 = vpop.f32.mrb[28].mxu1 }
0x1767   : > { %v1605_v40 = vadd.f32 %v3856_v28, %v1604_v39  ;;  %v2955_v50 = vpop.f32.mrb[29].mxu1 }
0x1768   : > { %v1607_v42 = vpop.f32.mrb[30].mxu1 }
0x1769   : > { %v1614_v41 = vadd.f32 %v1613_v3, %v1605_v40  ;;  %v2956_v57 = vpop.f32.mrb[31].mxu1 }
0x176b   : > { %v1616_v43 = vmul.f32 %v1615_v21, %v1614_v41 }
0x176d   : > { %v3905_v61 = vadd.f32 %v1616_v43, %v3800_v31 }
0x176f   : > { %1631 = vperm.xlu0 %3159, %v3905_v61   ;;  %1625 = vperm.xlu1 %3158, %v3905_v61   ;;  %2719 = vst.msk [vmem:[%s3594_s19 + $0x20] sm:$0xff] %vm351_vm2, %v3905_v61 }
0x1773   : > { %3160 = vset.pattern.permute.xlu1 %v3311_v4  ;;  %3162 = vset.pattern.permute.xlu0 %v3309_v1 }
0x1774   : > { %1637 = vperm.xlu1 %3160, %v3905_v61  }
0x1778   : > { %3161 = vset.pattern.permute.xlu1 %v3312_v5 }
0x1779   : > { %1643 = vperm.xlu1 %3161, %v3905_v61  }
0x177d   : > { %3163 = vset.pattern.permute.xlu1 %v3310_v2 }
0x17ee   : > { %v1626_v31 = vpop.permute.xlu1 %1625  ;;  %v1632_v38 = vpop.permute.xlu0 %1631 }
0x17ef   : > { %v1628_v62 = vmul.f32 %v1626_v31, %v3478_v22  ;;  %v1634_v44 = vmul.f32 %v1632_v38, %v3484_v25 }
0x17f1   : > { %v1629_v37 = vadd.f32 %v1628_v62, %v1545_v11 }
0x17f3   : > { %v1638_v45 = vpop.permute.xlu1 %1637  ;;  %v1635_v46 = vadd.f32 %v1634_v44, %v1629_v37 }
0x17f4   : > { %v1640_v48 = vmul.f32 %v1638_v45, %v3496_v32 }
0x17f6   : > { %v1641_v51 = vadd.f32 %v1640_v48, %v1635_v46 }
0x17f8   : > { %v1644_v49 = vpop.permute.xlu1 %1643 }
0x17f9   : > { %v1646_v52 = vmul.f32 %v1644_v49, %v3499_v33 }
0x17fb   : > { %v1647_v53 = vadd.f32 %v1646_v52, %v1641_v51 }
0x17fd   : > { %3239 = vtanh.f32 %v1647_v53 }
0x1807   : > { %v3240_v54 = vpop.eup %3239 }
0x1808   : > { %v1649_v55 = vpack.c.bf16 %v3240_v54, %v3240_v54  ;;  %v1843_v54 = vstv %s3933_s20  ;;  %s2558_s20 = scalar_lea.vmem (%p3385_p4), %s4219_s8, %s2742_s16 }
0x180a   : > { %2962 = vmatmul.mubr.msk.bf16.vlgmr.msra.gmra.mrb[32].mxu0 %vm409_vm1, %v1649_v55 }
0x180b   : > { %2974 = vmatpush3.bf16.msra.mxu0 %v3433_v8  ;;  %2977 = vmatprep.mubr.msk.bf16.mxu0 %vm3314_vm0, %v3313_v9 }
0x180c   : > { %2975 = vmatprep.subr.bf16.mxu0 %v3313_v9 }
0x180f   : > { %2976 = vmatpush3.bf16.msra.mxu0 %v3447_v12 }
0x1810   : > { %2989 = vmatprep.subr.bf16.mxu0 %v3313_v9 }
0x18dd   : > { %v1687_v56 = vpop.f32.mrb[32].mxu0 }
0x18de   : > { %v3937_v60 = vadd.f32 %v3856_v28, %v1687_v56  ;;  %v2963_v63 = vpop.f32.mrb[33].mxu0 }
0x18df   : > { %v1690_v0 = vpop.f32.mrb[34].mxu0 }
0x18e0   : > { %v1695_v6 = vmul.f32 %v1694_v59, %v3937_v60  ;;  %v2964_v10 = vpop.f32.mrb[35].mxu0 }
0x18e1   : > { %v1854_v10 = vsub.s32 5, %v3457_v14 }
0x18e2   : > { %v1696_v47 = vadd.f32 %v1695_v6, %v3905_v61 }
0x18e4   : > { %1709 = vperm.xlu1 %3163, %v1696_v47   ;;  %1699 = vperm.xlu0 %3162, %v1696_v47  }
0x18e8   : > { %3164 = vset.pattern.permute.xlu1 %v3311_v4  ;;  %3165 = vset.pattern.permute.xlu0 %v3312_v5 }
0x18e9   : > { %1715 = vperm.xlu1 %3164, %v1696_v47   ;;  %1721 = vperm.xlu0 %3165, %v1696_v47  }
0x18ed   : > { %3166 = vset.pattern.permute.xlu1 %v3309_v1  ;;  %3168 = vset.pattern.permute.xlu0 %v3311_v4 }
0x1963   : > { %v1710_v11 = vpop.permute.xlu1 %1709  ;;  %v1700_v13 = vpop.permute.xlu0 %1699 }
0x1964   : > { %v1702_v17 = vmul.f32 %v1700_v13, %v3478_v22  ;;  %v1712_v18 = vmul.f32 %v1710_v11, %v3484_v25  ;;  %v1855_v11 = vrot.slane %v3480_v23, %v1854_v10 }
0x1966   : > { %v1707_v19 = vadd.f32 %v1706_v15, %v1702_v17 }
0x1968   : > { %v1716_v16 = vpop.permute.xlu1 %1715  ;;  %v1713_v24 = vadd.f32 %v1712_v18, %v1707_v19  ;;  %v1722_v26 = vpop.permute.xlu0 %1721 }
0x1969   : > { %v1718_v27 = vmul.f32 %v1716_v16, %v3496_v32  ;;  %v1724_v20 = vmul.f32 %v1722_v26, %v3499_v33 }
0x196b   : > { %v1719_v30 = vadd.f32 %v1718_v27, %v1713_v24 }
0x196d   : > { %v1725_v35 = vadd.f32 %v1724_v20, %v1719_v30 }
0x196f   : > { %3241 = vtanh.f32 %v1725_v35 }
0x1979   : > { %v3242_v36 = vpop.eup %3241 }
0x197a   : > { %v1727_v29 = vpack.c.bf16 %v3242_v36, %v3242_v36 }
0x197c   : > { %2970 = vmatmul.mubr.msk.bf16.vlgmr.msra.gmra.mrb[32].mxu1 %vm409_vm1, %v1727_v29 }
0x197d   : > { %2982 = vmatpush3.bf16.msra.mxu1 %v3433_v8  ;;  %2985 = vmatprep.mubr.msk.bf16.mxu1 %vm3314_vm0, %v3313_v9 }
0x197e   : > { %2983 = vmatprep.subr.bf16.mxu1 %v3313_v9 }
0x1981   : > { %2984 = vmatpush3.bf16.msra.mxu1 %v3447_v12 }
0x1982   : > { %2997 = vmatprep.subr.bf16.mxu1 %v3313_v9 }
0x1a4f   : > { %v1765_v7 = vpop.f32.mrb[32].mxu1 }
0x1a50   : > { %v3960_v39 = vadd.f32 %v3856_v28, %v1765_v7  ;;  %v2971_v40 = vpop.f32.mrb[33].mxu1 }
0x1a51   : > { %v1768_v3 = vpop.f32.mrb[34].mxu1 }
0x1a52   : > { %v1771_v50 = vmul.f32 %v3960_v39, %v1694_v59  ;;  %v2972_v21 = vpop.f32.mrb[35].mxu1 }
0x1a54   : > { %v1772_v42 = vadd.f32 %v1771_v50, %v3905_v61 }
0x1a56   : > { %1787 = vperm.xlu0 %3168, %v1772_v42   ;;  %1775 = vperm.xlu1 %3166, %v1772_v42  }
0x1a5a   : > { %3167 = vset.pattern.permute.xlu1 %v3310_v2  ;;  %3171 = vset.pattern.permute.xlu0 %v3310_v2 }
0x1a5b   : > { %1781 = vperm.xlu1 %3167, %v1772_v42  }
0x1a5f   : > { %3169 = vset.pattern.permute.xlu1 %v3312_v5 }
0x1a60   : > { %1793 = vperm.xlu1 %3169, %v1772_v42   ;;  %v1925_v42 = vstv %s1920_s21 }
0x1a64   : > { %3170 = vset.pattern.permute.xlu1 %v3309_v1 }
0x1ad5   : > { %v1776_v41 = vpop.permute.xlu1 %1775  ;;  %v1788_v43 = vpop.permute.xlu0 %1787 }
0x1ad6   : > { %v1778_v57 = vmul.f32 %v1776_v41, %v3478_v22  ;;  %v1790_v37 = vmul.f32 %v1788_v43, %v3496_v32 }
0x1ad8   : > { %v1779_v62 = vadd.f32 %v1778_v57, %v1706_v15 }
0x1ada   : > { %v1782_v31 = vpop.permute.xlu1 %1781 }
0x1adb   : > { %v1784_v38 = vmul.f32 %v1782_v31, %v3484_v25 }
0x1add   : > { %v1785_v44 = vadd.f32 %v1784_v38, %v1779_v62 }
0x1adf   : > { %v1791_v45 = vadd.f32 %v1790_v37, %v1785_v44  ;;  %v1794_v46 = vpop.permute.xlu1 %1793 }
0x1ae0   : > { %v1796_v48 = vmul.f32 %v1794_v46, %v3499_v33 }
0x1ae2   : > { %v1797_v49 = vadd.f32 %v1796_v48, %v1791_v45 }
0x1ae4   : > { %3243 = vtanh.f32 %v1797_v49 }
0x1aee   : > { %v3244_v51 = vpop.eup %3243 }
0x1aef   : > { %v1799_v52 = vpack.c.bf16 %v3244_v51, %v3244_v51 }
0x1af1   : > { %2978 = vmatmul.mubr.msk.bf16.vlgmr.msra.gmra.mrb[36].mxu0 %vm409_vm1, %v1799_v52 }
0x1af2   : > { %2990 = vmatpush3.bf16.msra.mxu0 %v3433_v8  ;;  %2993 = vmatprep.mubr.msk.bf16.mxu0 %vm3314_vm0, %v3313_v9 }
0x1af3   : > { %2991 = vmatprep.subr.bf16.mxu0 %v3313_v9 }
0x1af6   : > { %2992 = vmatpush3.bf16.msra.mxu0 %v3447_v12 }
0x1af7   : > { %3005 = vmatprep.subr.bf16.mxu0 %v3313_v9 }
0x1bc4   : > { %v1837_v53 = vpop.f32.mrb[36].mxu0 }
0x1bc5   : > { %v1838_v55 = vadd.f32 %v3856_v28, %v1837_v53  ;;  %v2979_v56 = vpop.f32.mrb[37].mxu0 }
0x1bc6   : > { %v1840_v59 = vpop.f32.mrb[38].mxu0  ;;  %v2004_v56 = vstv %s2003_s24 }
0x1bc7   : > { %v1844_v63 = vmul.f32 %v1843_v54, %v1838_v55  ;;  %v2980_v0 = vpop.f32.mrb[39].mxu0  ;;  %v1921_v29 = vadd.f32 %v1838_v55, %v3960_v39 }
0x1bc9   : > { %v1845_v6 = vadd.f32 %v1844_v63, %v3905_v61  ;;  %v1922_v7 = vmul.f32 2.0, %v1921_v29 }
0x1bcb   : > { %1858 = vperm.xlu0 %3171, %v1845_v6   ;;  %1848 = vperm.xlu1 %3170, %v1845_v6   ;;  %v1923_v50 = vadd.f32 %v1922_v7, %v3937_v60 }
0x1bcf   : > { %3172 = vset.pattern.permute.xlu1 %v3311_v4  ;;  %3174 = vset.pattern.permute.xlu0 %v3309_v1 }
0x1bd0   : > { %1864 = vperm.xlu1 %3172, %v1845_v6  }
0x1bd4   : > { %3173 = vset.pattern.permute.xlu1 %v3312_v5 }
0x1bd5   : > { %1870 = vperm.xlu1 %3173, %v1845_v6  }
0x1bd9   : > { %3175 = vset.pattern.permute.xlu1 %v3310_v2 }
0x1c4a   : > { %v1849_v47 = vpop.permute.xlu1 %1848  ;;  %v1859_v15 = vpop.permute.xlu0 %1858 }
0x1c4b   : > { %v1851_v13 = vmul.f32 %v1849_v47, %v3478_v22  ;;  %v1861_v18 = vmul.f32 %v1859_v15, %v3484_v25 }
0x1c4d   : > { %v1856_v17 = vadd.f32 %v1855_v11, %v1851_v13 }
0x1c4f   : > { %v1865_v19 = vpop.permute.xlu1 %1864  ;;  %v1862_v16 = vadd.f32 %v1861_v18, %v1856_v17  ;;  %v2016_v17 = vrot.slane %v3538_v58, %v1854_v10 }
0x1c50   : > { %v1867_v24 = vmul.f32 %v1865_v19, %v3496_v32 }
0x1c52   : > { %v1868_v27 = vadd.f32 %v1867_v24, %v1862_v16 }
0x1c54   : > { %v1871_v26 = vpop.permute.xlu1 %1870 }
0x1c55   : > { %v1873_v30 = vmul.f32 %v1871_v26, %v3499_v33 }
0x1c57   : > { %v1874_v20 = vadd.f32 %v1873_v30, %v1868_v27 }
0x1c59   : > { %3245 = vtanh.f32 %v1874_v20 }
0x1c63   : > { %v3246_v35 = vpop.eup %3245 }
0x1c64   : > { %v1876_v36 = vpack.c.bf16 %v3246_v35, %v3246_v35 }
0x1c66   : > { %2986 = vmatmul.mubr.msk.bf16.vlgmr.msra.gmra.mrb[36].mxu1 %vm409_vm1, %v1876_v36 }
0x1c67   : > { %2998 = vmatpush3.bf16.msra.mxu1 %v3433_v8  ;;  %3001 = vmatprep.mubr.msk.bf16.mxu1 %vm3314_vm0, %v3313_v9 }
0x1c68   : > { %2999 = vmatprep.subr.bf16.mxu1 %v3313_v9 }
0x1c6b   : > { %3000 = vmatpush3.bf16.msra.mxu1 %v3447_v12 }
0x1c6c   : > { %3013 = vmatprep.subr.bf16.mxu1 %v3313_v9 }
0x1d39   : > { %v1914_v40 = vpop.f32.mrb[36].mxu1 }
0x1d3a   : > { %v1915_v3 = vadd.f32 %v3856_v28, %v1914_v40  ;;  %v2987_v21 = vpop.f32.mrb[37].mxu1 }
0x1d3b   : > { %v1917_v41 = vpop.f32.mrb[38].mxu1 }
0x1d3c   : > { %v1924_v57 = vadd.f32 %v1923_v50, %v1915_v3  ;;  %v2988_v43 = vpop.f32.mrb[39].mxu1 }
0x1d3e   : > { %v1926_v31 = vmul.f32 %v1925_v42, %v1924_v57 }
0x1d40   : > { %v4006_v62 = vadd.f32 %v1926_v31, %v3905_v61 }
0x1d42   : > { %1941 = vperm.xlu1 %3175, %v4006_v62   ;;  %1935 = vperm.xlu0 %3174, %v4006_v62   ;;  %2726 = vst.msk [vmem:[%s3594_s19 + $0x28] sm:$0xff] %vm351_vm2, %v4006_v62 }
0x1d46   : > { %3176 = vset.pattern.permute.xlu1 %v3311_v4  ;;  %3177 = vset.pattern.permute.xlu0 %v3312_v5 }
0x1d47   : > { %1947 = vperm.xlu1 %3176, %v4006_v62   ;;  %1953 = vperm.xlu0 %3177, %v4006_v62  }
0x1d4b   : > { %3178 = vset.pattern.permute.xlu1 %v3309_v1  ;;  %3180 = vset.pattern.permute.xlu0 %v3311_v4 }
0x1dc1   : > { %v1942_v61 = vpop.permute.xlu1 %1941  ;;  %v1936_v60 = vpop.permute.xlu0 %1935 }
0x1dc2   : > { %v1938_v39 = vmul.f32 %v1936_v60, %v3478_v22  ;;  %v1944_v38 = vmul.f32 %v1942_v61, %v3484_v25 }
0x1dc4   : > { %v1939_v37 = vadd.f32 %v1938_v39, %v1855_v11 }
0x1dc6   : > { %v1948_v44 = vpop.permute.xlu1 %1947  ;;  %v1945_v45 = vadd.f32 %v1944_v38, %v1939_v37  ;;  %v1954_v46 = vpop.permute.xlu0 %1953 }
0x1dc7   : > { %v1950_v48 = vmul.f32 %v1948_v44, %v3496_v32  ;;  %v1956_v51 = vmul.f32 %v1954_v46, %v3499_v33 }
0x1dc9   : > { %v1951_v49 = vadd.f32 %v1950_v48, %v1945_v45 }
0x1dcb   : > { %v1957_v52 = vadd.f32 %v1956_v51, %v1951_v49 }
0x1dcd   : > { %3247 = vtanh.f32 %v1957_v52 }
0x1dd7   : > { %v3248_v53 = vpop.eup %3247 }
0x1dd8   : > { %v1959_v54 = vpack.c.bf16 %v3248_v53, %v3248_v53  ;;  %v2153_v53 = vstv %s4034_s23 }
0x1dda   : > { %2994 = vmatmul.mubr.msk.bf16.vlgmr.msra.gmra.mrb[40].mxu0 %vm409_vm1, %v1959_v54 }
0x1ddb   : > { %3006 = vmatpush3.bf16.msra.mxu0 %v3433_v8  ;;  %3009 = vmatprep.mubr.msk.bf16.mxu0 %vm3314_vm0, %v3313_v9 }
0x1ddc   : > { %3007 = vmatprep.subr.bf16.mxu0 %v3313_v9 }
0x1ddf   : > { %3008 = vmatpush3.bf16.msra.mxu0 %v3447_v12 }
0x1de0   : > { %3021 = vmatprep.subr.bf16.mxu0 %v3313_v9 }
0x1ead   : > { %v1997_v55 = vpop.f32.mrb[40].mxu0 }
0x1eae   : > { %v4038_v59 = vadd.f32 %v3856_v28, %v1997_v55  ;;  %v2995_v63 = vpop.f32.mrb[41].mxu0 }
0x1eaf   : > { %v2000_v0 = vpop.f32.mrb[42].mxu0 }
0x1eb0   : > { %v2005_v6 = vmul.f32 %v2004_v56, %v4038_v59  ;;  %v2996_v47 = vpop.f32.mrb[43].mxu0 }
0x1eb1   : > { %v2164_v47 = vsub.s32 6, %v3457_v14 }
0x1eb2   : > { %v2006_v11 = vadd.f32 %v2005_v6, %v4006_v62 }
0x1eb4   : > { %2025 = vperm.xlu0 %3180, %v2006_v11   ;;  %2009 = vperm.xlu1 %3178, %v2006_v11  }
0x1eb8   : > { %3179 = vset.pattern.permute.xlu1 %v3310_v2  ;;  %3183 = vset.pattern.permute.xlu0 %v3310_v2 }
0x1eb9   : > { %2019 = vperm.xlu1 %3179, %v2006_v11  }
0x1ebd   : > { %3181 = vset.pattern.permute.xlu1 %v3312_v5 }
0x1ebe   : > { %2031 = vperm.xlu1 %3181, %v2006_v11  }
0x1ec2   : > { %3182 = vset.pattern.permute.xlu1 %v3309_v1 }
0x1f33   : > { %v2010_v13 = vpop.permute.xlu1 %2009  ;;  %v2026_v18 = vpop.permute.xlu0 %2025 }
0x1f34   : > { %v2012_v15 = vmul.f32 %v2010_v13, %v3478_v22  ;;  %v2028_v26 = vmul.f32 %v2026_v18, %v3496_v32 }
0x1f36   : > { %v2017_v16 = vadd.f32 %v2016_v17, %v2012_v15  ;;  %v2165_v15 = vrot.slane %v3480_v23, %v2164_v47 }
0x1f38   : > { %v2020_v19 = vpop.permute.xlu1 %2019 }
0x1f39   : > { %v2022_v24 = vmul.f32 %v2020_v19, %v3484_v25 }
0x1f3b   : > { %v2023_v27 = vadd.f32 %v2022_v24, %v2017_v16 }
0x1f3d   : > { %v2029_v30 = vadd.f32 %v2028_v26, %v2023_v27  ;;  %v2032_v20 = vpop.permute.xlu1 %2031 }
0x1f3e   : > { %v2034_v35 = vmul.f32 %v2032_v20, %v3499_v33 }
0x1f40   : > { %v2035_v36 = vadd.f32 %v2034_v35, %v2029_v30 }
0x1f42   : > { %3249 = vtanh.f32 %v2035_v36 }
0x1f4c   : > { %v3250_v29 = vpop.eup %3249 }
0x1f4d   : > { %v2037_v7 = vpack.c.bf16 %v3250_v29, %v3250_v29 }
0x1f4f   : > { %3002 = vmatmul.mubr.msk.bf16.vlgmr.msra.gmra.mrb[40].mxu1 %vm409_vm1, %v2037_v7 }
0x1f50   : > { %3014 = vmatpush3.bf16.msra.mxu1 %v3433_v8  ;;  %3017 = vmatprep.mubr.msk.bf16.mxu1 %vm3314_vm0, %v3313_v9 }
0x1f51   : > { %3015 = vmatprep.subr.bf16.mxu1 %v3313_v9 }
0x1f54   : > { %3016 = vmatpush3.bf16.msra.mxu1 %v3447_v12 }
0x1f55   : > { %3029 = vmatprep.subr.bf16.mxu1 %v3313_v9 }
0x2022   : > { %v2075_v10 = vpop.f32.mrb[40].mxu1 }
0x2023   : > { %v4061_v40 = vadd.f32 %v3856_v28, %v2075_v10  ;;  %v3003_v3 = vpop.f32.mrb[41].mxu1 }
0x2024   : > { %v2078_v50 = vpop.f32.mrb[42].mxu1 }
0x2025   : > { %v2081_v21 = vmul.f32 %v4061_v40, %v2004_v56  ;;  %v3004_v42 = vpop.f32.mrb[43].mxu1 }
0x2026   : > { %v2235_v42 = vstv %s2230_s25 }
0x2027   : > { %v2082_v41 = vadd.f32 %v2081_v21, %v4006_v62 }
0x2029   : > { %2091 = vperm.xlu0 %3183, %v2082_v41   ;;  %2085 = vperm.xlu1 %3182, %v2082_v41  }
0x202d   : > { %3184 = vset.pattern.permute.xlu1 %v3311_v4  ;;  %3186 = vset.pattern.permute.xlu0 %v3309_v1 }
0x202e   : > { %2097 = vperm.xlu1 %3184, %v2082_v41  }
0x2032   : > { %3185 = vset.pattern.permute.xlu1 %v3312_v5 }
0x2033   : > { %2103 = vperm.xlu1 %3185, %v2082_v41  }
0x2037   : > { %3187 = vset.pattern.permute.xlu1 %v3310_v2 }
0x20a8   : > { %v2086_v57 = vpop.permute.xlu1 %2085  ;;  %v2092_v31 = vpop.permute.xlu0 %2091 }
0x20a9   : > { %v2088_v43 = vmul.f32 %v2086_v57, %v3478_v22  ;;  %v2094_v60 = vmul.f32 %v2092_v31, %v3484_v25 }
0x20ab   : > { %v2089_v61 = vadd.f32 %v2088_v43, %v2016_v17 }
0x20ad   : > { %v2098_v39 = vpop.permute.xlu1 %2097  ;;  %v2095_v38 = vadd.f32 %v2094_v60, %v2089_v61 }
0x20ae   : > { %v2100_v37 = vmul.f32 %v2098_v39, %v3496_v32 }
0x20b0   : > { %v2101_v45 = vadd.f32 %v2100_v37, %v2095_v38 }
0x20b2   : > { %v2104_v44 = vpop.permute.xlu1 %2103 }
0x20b3   : > { %v2106_v46 = vmul.f32 %v2104_v44, %v3499_v33 }
0x20b5   : > { %v2107_v48 = vadd.f32 %v2106_v46, %v2101_v45 }
0x20b7   : > { %3251 = vtanh.f32 %v2107_v48 }
0x20c1   : > { %v3252_v49 = vpop.eup %3251 }
0x20c2   : > { %v2109_v51 = vpack.c.bf16 %v3252_v49, %v3252_v49 }
0x20c4   : > { %3010 = vmatmul.mubr.msk.bf16.vlgmr.msra.gmra.mrb[44].mxu0 %vm409_vm1, %v2109_v51 }
0x20c5   : > { %3022 = vmatpush3.bf16.msra.mxu0 %v3433_v8  ;;  %3025 = vmatprep.mubr.msk.bf16.mxu0 %vm3314_vm0, %v3313_v9 }
0x20c6   : > { %3023 = vmatprep.subr.bf16.mxu0 %v3313_v9 }
0x20c9   : > { %3024 = vmatpush3.bf16.msra.mxu0 %v3447_v12 }
0x20ca   : > { %3037 = vmatprep.subr.bf16.mxu0 %v3313_v9 }
0x2197   : > { %v2147_v52 = vpop.f32.mrb[44].mxu0 }
0x2198   : > { %v2148_v54 = vadd.f32 %v3856_v28, %v2147_v52  ;;  %v3011_v55 = vpop.f32.mrb[45].mxu0 }
0x2199   : > { %v2150_v56 = vpop.f32.mrb[46].mxu0 }
0x219a   : > { %v2154_v63 = vmul.f32 %v2153_v53, %v2148_v54  ;;  %v3012_v0 = vpop.f32.mrb[47].mxu0  ;;  %v2231_v23 = vadd.f32 %v2148_v54, %v4061_v40  ;;  %v2314_v54 = vstv %s2313_s10 }
0x219c   : > { %v2155_v6 = vadd.f32 %v2154_v63, %v4006_v62  ;;  %v2232_v7 = vmul.f32 2.0, %v2231_v23 }
0x219e   : > { %2168 = vperm.xlu1 %3187, %v2155_v6   ;;  %2158 = vperm.xlu0 %3186, %v2155_v6   ;;  %v2233_v50 = vadd.f32 %v2232_v7, %v4038_v59 }
0x21a2   : > { %3188 = vset.pattern.permute.xlu1 %v3311_v4  ;;  %3189 = vset.pattern.permute.xlu0 %v3312_v5 }
0x21a3   : > { %2174 = vperm.xlu1 %3188, %v2155_v6   ;;  %2180 = vperm.xlu0 %3189, %v2155_v6  }
0x21a7   : > { %3190 = vset.pattern.permute.xlu1 %v3309_v1  ;;  %3192 = vset.pattern.permute.xlu0 %v3311_v4 }
0x221d   : > { %v2169_v11 = vpop.permute.xlu1 %2168  ;;  %v2159_v13 = vpop.permute.xlu0 %2158 }
0x221e   : > { %v2161_v17 = vmul.f32 %v2159_v13, %v3478_v22  ;;  %v2171_v18 = vmul.f32 %v2169_v11, %v3484_v25 }
0x2220   : > { %v2166_v19 = vadd.f32 %v2165_v15, %v2161_v17 }
0x2222   : > { %v2175_v16 = vpop.permute.xlu1 %2174  ;;  %v2172_v24 = vadd.f32 %v2171_v18, %v2166_v19  ;;  %v2181_v26 = vpop.permute.xlu0 %2180 }
0x2223   : > { %v2177_v27 = vmul.f32 %v2175_v16, %v3496_v32  ;;  %v2183_v20 = vmul.f32 %v2181_v26, %v3499_v33 }
0x2225   : > { %v2178_v30 = vadd.f32 %v2177_v27, %v2172_v24 }
0x2227   : > { %v2184_v35 = vadd.f32 %v2183_v20, %v2178_v30 }
0x2229   : > { %3253 = vtanh.f32 %v2184_v35 }
0x2233   : > { %v3254_v36 = vpop.eup %3253 }
0x2234   : > { %v2186_v29 = vpack.c.bf16 %v3254_v36, %v3254_v36 }
0x2236   : > { %3018 = vmatmul.mubr.msk.bf16.vlgmr.msra.gmra.mrb[44].mxu1 %vm409_vm1, %v2186_v29 }
0x2237   : > { %3030 = vmatpush3.bf16.msra.mxu1 %v3433_v8  ;;  %3033 = vmatprep.mubr.msk.bf16.mxu1 %vm3314_vm0, %v3313_v9 }
0x2238   : > { %3031 = vmatprep.subr.bf16.mxu1 %v3313_v9 }
0x223b   : > { %3032 = vmatpush3.bf16.msra.mxu1 %v3447_v12 }
0x223c   : > { %3045 = vmatprep.subr.bf16.mxu1 %v3313_v9 }
0x2309   : > { %v2224_v10 = vpop.f32.mrb[44].mxu1 }
0x230a   : > { %v2225_v3 = vadd.f32 %v3856_v28, %v2224_v10  ;;  %v3019_v21 = vpop.f32.mrb[45].mxu1 }
0x230b   : > { %v2227_v41 = vpop.f32.mrb[46].mxu1 }
0x230c   : > { %v2234_v57 = vadd.f32 %v2233_v50, %v2225_v3  ;;  %v3020_v43 = vpop.f32.mrb[47].mxu1 }
0x230e   : > { %v2236_v31 = vmul.f32 %v2235_v42, %v2234_v57 }
0x2310   : > { %v4107_v61 = vadd.f32 %v2236_v31, %v4006_v62 }
0x2312   : > { %2257 = vperm.xlu0 %3192, %v4107_v61   ;;  %2245 = vperm.xlu1 %3190, %v4107_v61   ;;  %2733 = vst.msk [vmem:[%s3594_s19 + $0x30] sm:$0xff] %vm351_vm2, %v4107_v61 }
0x2316   : > { %3191 = vset.pattern.permute.xlu1 %v3310_v2  ;;  %3195 = vset.pattern.permute.xlu0 %v3310_v2 }
0x2317   : > { %2251 = vperm.xlu1 %3191, %v4107_v61  }
0x231b   : > { %3193 = vset.pattern.permute.xlu1 %v3312_v5 }
0x231c   : > { %2263 = vperm.xlu1 %3193, %v4107_v61  }
0x2320   : > { %3194 = vset.pattern.permute.xlu1 %v3309_v1 }
0x2391   : > { %v2246_v62 = vpop.permute.xlu1 %2245  ;;  %v2258_v40 = vpop.permute.xlu0 %2257 }
0x2392   : > { %v2248_v59 = vmul.f32 %v2246_v62, %v3478_v22  ;;  %v2260_v37 = vmul.f32 %v2258_v40, %v3496_v32 }
0x2394   : > { %v2249_v39 = vadd.f32 %v2248_v59, %v2165_v15  ;;  %v2326_v15 = vrot.slane %v3538_v58, %v2164_v47 }
0x2396   : > { %v2252_v60 = vpop.permute.xlu1 %2251 }
0x2397   : > { %v2254_v38 = vmul.f32 %v2252_v60, %v3484_v25 }
0x2399   : > { %v2255_v44 = vadd.f32 %v2254_v38, %v2249_v39  ;;  %v2463_v39 = vstv %s4131_s29 }
0x239b   : > { %v2261_v45 = vadd.f32 %v2260_v37, %v2255_v44  ;;  %v2264_v46 = vpop.permute.xlu1 %2263 }
0x239c   : > { %v2266_v48 = vmul.f32 %v2264_v46, %v3499_v33 }
0x239e   : > { %v2267_v49 = vadd.f32 %v2266_v48, %v2261_v45 }
0x23a0   : > { %3255 = vtanh.f32 %v2267_v49 }
0x23aa   : > { %v3256_v51 = vpop.eup %3255 }
0x23ab   : > { %v2269_v52 = vpack.c.bf16 %v3256_v51, %v3256_v51 }
0x23ad   : > { %3026 = vmatmul.mubr.msk.bf16.vlgmr.msra.gmra.mrb[48].mxu0 %vm409_vm1, %v2269_v52 }
0x23ae   : > { %3038 = vmatpush3.bf16.msra.mxu0 %v3433_v8  ;;  %3041 = vmatprep.mubr.msk.bf16.mxu0 %vm3314_vm0, %v3313_v9 }
0x23af   : > { %3039 = vmatprep.subr.bf16.mxu0 %v3313_v9 }
0x23b2   : > { %3040 = vmatpush3.bf16.msra.mxu0 %v3447_v12 }
0x2480   : > { %v2307_v53 = vpop.f32.mrb[48].mxu0 }
0x2481   : > { %v4135_v55 = vadd.f32 %v3856_v28, %v2307_v53  ;;  %v3027_v56 = vpop.f32.mrb[49].mxu0 }
0x2482   : > { %v2310_v63 = vpop.f32.mrb[50].mxu0 }
0x2483   : > { %v2315_v0 = vmul.f32 %v2314_v54, %v4135_v55  ;;  %v3028_v6 = vpop.f32.mrb[51].mxu0 }
0x2485   : > { %v2316_v11 = vadd.f32 %v2315_v0, %v4107_v61 }
0x2487   : > { %2329 = vperm.xlu0 %3195, %v2316_v11   ;;  %2319 = vperm.xlu1 %3194, %v2316_v11  }
0x248b   : > { %3196 = vset.pattern.permute.xlu1 %v3311_v4  ;;  %3198 = vset.pattern.permute.xlu0 %v3309_v1 }
0x248c   : > { %2335 = vperm.xlu1 %3196, %v2316_v11  }
0x2490   : > { %3197 = vset.pattern.permute.xlu1 %v3312_v5 }
0x2491   : > { %2341 = vperm.xlu1 %3197, %v2316_v11  }
0x2495   : > { %3199 = vset.pattern.permute.xlu1 %v3310_v2 }
0x2506   : > { %v2320_v13 = vpop.permute.xlu1 %2319  ;;  %v2330_v18 = vpop.permute.xlu0 %2329 }
0x2507   : > { %v2322_v17 = vmul.f32 %v2320_v13, %v3478_v22  ;;  %v2332_v16 = vmul.f32 %v2330_v18, %v3484_v25 }
0x2509   : > { %v2327_v19 = vadd.f32 %v2326_v15, %v2322_v17 }
0x250b   : > { %v2336_v24 = vpop.permute.xlu1 %2335  ;;  %v2333_v26 = vadd.f32 %v2332_v16, %v2327_v19 }
0x250c   : > { %v2338_v27 = vmul.f32 %v2336_v24, %v3496_v32 }
0x250e   : > { %v2339_v20 = vadd.f32 %v2338_v27, %v2333_v26 }
0x2510   : > { %v2342_v30 = vpop.permute.xlu1 %2341 }
0x2511   : > { %v2344_v35 = vmul.f32 %v2342_v30, %v3499_v33  ;;  %v2602_v30 = vld [vmem:[%s3594_s19 + $0x8] sm:$0xff] (%p3385_p4) }
0x2512   : > { %2603 = vst [vmem:[%s2558_s20 + $0x10] sm:$0xff] (%p3385_p4), %v2602_v30 }
0x2513   : > { %v2345_v36 = vadd.f32 %v2344_v35, %v2339_v20  ;;  %v2604_v20 = vld [vmem:[%s3594_s19 + $0x10] sm:$0xff] (%p3385_p4)  ;;  %v2608_v35 = vld [vmem:[%s3594_s19 + $0x20] sm:$0xff] (%p3385_p4) }
0x2514   : > { %2605 = vst [vmem:[%s2558_s20 + $0x20] sm:$0xff] (%p3385_p4), %v2604_v20  ;;  %2609 = vst [vmem:[%s2558_s20 + $0x40] sm:$0xff] (%p3385_p4), %v2608_v35 }
0x2515   : > { %3257 = vtanh.f32 %v2345_v36  ;;  %v2610_v36 = vld [vmem:[%s3594_s19 + $0x28] sm:$0xff] (%p3385_p4) }
0x2516   : > { %2611 = vst [vmem:[%s2558_s20 + $0x50] sm:$0xff] (%p3385_p4), %v2610_v36 }
0x251f   : > { %v3258_v29 = vpop.eup %3257 }
0x2520   : > { %v2347_v14 = vpack.c.bf16 %v3258_v29, %v3258_v29  ;;  %v2612_v29 = vld [vmem:[%s3594_s19 + $0x30] sm:$0xff] (%p3385_p4) }
0x2521   : > { %2613 = vst [vmem:[%s2558_s20 + $0x60] sm:$0xff] (%p3385_p4), %v2612_v29 }
0x2522   : > { %3034 = vmatmul.mubr.msk.bf16.vlgmr.msra.gmra.mrb[48].mxu1 %vm409_vm1, %v2347_v14 }
0x2523   : > { %3046 = vmatpush3.bf16.msra.mxu1 %v3433_v8  ;;  %3049 = vmatprep.mubr.msk.bf16.mxu1 %vm3314_vm0, %v3313_v9 }
0x2524   : > { %3047 = vmatprep.subr.bf16.mxu1 %v3313_v9 }
0x2527   : > { %3048 = vmatpush3.bf16.msra.mxu1 %v3447_v12 }
0x25f5   : > { %v2385_v58 = vpop.f32.mrb[48].mxu1 }
0x25f6   : > { %v2386_v47 = vadd.f32 %v3856_v28, %v2385_v58  ;;  %v3035_v23 = vpop.f32.mrb[49].mxu1 }
0x25f7   : > { %v2388_v7 = vpop.f32.mrb[50].mxu1 }
0x25f8   : > { %v2391_v10 = vmul.f32 %v2386_v47, %v2314_v54  ;;  %v3036_v3 = vpop.f32.mrb[51].mxu1 }
0x25fa   : > { %v2392_v50 = vadd.f32 %v2391_v10, %v4107_v61 }
0x25fc   : > { %2401 = vperm.xlu1 %3199, %v2392_v50   ;;  %2395 = vperm.xlu0 %3198, %v2392_v50  }
0x2600   : > { %3200 = vset.pattern.permute.xlu1 %v3311_v4  ;;  %3201 = vset.pattern.permute.xlu0 %v3312_v5 }
0x2601   : > { %2407 = vperm.xlu1 %3200, %v2392_v50   ;;  %2413 = vperm.xlu0 %3201, %v2392_v50  }
0x2605   : > { %3202 = vset.pattern.permute.xlu1 %v3309_v1  ;;  %3204 = vset.pattern.permute.xlu0 %v3311_v4 }
0x267b   : > { %v2402_v8 = vpop.permute.xlu1 %2401  ;;  %v2396_v9 = vpop.permute.xlu0 %2395 }
0x267c   : > { %v2398_v12 = vmul.f32 %v2396_v9, %v3478_v22  ;;  %v2404_v21 = vmul.f32 %v2402_v8, %v3484_v25 }
0x267e   : > { %v2399_v42 = vadd.f32 %v2398_v12, %v2326_v15 }
0x2680   : > { %v2408_v41 = vpop.permute.xlu1 %2407  ;;  %v2405_v57 = vadd.f32 %v2404_v21, %v2399_v42  ;;  %v2414_v43 = vpop.permute.xlu0 %2413 }
0x2681   : > { %v2410_v31 = vmul.f32 %v2408_v41, %v3496_v32  ;;  %v2416_v59 = vmul.f32 %v2414_v43, %v3499_v33 }
0x2683   : > { %v2411_v62 = vadd.f32 %v2410_v31, %v2405_v57 }
0x2685   : > { %v2417_v40 = vadd.f32 %v2416_v59, %v2411_v62 }
0x2687   : > { %3259 = vtanh.f32 %v2417_v40 }
0x2691   : > { %v3260_v1 = vpop.eup %3259 }
0x2692   : > { %v2419_v4 = vpack.c.bf16 %v3260_v1, %v3260_v1 }
0x2694   : > { %3042 = vmatmul.mubr.msk.bf16.vlgmr.msra.gmra.mrb[52].mxu0 %vm409_vm1, %v2419_v4 }
0x2767   : > { %v2457_v60 = vpop.f32.mrb[52].mxu0 }
0x2768   : > { %v2458_v38 = vadd.f32 %v3856_v28, %v2457_v60  ;;  %v3043_v37 = vpop.f32.mrb[53].mxu0 }
0x2769   : > { %v2460_v44 = vpop.f32.mrb[54].mxu0 }
0x276a   : > { %v2464_v45 = vmul.f32 %v2463_v39, %v2458_v38  ;;  %v3044_v46 = vpop.f32.mrb[55].mxu0 }
0x276c   : > { %v2465_v48 = vadd.f32 %v2464_v45, %v4107_v61 }
0x276e   : > { %2484 = vperm.xlu0 %3204, %v2465_v48   ;;  %2468 = vperm.xlu1 %3202, %v2465_v48  }
0x2772   : > { %3203 = vset.pattern.permute.xlu1 %v3310_v2  ;;  %3206 = vset.pattern.permute.xlu0 %v3312_v5 }
0x2773   : > { %2478 = vperm.xlu1 %3203, %v2465_v48  }
0x2777   : > { %3205 = vset.pattern.permute.xlu1 %v3312_v5 }
0x2778   : > { %2490 = vperm.xlu1 %3205, %v2465_v48  }
0x27ed   : > { %v2469_v49 = vpop.permute.xlu1 %2468  ;;  %v2485_v28 = vpop.permute.xlu0 %2484 }
0x27ee   : > { %v2471_v51 = vmul.f32 %v2469_v49, %v3478_v22  ;;  %v2487_v56 = vmul.f32 %v2485_v28, %v3496_v32  ;;  %v2541_v22 = vadd.f32 %v2458_v38, %v2386_v47 }
0x27f0   : > { %v2476_v53 = vadd.f32 %v3502_v34, %v2471_v51  ;;  %v2542_v15 = vmul.f32 2.0, %v2541_v22 }
0x27f2   : > { %v2479_v52 = vpop.permute.xlu1 %2478  ;;  %v2543_v17 = vadd.f32 %v2542_v15, %v4135_v55  ;;  %v2600_v55 = vld [vmem:[%s3594_s19] sm:$0xff] (%p3385_p4) }
0x27f3   : > { %v2481_v54 = vmul.f32 %v2479_v52, %v3484_v25  ;;  %v3264_v25 = vld [vmem:[%s4218_s7] ss:$0 sm:$0xff]  ;;  %2601 = vst [vmem:[%s2558_s20] sm:$0xff] (%p3385_p4), %v2600_v55 }
0x27f5   : > { %v2482_v63 = vadd.f32 %v2481_v54, %v2476_v53 }
0x27f7   : > { %v2488_v2 = vadd.f32 %v2487_v56, %v2482_v63  ;;  %v2491_v0 = vpop.permute.xlu1 %2490 }
0x27f8   : > { %v2493_v6 = vmul.f32 %v2491_v0, %v3499_v33  ;;  %v2545_v33 = vstv %s2540_s11 }
0x27fa   : > { %v2494_v11 = vadd.f32 %v2493_v6, %v2488_v2 }
0x27fc   : > { %3261 = vtanh.f32 %v2494_v11 }
0x2806   : > { %v3262_v5 = vpop.eup %3261 }
0x2807   : > { %v2496_v13 = vpack.c.bf16 %v3262_v5, %v3262_v5 }
0x2809   : > { %3050 = vmatmul.mubr.msk.bf16.vlgmr.msra.gmra.mrb[52].mxu1 %vm409_vm1, %v2496_v13 }
0x28dc   : > { %v2534_v34 = vpop.f32.mrb[52].mxu1 }
0x28dd   : > { %v2535_v32 = vadd.f32 %v3264_v25, %v2534_v34  ;;  %v3051_v18 = vpop.f32.mrb[53].mxu1 }
0x28de   : > { %v2537_v19 = vpop.f32.mrb[54].mxu1 }
0x28df   : > { %v2544_v16 = vadd.f32 %v2543_v17, %v2535_v32  ;;  %v3052_v24 = vpop.f32.mrb[55].mxu1  ;;  %2556 = sbr.rel (!%p3385_p4) target bundleno = 10478 (0x28ee), region = 60 }
0x28e1   : > { %v2546_v26 = vmul.f32 %v2545_v33, %v2544_v16 }
0x28e3   : > { %v2547_v27 = vadd.f32 %v2546_v26, %v4107_v61  ;;  %v2606_v61 = vld [vmem:[%s3594_s19 + $0x18] sm:$0xff] (%p3385_p4) }
0x28e4   : > { %2607 = vst [vmem:[%s2558_s20 + $0x30] sm:$0xff] (%p3385_p4), %v2606_v61 }
0x28e5   : > { %2740 = vst.msk [vmem:[%s3594_s19 + $0x38] sm:$0xff] %vm351_vm2, %v2547_v27 }
0x28ec   : > { %v2614_v14 = vld [vmem:[%s3594_s19 + $0x38] sm:$0xff] }
0x28ed   : > { %2615 = vst [vmem:[%s2558_s20 + $0x70] sm:$0xff] %v2614_v14 }
0x28ee PF: > { %p16_p4 = scmp.ge.s32.totalorder %s3375_s9, 4   ;;  %s4222_s27 = smov %s3302_s28 }
0x28ef   : > { %s4223_s28 = smov %s3383_s12  ;;  %s4224_s29 = smov %s3375_s9 }
0x28f0   :  { %18 = sbr.rel (!%p16_p4) target bundleno = 2 (0x2), region = 132 }
0x28f7   :  { %2631 = vsyncpa [#allocation3], 1 }
0x28f8   :  { %2633 = vsyncpa [#allocation3 + $0x1], 1 }

</bundles_post_ra>
